<compile_context>
chip_gen: v5e
topology: v5e:2x2
jax: 0.10.0
libtpu: 0.0.40
codegen_flags: <defaults>
</compile_context>

<pallas_src>
import functools
import numpy as np

import jax
import jax.numpy as jnp
from jax.experimental import pallas as pl
from jax.experimental.pallas import tpu as pltpu


_LN_EPS = 1e-5
_SQRT_2_OVER_PI = 0.7978845608028654
_NEG_INF = -1e30


def _gelu_tanh(z):
    return 0.5 * z * (1.0 + jnp.tanh(_SQRT_2_OVER_PI * (z + 0.044715 * z * z * z)))


# ----------------------------------------------------------------------------
# Fused SpaceTimeBlock kernel (block_batch batch elements per grid step)
# ----------------------------------------------------------------------------

def _spacetime_block_kernel(
        x_ref,                                # (Bb*Tp, D)  f32  (token-padded, flattened)
        ln_ref,                               # (6, D)      f32  rows: n1g n1b n2g n2b n3g n3b
        mask_ref,                             # (2, Tp, Tp) f32  additive: [0]=time, [1]=space
        t_qkv_w_ref, t_qkv_b_ref,             # (D, 3D) bf16 / (1, 3D) f32  (Q part pre-scaled)
        t_proj_w_ref, t_proj_b_ref,           # (D, D)  bf16 / (1, D)  f32
        s_qkv_w_ref, s_qkv_b_ref,             # space attention, same shapes
        s_proj_w_ref, s_proj_b_ref,
        fc1_w_ref, fc1_b_ref,                 # (D, Hd) bf16 / (1, Hd) f32
        fc2_w_ref, fc2_b_ref,                 # (Hd, D) bf16 / (1, D)  f32
        o_ref,                                # (Bb*Tp, D)  f32
        *, heads, t_pad, block_batch):

    D = x_ref.shape[-1]
    Dh = D // heads

    x = x_ref[...]                            # (M, D) f32, M = Bb*Tp

    def layernorm(z, g, b):
        mu = jnp.mean(z, axis=-1, keepdims=True)
        zc = z - mu
        var = jnp.mean(zc * zc, axis=-1, keepdims=True)
        return zc * jax.lax.rsqrt(var + _LN_EPS) * g + b

    def softmax(s):
        m = jnp.max(s, axis=-1, keepdims=True)
        e = jnp.exp(s - m)
        den = jnp.sum(e, axis=-1, keepdims=True)
        r = pl.reciprocal(den, approx=True)
        r = r * (2.0 - den * r)               # one Newton refinement step
        return e * r

    def bf16(z):
        return z.astype(jnp.bfloat16)

    def var_attention(xn, qkv_w_ref, qkv_b_ref, proj_w_ref, proj_b_ref, mask):
        """VarAttention.forward via masked full (Tp,Tp) attention per head."""
        # fused QKV: one (M, D) x (D, 3D) bf16 MXU push (Q scale folded into weights)
        qkv = jnp.dot(bf16(xn), qkv_w_ref[...],
                      preferred_element_type=jnp.float32) + qkv_b_ref[...]
        # 128-lane-aligned slices, cast to bf16 once (hoisted out of the head loop)
        q = bf16(qkv[:, 0 * D:1 * D])
        k = bf16(qkv[:, 1 * D:2 * D])
        v = bf16(qkv[:, 2 * D:3 * D])

        outs = []
        for b in range(block_batch):
            r0 = b * t_pad                    # sublane-aligned (t_pad % 8 == 0)
            qb = q[r0:r0 + t_pad, :]
            kb = k[r0:r0 + t_pad, :]
            vb = v[r0:r0 + t_pad, :]
            head_outs = []
            for h in range(heads):
                c0 = h * Dh
                qh = qb[:, c0:c0 + Dh]
                kh = kb[:, c0:c0 + Dh]
                vh = vb[:, c0:c0 + Dh]
                s = jax.lax.dot_general(qh, kh, (((1,), (1,)), ((), ())),
                                        preferred_element_type=jnp.float32)
                p = softmax(s + mask)         # additive mask encodes time/space grouping + CLS
                head_outs.append(jnp.dot(bf16(p), vh,
                                         preferred_element_type=jnp.float32))
            outs.append(jnp.concatenate(head_outs, axis=-1))   # (Tp, D) lane concat
        o = outs[0] if block_batch == 1 else jnp.concatenate(outs, axis=0)
        # single K=128 output projection
        return jnp.dot(bf16(o), proj_w_ref[...],
                       preferred_element_type=jnp.float32) + proj_b_ref[...]

    # hoist gamma/beta reads
    g1, b1 = ln_ref[0:1, :], ln_ref[1:2, :]
    g2, b2 = ln_ref[2:3, :], ln_ref[3:4, :]
    g3, b3 = ln_ref[4:5, :], ln_ref[5:6, :]
    time_mask = mask_ref[0]
    space_mask = mask_ref[1]

    # ------- SpaceTimeBlock.forward ('frozen-in-time', inference) -------
    # NOTE residual wiring: the space residual is taken from the ORIGINAL x,
    # and norm1 is applied to the time residual — this matches the module.
    t_out = var_attention(layernorm(x, g3, b3),
                          t_qkv_w_ref, t_qkv_b_ref, t_proj_w_ref, t_proj_b_ref,
                          time_mask)
    time_res = x + t_out
    s_out = var_attention(layernorm(time_res, g1, b1),
                          s_qkv_w_ref, s_qkv_b_ref, s_proj_w_ref, s_proj_b_ref,
                          space_mask)
    space_res = x + s_out
    h = layernorm(space_res, g2, b2)
    h = jnp.dot(bf16(h), fc1_w_ref[...],
                preferred_element_type=jnp.float32) + fc1_b_ref[...]
    h = _gelu_tanh(h)
    h = jnp.dot(bf16(h), fc2_w_ref[...],
                preferred_element_type=jnp.float32) + fc2_b_ref[...]
    o_ref[...] = space_res + h


# ----------------------------------------------------------------------------
# One-time parameter rearrangement + mask construction
# ----------------------------------------------------------------------------

def _build_masks(frames, patches, t_pad):
    """Additive (0 / -inf) masks over the padded token axis.

    Row i = query token, column j = key token.  Token 0 is CLS; patch token
    (f, n) lives at index 1 + f*patches + n.
      time  : patch (f, n) attends to CLS + all (f', n)   (same spatial pos)
      space : patch (f, n) attends to CLS + all (f, n')   (same frame)
      CLS   : attends to every real token.
    Padded key columns are always masked; padded query rows attend to the CLS
    key only (finite softmax; their output is dropped in the wrapper).
    """
    T = 1 + frames * patches
    time_m = np.full((t_pad, t_pad), _NEG_INF, np.float32)
    space_m = np.full((t_pad, t_pad), _NEG_INF, np.float32)
    time_m[0, :T] = 0.0
    space_m[0, :T] = 0.0
    for f in range(frames):
        for n in range(patches):
            i = 1 + f * patches + n
            time_m[i, 0] = 0.0
            space_m[i, 0] = 0.0
            for f2 in range(frames):
                time_m[i, 1 + f2 * patches + n] = 0.0
            for n2 in range(patches):
                space_m[i, 1 + f * patches + n2] = 0.0
    time_m[T:, 0] = 0.0
    space_m[T:, 0] = 0.0
    return np.stack([time_m, space_m], axis=0)


def prepare_params(p, heads, frames, patches):
    """Rearrange PyTorch-layout weights ONCE so the kernel never transposes."""
    D = p['norm1_w'].shape[0]
    Dh = D // heads
    Hd = p['fc1_w'].shape[0]
    T = 1 + frames * patches
    t_pad = ((T + 7) // 8) * 8
    scale = float(Dh) ** -0.5

    def qkv(w, b):      # w: (3D, D), b: (3D,) -> (D, 3D) bf16 slab, (1, 3D) f32
        wt = np.asarray(w, np.float32).T.copy()        # columns [Q | K | V]
        bb = np.asarray(b, np.float32).reshape(1, 3 * D).copy()
        wt[:, :D] *= scale                              # fold q-scale into weights
        bb[:, :D] *= scale
        return jnp.asarray(wt, jnp.bfloat16), jnp.asarray(bb, jnp.float32)

    def proj(w, b):     # w: (D, D), b: (D,) -> (D, D) bf16, (1, D) f32
        return (jnp.asarray(np.asarray(w, np.float32).T, jnp.bfloat16),
                jnp.asarray(np.asarray(b, np.float32).reshape(1, D), jnp.float32))

    t_qkv_w, t_qkv_b = qkv(p['t_qkv_w'], p['t_qkv_b'])
    t_proj_w, t_proj_b = proj(p['t_proj_w'], p['t_proj_b'])
    s_qkv_w, s_qkv_b = qkv(p['s_qkv_w'], p['s_qkv_b'])
    s_proj_w, s_proj_b = proj(p['s_proj_w'], p['s_proj_b'])

    ln = jnp.stack([p['norm1_w'], p['norm1_b'],
                    p['norm2_w'], p['norm2_b'],
                    p['norm3_w'], p['norm3_b']], axis=0).astype(jnp.float32)
    masks = jnp.asarray(_build_masks(frames, patches, t_pad), jnp.float32)

    return (ln, masks,
            t_qkv_w, t_qkv_b, t_proj_w, t_proj_b,
            s_qkv_w, s_qkv_b, s_proj_w, s_proj_b,
            jnp.asarray(np.asarray(p['fc1_w'], np.float32).T, jnp.bfloat16),
            jnp.asarray(np.asarray(p['fc1_b'], np.float32).reshape(1, Hd), jnp.float32),
            jnp.asarray(np.asarray(p['fc2_w'], np.float32).T, jnp.bfloat16),
            jnp.asarray(np.asarray(p['fc2_b'], np.float32).reshape(1, D), jnp.float32))


# ----------------------------------------------------------------------------
# Wrapper: token padding + flattening + pallas_call
# ----------------------------------------------------------------------------

def spacetime_block(x, prepped, *, heads, frames, patches, block_batch=1):
    B, T, D = x.shape
    assert T == 1 + frames * patches and D % heads == 0
    assert B % block_batch == 0
    t_pad = ((T + 7) // 8) * 8
    M = block_batch * t_pad

    # Pad tokens to a sublane-aligned count and flatten (batch, token) so every
    # QKV / output-proj / fc1 / fc2 matmul runs with M = block_batch * t_pad rows.
    x_p = jnp.pad(x, ((0, 0), (0, t_pad - T), (0, 0))).reshape(B * t_pad, D)

    kern = functools.partial(_spacetime_block_kernel, heads=heads, t_pad=t_pad,
                             block_batch=block_batch)

    def full_spec(a):
        nd = a.ndim
        return pl.BlockSpec(a.shape, lambda i: (0,) * nd)   # weights stay VMEM-resident

    in_specs = [pl.BlockSpec((M, D), lambda i: (i, 0))]
    in_specs += [full_spec(a) for a in prepped]

    out_flat = pl.pallas_call(
        kern,
        out_shape=jax.ShapeDtypeStruct((B * t_pad, D), jnp.float32),
        grid=(B // block_batch,),
        in_specs=in_specs,
        out_specs=pl.BlockSpec((M, D), lambda i: (i, 0)),
        compiler_params=pltpu.CompilerParams(
            dimension_semantics=("parallel",)),
    )(x_p, *prepped)
    return out_flat.reshape(B, t_pad, D)[:, :T, :]


# ----------------------------------------------------------------------------
# Pure-JAX reference (mirrors the PyTorch module, f32 throughout)
# ----------------------------------------------------------------------------

def _ref_layernorm(z, g, b):
    mu = jnp.mean(z, axis=-1, keepdims=True)
    zc = z - mu
    var = jnp.mean(zc * zc, axis=-1, keepdims=True)
    return zc * jax.lax.rsqrt(var + _LN_EPS) * g + b


def _ref_attn(q, k, v):
    sim = jnp.einsum('bid,bjd->bij', q, k)
    p = jax.nn.softmax(sim, axis=-1)
    return jnp.einsum('bij,bjd->bid', p, v)


def _ref_var_attention(x, w_qkv, b_qkv, w_proj, b_proj, heads, mode, F, N):
    B, T, D = x.shape
    Dh = D // heads
    scale = float(Dh) ** -0.5
    qkv = x @ w_qkv.T + b_qkv
    q, k, v = jnp.split(qkv, 3, axis=-1)

    def to_heads(t):   # 'b n (h d) -> (b h) n d'
        return t.reshape(B, T, heads, Dh).transpose(0, 2, 1, 3).reshape(B * heads, T, Dh)

    q, k, v = map(to_heads, (q, k, v))
    q = q * scale
    cls_q, q_ = q[:, :1], q[:, 1:]
    cls_k, k_ = k[:, :1], k[:, 1:]
    cls_v, v_ = v[:, :1], v[:, 1:]
    cls_out = _ref_attn(cls_q, k, v)

    BH = B * heads
    if mode == 'time':     # 'b (f n) d -> (b n) f d'
        regroup = lambda t: (t.reshape(BH, F, N, Dh).transpose(0, 2, 1, 3)
                             .reshape(BH * N, F, Dh))
        r = N
    else:                  # 'b (f n) d -> (b f) n d'
        regroup = lambda t: t.reshape(BH * F, N, Dh)
        r = F
    q_, k_, v_ = map(regroup, (q_, k_, v_))
    cls_k_r = jnp.repeat(cls_k, r, axis=0)
    cls_v_r = jnp.repeat(cls_v, r, axis=0)
    out = _ref_attn(q_, jnp.concatenate([cls_k_r, k_], axis=1),
                    jnp.concatenate([cls_v_r, v_], axis=1))
    if mode == 'time':     # '(b n) f d -> b (f n) d'
        out = (out.reshape(BH, N, F, Dh).transpose(0, 2, 1, 3)
                  .reshape(BH, F * N, Dh))
    else:
        out = out.reshape(BH, F * N, Dh)
    out = jnp.concatenate([cls_out, out], axis=1)
    out = out.reshape(B, heads, T, Dh).transpose(0, 2, 1, 3).reshape(B, T, D)
    return out @ w_proj.T + b_proj


def spacetime_block_reference(x, p, *, heads, frames, patches):
    t_out = _ref_var_attention(_ref_layernorm(x, p['norm3_w'], p['norm3_b']),
                               p['t_qkv_w'], p['t_qkv_b'], p['t_proj_w'], p['t_proj_b'],
                               heads, 'time', frames, patches)
    time_res = x + t_out
    s_out = _ref_var_attention(_ref_layernorm(time_res, p['norm1_w'], p['norm1_b']),
                               p['s_qkv_w'], p['s_qkv_b'], p['s_proj_w'], p['s_proj_b'],
                               heads, 'space', frames, patches)
    space_res = x + s_out
    h = _ref_layernorm(space_res, p['norm2_w'], p['norm2_b'])
    h = _gelu_tanh(h @ p['fc1_w'].T + p['fc1_b'])
    h = h @ p['fc2_w'].T + p['fc2_b']
    return space_res + h


# ----------------------------------------------------------------------------
# Deterministic parameter init (PyTorch tensor layouts)
# ----------------------------------------------------------------------------

def init_params(key, dim, heads, mlp_ratio=4.0, std=0.03):
    Hd = int(dim * mlp_ratio)
    ks = jax.random.split(key, 12)
    nrm = lambda k, shape, s=std: s * jax.random.normal(k, shape, jnp.float32)
    return {
        'norm1_w': 1.0 + 0.1 * jax.random.normal(ks[0], (dim,), jnp.float32),
        'norm1_b': 0.1 * jax.random.normal(ks[1], (dim,), jnp.float32),
        'norm2_w': 1.0 + 0.1 * jax.random.normal(ks[2], (dim,), jnp.float32),
        'norm2_b': 0.1 * jax.random.normal(ks[3], (dim,), jnp.float32),
        'norm3_w': 1.0 + 0.1 * jax.random.normal(ks[4], (dim,), jnp.float32),
        'norm3_b': 0.1 * jax.random.normal(ks[5], (dim,), jnp.float32),
        # time attention (random init so the time path is exercised; LaviLa's
        # default time_init='zeros' would make it a constant path).
        't_qkv_w': nrm(ks[6], (3 * dim, dim)),
        't_qkv_b': nrm(ks[6], (3 * dim,), 0.02),
        't_proj_w': nrm(ks[7], (dim, dim)),
        't_proj_b': nrm(ks[7], (dim,), 0.02),
        # space attention
        's_qkv_w': nrm(ks[8], (3 * dim, dim)),
        's_qkv_b': nrm(ks[8], (3 * dim,), 0.02),
        's_proj_w': nrm(ks[9], (dim, dim)),
        's_proj_b': nrm(ks[9], (dim,), 0.02),
        # MLP
        'fc1_w': nrm(ks[10], (Hd, dim)),
        'fc1_b': nrm(ks[10], (Hd,), 0.02),
        'fc2_w': nrm(ks[11], (dim, Hd)),
        'fc2_b': nrm(ks[11], (dim,), 0.02),
    }


# ----------------------------------------------------------------------------
# main
# ----------------------------------------------------------------------------

if __name__ == "__main__":
    B, F, N, D, H = 2, 2, 16, 128, 4          # tokens T = 1 + F*N = 33, Dh = 32
    T = 1 + F * N

    root = jax.random.PRNGKey(0)
    k_p, k_x = jax.random.split(root)
    params = init_params(k_p, D, H)
    prepped = prepare_params(params, H, F, N)

    ref_fn = jax.jit(functools.partial(spacetime_block_reference,
                                       heads=H, frames=F, patches=N))

    # check 1: one batch element per grid step (grid=(2,) keeps both v7x TCs busy)
    x = jax.random.normal(k_x, (B, T, D), jnp.float32)
    run1 = jax.jit(functools.partial(spacetime_block, heads=H, frames=F,
                                     patches=N, block_batch=1))
    out1 = jax.block_until_ready(run1(x, prepped))
    ref1 = jax.block_until_ready(ref_fn(x, params))
    assert out1.shape == (B, T, D)
    d1 = jnp.abs(out1 - ref1)
    max1, mean1 = float(jnp.max(d1)), float(jnp.mean(d1))
    # loose tolerance: kernel uses bf16 MXU operands (softmax denom is Newton-refined)
    assert np.isfinite(max1) and max1 < 0.15 and mean1 < 0.03, (max1, mean1)

    # check 2: batch blocking — two batch elements share each grid step's matmuls
    B2 = 4
    x2 = jax.random.normal(jax.random.PRNGKey(1), (B2, T, D), jnp.float32)
    run2 = jax.jit(functools.partial(spacetime_block, heads=H, frames=F,
                                     patches=N, block_batch=2))
    out2 = jax.block_until_ready(run2(x2, prepped))
    ref2 = jax.block_until_ready(ref_fn(x2, params))
    assert out2.shape == (B2, T, D)
    d2 = jnp.abs(out2 - ref2)
    max2, mean2 = float(jnp.max(d2)), float(jnp.mean(d2))
    assert np.isfinite(max2) and max2 < 0.15 and mean2 < 0.03, (max2, mean2)

    print("KERNEL_OK")
</pallas_src>

<mosaic_0001>
module attributes {stable_mosaic.version = 11 : i64} {
  func.func @_spacetime_block_kernel(%arg0: i32, %arg1: memref<40x128xf32, #tpu.memory_space<vmem>>, %arg2: memref<6x128xf32, #tpu.memory_space<vmem>>, %arg3: memref<2x40x40xf32, #tpu.memory_space<vmem>>, %arg4: memref<128x384xbf16, #tpu.memory_space<vmem>>, %arg5: memref<1x384xf32, #tpu.memory_space<vmem>>, %arg6: memref<128x128xbf16, #tpu.memory_space<vmem>>, %arg7: memref<1x128xf32, #tpu.memory_space<vmem>>, %arg8: memref<128x384xbf16, #tpu.memory_space<vmem>>, %arg9: memref<1x384xf32, #tpu.memory_space<vmem>>, %arg10: memref<128x128xbf16, #tpu.memory_space<vmem>>, %arg11: memref<1x128xf32, #tpu.memory_space<vmem>>, %arg12: memref<128x512xbf16, #tpu.memory_space<vmem>>, %arg13: memref<1x512xf32, #tpu.memory_space<vmem>>, %arg14: memref<512x128xbf16, #tpu.memory_space<vmem>>, %arg15: memref<1x128xf32, #tpu.memory_space<vmem>>, %arg16: memref<40x128xf32, #tpu.memory_space<vmem>>) attributes {dimension_semantics = [#tpu.dimension_semantics<parallel>], iteration_bounds = array<i64: 2>, scalar_prefetch = 0 : i64, scratch_operands = 0 : i64, tpu.core_type = #tpu.core_type<tc>, window_params = [{transform_indices = @transform_0, window_bounds = array<i64: 40, 128>}, {pipeline_mode = #tpu.pipeline_mode<synchronous>, transform_indices = @transform_1, window_bounds = array<i64: 6, 128>}, {pipeline_mode = #tpu.pipeline_mode<synchronous>, transform_indices = @transform_2, window_bounds = array<i64: 2, 40, 40>}, {pipeline_mode = #tpu.pipeline_mode<synchronous>, transform_indices = @transform_3, window_bounds = array<i64: 128, 384>}, {pipeline_mode = #tpu.pipeline_mode<synchronous>, transform_indices = @transform_4, window_bounds = array<i64: 1, 384>}, {pipeline_mode = #tpu.pipeline_mode<synchronous>, transform_indices = @transform_5, window_bounds = array<i64: 128, 128>}, {pipeline_mode = #tpu.pipeline_mode<synchronous>, transform_indices = @transform_6, window_bounds = array<i64: 1, 128>}, {pipeline_mode = #tpu.pipeline_mode<synchronous>, transform_indices = @transform_7, window_bounds = array<i64: 128, 384>}, {pipeline_mode = #tpu.pipeline_mode<synchronous>, transform_indices = @transform_8, window_bounds = array<i64: 1, 384>}, {pipeline_mode = #tpu.pipeline_mode<synchronous>, transform_indices = @transform_9, window_bounds = array<i64: 128, 128>}, {pipeline_mode = #tpu.pipeline_mode<synchronous>, transform_indices = @transform_10, window_bounds = array<i64: 1, 128>}, {pipeline_mode = #tpu.pipeline_mode<synchronous>, transform_indices = @transform_11, window_bounds = array<i64: 128, 512>}, {pipeline_mode = #tpu.pipeline_mode<synchronous>, transform_indices = @transform_12, window_bounds = array<i64: 1, 512>}, {pipeline_mode = #tpu.pipeline_mode<synchronous>, transform_indices = @transform_13, window_bounds = array<i64: 512, 128>}, {pipeline_mode = #tpu.pipeline_mode<synchronous>, transform_indices = @transform_14, window_bounds = array<i64: 1, 128>}, {transform_indices = @transform_15, window_bounds = array<i64: 40, 128>}]} {
    %c0 = arith.constant 0 : index
    %c0_0 = arith.constant 0 : index
    %0 = vector.load %arg1[%c0, %c0_0] : memref<40x128xf32, #tpu.memory_space<vmem>>, vector<40x128xf32>
    %c0_1 = arith.constant 0 : index
    %c0_2 = arith.constant 0 : index
    %1 = vector.load %arg2[%c0_1, %c0_2] : memref<6x128xf32, #tpu.memory_space<vmem>>, vector<1x128xf32>
    %c1 = arith.constant 1 : index
    %c0_3 = arith.constant 0 : index
    %2 = vector.load %arg2[%c1, %c0_3] : memref<6x128xf32, #tpu.memory_space<vmem>>, vector<1x128xf32>
    %c2 = arith.constant 2 : index
    %c0_4 = arith.constant 0 : index
    %3 = vector.load %arg2[%c2, %c0_4] : memref<6x128xf32, #tpu.memory_space<vmem>>, vector<1x128xf32>
    %c3 = arith.constant 3 : index
    %c0_5 = arith.constant 0 : index
    %4 = vector.load %arg2[%c3, %c0_5] : memref<6x128xf32, #tpu.memory_space<vmem>>, vector<1x128xf32>
    %c4 = arith.constant 4 : index
    %c0_6 = arith.constant 0 : index
    %5 = vector.load %arg2[%c4, %c0_6] : memref<6x128xf32, #tpu.memory_space<vmem>>, vector<1x128xf32>
    %c5 = arith.constant 5 : index
    %c0_7 = arith.constant 0 : index
    %6 = vector.load %arg2[%c5, %c0_7] : memref<6x128xf32, #tpu.memory_space<vmem>>, vector<1x128xf32>
    %c0_8 = arith.constant 0 : index
    %c0_9 = arith.constant 0 : index
    %c0_10 = arith.constant 0 : index
    %7 = vector.load %arg3[%c0_8, %c0_9, %c0_10] : memref<2x40x40xf32, #tpu.memory_space<vmem>>, vector<1x40x40xf32>
    %8 = vector.shape_cast %7 : vector<1x40x40xf32> to vector<40x40xf32>
    %c1_11 = arith.constant 1 : index
    %c0_12 = arith.constant 0 : index
    %c0_13 = arith.constant 0 : index
    %9 = vector.load %arg3[%c1_11, %c0_12, %c0_13] : memref<2x40x40xf32, #tpu.memory_space<vmem>>, vector<1x40x40xf32>
    %10 = vector.shape_cast %9 : vector<1x40x40xf32> to vector<40x40xf32>
    %cst = arith.constant dense<0.000000e+00> : vector<40xf32>
    %11 = vector.multi_reduction <add>, %0, %cst [1] : vector<40x128xf32> to vector<40xf32>
    %12 = vector.shape_cast %11 : vector<40xf32> to vector<40x1xf32>
    %cst_14 = arith.constant 1.280000e+02 : f32
    %13 = vector.broadcast %cst_14 : f32 to vector<40x1xf32>
    %14 = arith.divf %12, %13 : vector<40x1xf32>
    %15 = vector.broadcast %14 : vector<40x1xf32> to vector<40x128xf32>
    %16 = arith.subf %0, %15 : vector<40x128xf32>
    %17 = arith.mulf %16, %16 : vector<40x128xf32>
    %cst_15 = arith.constant dense<0.000000e+00> : vector<40xf32>
    %18 = vector.multi_reduction <add>, %17, %cst_15 [1] : vector<40x128xf32> to vector<40xf32>
    %19 = vector.shape_cast %18 : vector<40xf32> to vector<40x1xf32>
    %cst_16 = arith.constant 1.280000e+02 : f32
    %20 = vector.broadcast %cst_16 : f32 to vector<40x1xf32>
    %21 = arith.divf %19, %20 : vector<40x1xf32>
    %cst_17 = arith.constant 9.99999974E-6 : f32
    %22 = vector.broadcast %cst_17 : f32 to vector<40x1xf32>
    %23 = arith.addf %21, %22 : vector<40x1xf32>
    %24 = math.rsqrt %23 : vector<40x1xf32>
    %25 = vector.broadcast %24 : vector<40x1xf32> to vector<40x128xf32>
    %26 = arith.mulf %16, %25 : vector<40x128xf32>
    %27 = vector.broadcast %5 : vector<1x128xf32> to vector<40x128xf32>
    %28 = arith.mulf %26, %27 : vector<40x128xf32>
    %29 = vector.broadcast %6 : vector<1x128xf32> to vector<40x128xf32>
    %30 = arith.addf %28, %29 : vector<40x128xf32>
    %31 = arith.truncf %30 : vector<40x128xf32> to vector<40x128xbf16>
    %c0_18 = arith.constant 0 : index
    %c0_19 = arith.constant 0 : index
    %32 = vector.load %arg4[%c0_18, %c0_19] : memref<128x384xbf16, #tpu.memory_space<vmem>>, vector<128x384xbf16>
    %cst_20 = arith.constant dense<0.000000e+00> : vector<40x384xf32>
    %33 = tpu.matmul %31, %32, %cst_20 {dimension_numbers = #tpu.dot_dimension_numbers<[1], [0], [0], [1], [0, 0, 1, 1], [], []>} : vector<40x128xbf16>, vector<128x384xbf16>, vector<40x384xf32> -> vector<40x384xf32>
    %c0_21 = arith.constant 0 : index
    %c0_22 = arith.constant 0 : index
    %34 = vector.load %arg5[%c0_21, %c0_22] : memref<1x384xf32, #tpu.memory_space<vmem>>, vector<1x384xf32>
    %35 = vector.broadcast %34 : vector<1x384xf32> to vector<40x384xf32>
    %36 = arith.addf %33, %35 : vector<40x384xf32>
    %37 = vector.extract_strided_slice %36 {offsets = [0, 0], sizes = [40, 128], strides = [1, 1]} : vector<40x384xf32> to vector<40x128xf32>
    %38 = arith.truncf %37 : vector<40x128xf32> to vector<40x128xbf16>
    %39 = vector.extract_strided_slice %36 {offsets = [0, 128], sizes = [40, 128], strides = [1, 1]} : vector<40x384xf32> to vector<40x128xf32>
    %40 = arith.truncf %39 : vector<40x128xf32> to vector<40x128xbf16>
    %41 = vector.extract_strided_slice %36 {offsets = [0, 256], sizes = [40, 128], strides = [1, 1]} : vector<40x384xf32> to vector<40x128xf32>
    %42 = arith.truncf %41 : vector<40x128xf32> to vector<40x128xbf16>
    %43 = vector.extract_strided_slice %38 {offsets = [0, 0], sizes = [40, 32], strides = [1, 1]} : vector<40x128xbf16> to vector<40x32xbf16>
    %44 = vector.extract_strided_slice %40 {offsets = [0, 0], sizes = [40, 32], strides = [1, 1]} : vector<40x128xbf16> to vector<40x32xbf16>
    %45 = vector.extract_strided_slice %42 {offsets = [0, 0], sizes = [40, 32], strides = [1, 1]} : vector<40x128xbf16> to vector<40x32xbf16>
    %cst_23 = arith.constant dense<0.000000e+00> : vector<40x40xf32>
    %46 = tpu.matmul %43, %44, %cst_23 {dimension_numbers = #tpu.dot_dimension_numbers<[1], [1], [0], [0], [0, 0, 1, 0], [], []>} : vector<40x32xbf16>, vector<40x32xbf16>, vector<40x40xf32> -> vector<40x40xf32>
    %47 = arith.addf %46, %8 : vector<40x40xf32>
    %cst_24 = arith.constant dense<0xFF800000> : vector<40xf32>
    %48 = vector.multi_reduction <maximumf>, %47, %cst_24 [1] : vector<40x40xf32> to vector<40xf32>
    %49 = vector.shape_cast %48 : vector<40xf32> to vector<40x1xf32>
    %50 = vector.broadcast %49 : vector<40x1xf32> to vector<40x40xf32>
    %51 = arith.subf %47, %50 : vector<40x40xf32>
    %52 = math.exp %51 : vector<40x40xf32>
    %cst_25 = arith.constant dense<0.000000e+00> : vector<40xf32>
    %53 = vector.multi_reduction <add>, %52, %cst_25 [1] : vector<40x40xf32> to vector<40xf32>
    %54 = vector.shape_cast %53 : vector<40xf32> to vector<40x1xf32>
    %55 = tpu.reciprocal %54 {approx = true} : vector<40x1xf32> -> vector<40x1xf32>
    %56 = arith.mulf %54, %55 : vector<40x1xf32>
    %cst_26 = arith.constant 2.000000e+00 : f32
    %57 = vector.broadcast %cst_26 : f32 to vector<40x1xf32>
    %58 = arith.subf %57, %56 : vector<40x1xf32>
    %59 = arith.mulf %55, %58 : vector<40x1xf32>
    %60 = vector.broadcast %59 : vector<40x1xf32> to vector<40x40xf32>
    %61 = arith.mulf %52, %60 : vector<40x40xf32>
    %62 = arith.truncf %61 : vector<40x40xf32> to vector<40x40xbf16>
    %cst_27 = arith.constant dense<0.000000e+00> : vector<40x32xf32>
    %63 = tpu.matmul %62, %45, %cst_27 {dimension_numbers = #tpu.dot_dimension_numbers<[1], [0], [0], [1], [0, 0, 1, 1], [], []>} : vector<40x40xbf16>, vector<40x32xbf16>, vector<40x32xf32> -> vector<40x32xf32>
    %64 = vector.extract_strided_slice %38 {offsets = [0, 32], sizes = [40, 32], strides = [1, 1]} : vector<40x128xbf16> to vector<40x32xbf16>
    %65 = vector.extract_strided_slice %40 {offsets = [0, 32], sizes = [40, 32], strides = [1, 1]} : vector<40x128xbf16> to vector<40x32xbf16>
    %66 = vector.extract_strided_slice %42 {offsets = [0, 32], sizes = [40, 32], strides = [1, 1]} : vector<40x128xbf16> to vector<40x32xbf16>
    %cst_28 = arith.constant dense<0.000000e+00> : vector<40x40xf32>
    %67 = tpu.matmul %64, %65, %cst_28 {dimension_numbers = #tpu.dot_dimension_numbers<[1], [1], [0], [0], [0, 0, 1, 0], [], []>} : vector<40x32xbf16>, vector<40x32xbf16>, vector<40x40xf32> -> vector<40x40xf32>
    %68 = arith.addf %67, %8 : vector<40x40xf32>
    %cst_29 = arith.constant dense<0xFF800000> : vector<40xf32>
    %69 = vector.multi_reduction <maximumf>, %68, %cst_29 [1] : vector<40x40xf32> to vector<40xf32>
    %70 = vector.shape_cast %69 : vector<40xf32> to vector<40x1xf32>
    %71 = vector.broadcast %70 : vector<40x1xf32> to vector<40x40xf32>
    %72 = arith.subf %68, %71 : vector<40x40xf32>
    %73 = math.exp %72 : vector<40x40xf32>
    %cst_30 = arith.constant dense<0.000000e+00> : vector<40xf32>
    %74 = vector.multi_reduction <add>, %73, %cst_30 [1] : vector<40x40xf32> to vector<40xf32>
    %75 = vector.shape_cast %74 : vector<40xf32> to vector<40x1xf32>
    %76 = tpu.reciprocal %75 {approx = true} : vector<40x1xf32> -> vector<40x1xf32>
    %77 = arith.mulf %75, %76 : vector<40x1xf32>
    %cst_31 = arith.constant 2.000000e+00 : f32
    %78 = vector.broadcast %cst_31 : f32 to vector<40x1xf32>
    %79 = arith.subf %78, %77 : vector<40x1xf32>
    %80 = arith.mulf %76, %79 : vector<40x1xf32>
    %81 = vector.broadcast %80 : vector<40x1xf32> to vector<40x40xf32>
    %82 = arith.mulf %73, %81 : vector<40x40xf32>
    %83 = arith.truncf %82 : vector<40x40xf32> to vector<40x40xbf16>
    %cst_32 = arith.constant dense<0.000000e+00> : vector<40x32xf32>
    %84 = tpu.matmul %83, %66, %cst_32 {dimension_numbers = #tpu.dot_dimension_numbers<[1], [0], [0], [1], [0, 0, 1, 1], [], []>} : vector<40x40xbf16>, vector<40x32xbf16>, vector<40x32xf32> -> vector<40x32xf32>
    %85 = vector.extract_strided_slice %38 {offsets = [0, 64], sizes = [40, 32], strides = [1, 1]} : vector<40x128xbf16> to vector<40x32xbf16>
    %86 = vector.extract_strided_slice %40 {offsets = [0, 64], sizes = [40, 32], strides = [1, 1]} : vector<40x128xbf16> to vector<40x32xbf16>
    %87 = vector.extract_strided_slice %42 {offsets = [0, 64], sizes = [40, 32], strides = [1, 1]} : vector<40x128xbf16> to vector<40x32xbf16>
    %cst_33 = arith.constant dense<0.000000e+00> : vector<40x40xf32>
    %88 = tpu.matmul %85, %86, %cst_33 {dimension_numbers = #tpu.dot_dimension_numbers<[1], [1], [0], [0], [0, 0, 1, 0], [], []>} : vector<40x32xbf16>, vector<40x32xbf16>, vector<40x40xf32> -> vector<40x40xf32>
    %89 = arith.addf %88, %8 : vector<40x40xf32>
    %cst_34 = arith.constant dense<0xFF800000> : vector<40xf32>
    %90 = vector.multi_reduction <maximumf>, %89, %cst_34 [1] : vector<40x40xf32> to vector<40xf32>
    %91 = vector.shape_cast %90 : vector<40xf32> to vector<40x1xf32>
    %92 = vector.broadcast %91 : vector<40x1xf32> to vector<40x40xf32>
    %93 = arith.subf %89, %92 : vector<40x40xf32>
    %94 = math.exp %93 : vector<40x40xf32>
    %cst_35 = arith.constant dense<0.000000e+00> : vector<40xf32>
    %95 = vector.multi_reduction <add>, %94, %cst_35 [1] : vector<40x40xf32> to vector<40xf32>
    %96 = vector.shape_cast %95 : vector<40xf32> to vector<40x1xf32>
    %97 = tpu.reciprocal %96 {approx = true} : vector<40x1xf32> -> vector<40x1xf32>
    %98 = arith.mulf %96, %97 : vector<40x1xf32>
    %cst_36 = arith.constant 2.000000e+00 : f32
    %99 = vector.broadcast %cst_36 : f32 to vector<40x1xf32>
    %100 = arith.subf %99, %98 : vector<40x1xf32>
    %101 = arith.mulf %97, %100 : vector<40x1xf32>
    %102 = vector.broadcast %101 : vector<40x1xf32> to vector<40x40xf32>
    %103 = arith.mulf %94, %102 : vector<40x40xf32>
    %104 = arith.truncf %103 : vector<40x40xf32> to vector<40x40xbf16>
    %cst_37 = arith.constant dense<0.000000e+00> : vector<40x32xf32>
    %105 = tpu.matmul %104, %87, %cst_37 {dimension_numbers = #tpu.dot_dimension_numbers<[1], [0], [0], [1], [0, 0, 1, 1], [], []>} : vector<40x40xbf16>, vector<40x32xbf16>, vector<40x32xf32> -> vector<40x32xf32>
    %106 = vector.extract_strided_slice %38 {offsets = [0, 96], sizes = [40, 32], strides = [1, 1]} : vector<40x128xbf16> to vector<40x32xbf16>
    %107 = vector.extract_strided_slice %40 {offsets = [0, 96], sizes = [40, 32], strides = [1, 1]} : vector<40x128xbf16> to vector<40x32xbf16>
    %108 = vector.extract_strided_slice %42 {offsets = [0, 96], sizes = [40, 32], strides = [1, 1]} : vector<40x128xbf16> to vector<40x32xbf16>
    %cst_38 = arith.constant dense<0.000000e+00> : vector<40x40xf32>
    %109 = tpu.matmul %106, %107, %cst_38 {dimension_numbers = #tpu.dot_dimension_numbers<[1], [1], [0], [0], [0, 0, 1, 0], [], []>} : vector<40x32xbf16>, vector<40x32xbf16>, vector<40x40xf32> -> vector<40x40xf32>
    %110 = arith.addf %109, %8 : vector<40x40xf32>
    %cst_39 = arith.constant dense<0xFF800000> : vector<40xf32>
    %111 = vector.multi_reduction <maximumf>, %110, %cst_39 [1] : vector<40x40xf32> to vector<40xf32>
    %112 = vector.shape_cast %111 : vector<40xf32> to vector<40x1xf32>
    %113 = vector.broadcast %112 : vector<40x1xf32> to vector<40x40xf32>
    %114 = arith.subf %110, %113 : vector<40x40xf32>
    %115 = math.exp %114 : vector<40x40xf32>
    %cst_40 = arith.constant dense<0.000000e+00> : vector<40xf32>
    %116 = vector.multi_reduction <add>, %115, %cst_40 [1] : vector<40x40xf32> to vector<40xf32>
    %117 = vector.shape_cast %116 : vector<40xf32> to vector<40x1xf32>
    %118 = tpu.reciprocal %117 {approx = true} : vector<40x1xf32> -> vector<40x1xf32>
    %119 = arith.mulf %117, %118 : vector<40x1xf32>
    %cst_41 = arith.constant 2.000000e+00 : f32
    %120 = vector.broadcast %cst_41 : f32 to vector<40x1xf32>
    %121 = arith.subf %120, %119 : vector<40x1xf32>
    %122 = arith.mulf %118, %121 : vector<40x1xf32>
    %123 = vector.broadcast %122 : vector<40x1xf32> to vector<40x40xf32>
    %124 = arith.mulf %115, %123 : vector<40x40xf32>
    %125 = arith.truncf %124 : vector<40x40xf32> to vector<40x40xbf16>
    %cst_42 = arith.constant dense<0.000000e+00> : vector<40x32xf32>
    %126 = tpu.matmul %125, %108, %cst_42 {dimension_numbers = #tpu.dot_dimension_numbers<[1], [0], [0], [1], [0, 0, 1, 1], [], []>} : vector<40x40xbf16>, vector<40x32xbf16>, vector<40x32xf32> -> vector<40x32xf32>
    %127 = tpu.concatenate %63, %84, %105, %126 in 1 : vector<40x32xf32>, vector<40x32xf32>, vector<40x32xf32>, vector<40x32xf32> -> vector<40x128xf32>
    %128 = arith.truncf %127 : vector<40x128xf32> to vector<40x128xbf16>
    %c0_43 = arith.constant 0 : index
    %c0_44 = arith.constant 0 : index
    %129 = vector.load %arg6[%c0_43, %c0_44] : memref<128x128xbf16, #tpu.memory_space<vmem>>, vector<128x128xbf16>
    %cst_45 = arith.constant dense<0.000000e+00> : vector<40x128xf32>
    %130 = tpu.matmul %128, %129, %cst_45 {dimension_numbers = #tpu.dot_dimension_numbers<[1], [0], [0], [1], [0, 0, 1, 1], [], []>} : vector<40x128xbf16>, vector<128x128xbf16>, vector<40x128xf32> -> vector<40x128xf32>
    %c0_46 = arith.constant 0 : index
    %c0_47 = arith.constant 0 : index
    %131 = vector.load %arg7[%c0_46, %c0_47] : memref<1x128xf32, #tpu.memory_space<vmem>>, vector<1x128xf32>
    %132 = vector.broadcast %131 : vector<1x128xf32> to vector<40x128xf32>
    %133 = arith.addf %130, %132 : vector<40x128xf32>
    %134 = arith.addf %0, %133 : vector<40x128xf32>
    %cst_48 = arith.constant dense<0.000000e+00> : vector<40xf32>
    %135 = vector.multi_reduction <add>, %134, %cst_48 [1] : vector<40x128xf32> to vector<40xf32>
    %136 = vector.shape_cast %135 : vector<40xf32> to vector<40x1xf32>
    %cst_49 = arith.constant 1.280000e+02 : f32
    %137 = vector.broadcast %cst_49 : f32 to vector<40x1xf32>
    %138 = arith.divf %136, %137 : vector<40x1xf32>
    %139 = vector.broadcast %138 : vector<40x1xf32> to vector<40x128xf32>
    %140 = arith.subf %134, %139 : vector<40x128xf32>
    %141 = arith.mulf %140, %140 : vector<40x128xf32>
    %cst_50 = arith.constant dense<0.000000e+00> : vector<40xf32>
    %142 = vector.multi_reduction <add>, %141, %cst_50 [1] : vector<40x128xf32> to vector<40xf32>
    %143 = vector.shape_cast %142 : vector<40xf32> to vector<40x1xf32>
    %cst_51 = arith.constant 1.280000e+02 : f32
    %144 = vector.broadcast %cst_51 : f32 to vector<40x1xf32>
    %145 = arith.divf %143, %144 : vector<40x1xf32>
    %cst_52 = arith.constant 9.99999974E-6 : f32
    %146 = vector.broadcast %cst_52 : f32 to vector<40x1xf32>
    %147 = arith.addf %145, %146 : vector<40x1xf32>
    %148 = math.rsqrt %147 : vector<40x1xf32>
    %149 = vector.broadcast %148 : vector<40x1xf32> to vector<40x128xf32>
    %150 = arith.mulf %140, %149 : vector<40x128xf32>
    %151 = vector.broadcast %1 : vector<1x128xf32> to vector<40x128xf32>
    %152 = arith.mulf %150, %151 : vector<40x128xf32>
    %153 = vector.broadcast %2 : vector<1x128xf32> to vector<40x128xf32>
    %154 = arith.addf %152, %153 : vector<40x128xf32>
    %155 = arith.truncf %154 : vector<40x128xf32> to vector<40x128xbf16>
    %c0_53 = arith.constant 0 : index
    %c0_54 = arith.constant 0 : index
    %156 = vector.load %arg8[%c0_53, %c0_54] : memref<128x384xbf16, #tpu.memory_space<vmem>>, vector<128x384xbf16>
    %cst_55 = arith.constant dense<0.000000e+00> : vector<40x384xf32>
    %157 = tpu.matmul %155, %156, %cst_55 {dimension_numbers = #tpu.dot_dimension_numbers<[1], [0], [0], [1], [0, 0, 1, 1], [], []>} : vector<40x128xbf16>, vector<128x384xbf16>, vector<40x384xf32> -> vector<40x384xf32>
    %c0_56 = arith.constant 0 : index
    %c0_57 = arith.constant 0 : index
    %158 = vector.load %arg9[%c0_56, %c0_57] : memref<1x384xf32, #tpu.memory_space<vmem>>, vector<1x384xf32>
    %159 = vector.broadcast %158 : vector<1x384xf32> to vector<40x384xf32>
    %160 = arith.addf %157, %159 : vector<40x384xf32>
    %161 = vector.extract_strided_slice %160 {offsets = [0, 0], sizes = [40, 128], strides = [1, 1]} : vector<40x384xf32> to vector<40x128xf32>
    %162 = arith.truncf %161 : vector<40x128xf32> to vector<40x128xbf16>
    %163 = vector.extract_strided_slice %160 {offsets = [0, 128], sizes = [40, 128], strides = [1, 1]} : vector<40x384xf32> to vector<40x128xf32>
    %164 = arith.truncf %163 : vector<40x128xf32> to vector<40x128xbf16>
    %165 = vector.extract_strided_slice %160 {offsets = [0, 256], sizes = [40, 128], strides = [1, 1]} : vector<40x384xf32> to vector<40x128xf32>
    %166 = arith.truncf %165 : vector<40x128xf32> to vector<40x128xbf16>
    %167 = vector.extract_strided_slice %162 {offsets = [0, 0], sizes = [40, 32], strides = [1, 1]} : vector<40x128xbf16> to vector<40x32xbf16>
    %168 = vector.extract_strided_slice %164 {offsets = [0, 0], sizes = [40, 32], strides = [1, 1]} : vector<40x128xbf16> to vector<40x32xbf16>
    %169 = vector.extract_strided_slice %166 {offsets = [0, 0], sizes = [40, 32], strides = [1, 1]} : vector<40x128xbf16> to vector<40x32xbf16>
    %cst_58 = arith.constant dense<0.000000e+00> : vector<40x40xf32>
    %170 = tpu.matmul %167, %168, %cst_58 {dimension_numbers = #tpu.dot_dimension_numbers<[1], [1], [0], [0], [0, 0, 1, 0], [], []>} : vector<40x32xbf16>, vector<40x32xbf16>, vector<40x40xf32> -> vector<40x40xf32>
    %171 = arith.addf %170, %10 : vector<40x40xf32>
    %cst_59 = arith.constant dense<0xFF800000> : vector<40xf32>
    %172 = vector.multi_reduction <maximumf>, %171, %cst_59 [1] : vector<40x40xf32> to vector<40xf32>
    %173 = vector.shape_cast %172 : vector<40xf32> to vector<40x1xf32>
    %174 = vector.broadcast %173 : vector<40x1xf32> to vector<40x40xf32>
    %175 = arith.subf %171, %174 : vector<40x40xf32>
    %176 = math.exp %175 : vector<40x40xf32>
    %cst_60 = arith.constant dense<0.000000e+00> : vector<40xf32>
    %177 = vector.multi_reduction <add>, %176, %cst_60 [1] : vector<40x40xf32> to vector<40xf32>
    %178 = vector.shape_cast %177 : vector<40xf32> to vector<40x1xf32>
    %179 = tpu.reciprocal %178 {approx = true} : vector<40x1xf32> -> vector<40x1xf32>
    %180 = arith.mulf %178, %179 : vector<40x1xf32>
    %cst_61 = arith.constant 2.000000e+00 : f32
    %181 = vector.broadcast %cst_61 : f32 to vector<40x1xf32>
    %182 = arith.subf %181, %180 : vector<40x1xf32>
    %183 = arith.mulf %179, %182 : vector<40x1xf32>
    %184 = vector.broadcast %183 : vector<40x1xf32> to vector<40x40xf32>
    %185 = arith.mulf %176, %184 : vector<40x40xf32>
    %186 = arith.truncf %185 : vector<40x40xf32> to vector<40x40xbf16>
    %cst_62 = arith.constant dense<0.000000e+00> : vector<40x32xf32>
    %187 = tpu.matmul %186, %169, %cst_62 {dimension_numbers = #tpu.dot_dimension_numbers<[1], [0], [0], [1], [0, 0, 1, 1], [], []>} : vector<40x40xbf16>, vector<40x32xbf16>, vector<40x32xf32> -> vector<40x32xf32>
    %188 = vector.extract_strided_slice %162 {offsets = [0, 32], sizes = [40, 32], strides = [1, 1]} : vector<40x128xbf16> to vector<40x32xbf16>
    %189 = vector.extract_strided_slice %164 {offsets = [0, 32], sizes = [40, 32], strides = [1, 1]} : vector<40x128xbf16> to vector<40x32xbf16>
    %190 = vector.extract_strided_slice %166 {offsets = [0, 32], sizes = [40, 32], strides = [1, 1]} : vector<40x128xbf16> to vector<40x32xbf16>
    %cst_63 = arith.constant dense<0.000000e+00> : vector<40x40xf32>
    %191 = tpu.matmul %188, %189, %cst_63 {dimension_numbers = #tpu.dot_dimension_numbers<[1], [1], [0], [0], [0, 0, 1, 0], [], []>} : vector<40x32xbf16>, vector<40x32xbf16>, vector<40x40xf32> -> vector<40x40xf32>
    %192 = arith.addf %191, %10 : vector<40x40xf32>
    %cst_64 = arith.constant dense<0xFF800000> : vector<40xf32>
    %193 = vector.multi_reduction <maximumf>, %192, %cst_64 [1] : vector<40x40xf32> to vector<40xf32>
    %194 = vector.shape_cast %193 : vector<40xf32> to vector<40x1xf32>
    %195 = vector.broadcast %194 : vector<40x1xf32> to vector<40x40xf32>
    %196 = arith.subf %192, %195 : vector<40x40xf32>
    %197 = math.exp %196 : vector<40x40xf32>
    %cst_65 = arith.constant dense<0.000000e+00> : vector<40xf32>
    %198 = vector.multi_reduction <add>, %197, %cst_65 [1] : vector<40x40xf32> to vector<40xf32>
    %199 = vector.shape_cast %198 : vector<40xf32> to vector<40x1xf32>
    %200 = tpu.reciprocal %199 {approx = true} : vector<40x1xf32> -> vector<40x1xf32>
    %201 = arith.mulf %199, %200 : vector<40x1xf32>
    %cst_66 = arith.constant 2.000000e+00 : f32
    %202 = vector.broadcast %cst_66 : f32 to vector<40x1xf32>
    %203 = arith.subf %202, %201 : vector<40x1xf32>
    %204 = arith.mulf %200, %203 : vector<40x1xf32>
    %205 = vector.broadcast %204 : vector<40x1xf32> to vector<40x40xf32>
    %206 = arith.mulf %197, %205 : vector<40x40xf32>
    %207 = arith.truncf %206 : vector<40x40xf32> to vector<40x40xbf16>
    %cst_67 = arith.constant dense<0.000000e+00> : vector<40x32xf32>
    %208 = tpu.matmul %207, %190, %cst_67 {dimension_numbers = #tpu.dot_dimension_numbers<[1], [0], [0], [1], [0, 0, 1, 1], [], []>} : vector<40x40xbf16>, vector<40x32xbf16>, vector<40x32xf32> -> vector<40x32xf32>
    %209 = vector.extract_strided_slice %162 {offsets = [0, 64], sizes = [40, 32], strides = [1, 1]} : vector<40x128xbf16> to vector<40x32xbf16>
    %210 = vector.extract_strided_slice %164 {offsets = [0, 64], sizes = [40, 32], strides = [1, 1]} : vector<40x128xbf16> to vector<40x32xbf16>
    %211 = vector.extract_strided_slice %166 {offsets = [0, 64], sizes = [40, 32], strides = [1, 1]} : vector<40x128xbf16> to vector<40x32xbf16>
    %cst_68 = arith.constant dense<0.000000e+00> : vector<40x40xf32>
    %212 = tpu.matmul %209, %210, %cst_68 {dimension_numbers = #tpu.dot_dimension_numbers<[1], [1], [0], [0], [0, 0, 1, 0], [], []>} : vector<40x32xbf16>, vector<40x32xbf16>, vector<40x40xf32> -> vector<40x40xf32>
    %213 = arith.addf %212, %10 : vector<40x40xf32>
    %cst_69 = arith.constant dense<0xFF800000> : vector<40xf32>
    %214 = vector.multi_reduction <maximumf>, %213, %cst_69 [1] : vector<40x40xf32> to vector<40xf32>
    %215 = vector.shape_cast %214 : vector<40xf32> to vector<40x1xf32>
    %216 = vector.broadcast %215 : vector<40x1xf32> to vector<40x40xf32>
    %217 = arith.subf %213, %216 : vector<40x40xf32>
    %218 = math.exp %217 : vector<40x40xf32>
    %cst_70 = arith.constant dense<0.000000e+00> : vector<40xf32>
    %219 = vector.multi_reduction <add>, %218, %cst_70 [1] : vector<40x40xf32> to vector<40xf32>
    %220 = vector.shape_cast %219 : vector<40xf32> to vector<40x1xf32>
    %221 = tpu.reciprocal %220 {approx = true} : vector<40x1xf32> -> vector<40x1xf32>
    %222 = arith.mulf %220, %221 : vector<40x1xf32>
    %cst_71 = arith.constant 2.000000e+00 : f32
    %223 = vector.broadcast %cst_71 : f32 to vector<40x1xf32>
    %224 = arith.subf %223, %222 : vector<40x1xf32>
    %225 = arith.mulf %221, %224 : vector<40x1xf32>
    %226 = vector.broadcast %225 : vector<40x1xf32> to vector<40x40xf32>
    %227 = arith.mulf %218, %226 : vector<40x40xf32>
    %228 = arith.truncf %227 : vector<40x40xf32> to vector<40x40xbf16>
    %cst_72 = arith.constant dense<0.000000e+00> : vector<40x32xf32>
    %229 = tpu.matmul %228, %211, %cst_72 {dimension_numbers = #tpu.dot_dimension_numbers<[1], [0], [0], [1], [0, 0, 1, 1], [], []>} : vector<40x40xbf16>, vector<40x32xbf16>, vector<40x32xf32> -> vector<40x32xf32>
    %230 = vector.extract_strided_slice %162 {offsets = [0, 96], sizes = [40, 32], strides = [1, 1]} : vector<40x128xbf16> to vector<40x32xbf16>
    %231 = vector.extract_strided_slice %164 {offsets = [0, 96], sizes = [40, 32], strides = [1, 1]} : vector<40x128xbf16> to vector<40x32xbf16>
    %232 = vector.extract_strided_slice %166 {offsets = [0, 96], sizes = [40, 32], strides = [1, 1]} : vector<40x128xbf16> to vector<40x32xbf16>
    %cst_73 = arith.constant dense<0.000000e+00> : vector<40x40xf32>
    %233 = tpu.matmul %230, %231, %cst_73 {dimension_numbers = #tpu.dot_dimension_numbers<[1], [1], [0], [0], [0, 0, 1, 0], [], []>} : vector<40x32xbf16>, vector<40x32xbf16>, vector<40x40xf32> -> vector<40x40xf32>
    %234 = arith.addf %233, %10 : vector<40x40xf32>
    %cst_74 = arith.constant dense<0xFF800000> : vector<40xf32>
    %235 = vector.multi_reduction <maximumf>, %234, %cst_74 [1] : vector<40x40xf32> to vector<40xf32>
    %236 = vector.shape_cast %235 : vector<40xf32> to vector<40x1xf32>
    %237 = vector.broadcast %236 : vector<40x1xf32> to vector<40x40xf32>
    %238 = arith.subf %234, %237 : vector<40x40xf32>
    %239 = math.exp %238 : vector<40x40xf32>
    %cst_75 = arith.constant dense<0.000000e+00> : vector<40xf32>
    %240 = vector.multi_reduction <add>, %239, %cst_75 [1] : vector<40x40xf32> to vector<40xf32>
    %241 = vector.shape_cast %240 : vector<40xf32> to vector<40x1xf32>
    %242 = tpu.reciprocal %241 {approx = true} : vector<40x1xf32> -> vector<40x1xf32>
    %243 = arith.mulf %241, %242 : vector<40x1xf32>
    %cst_76 = arith.constant 2.000000e+00 : f32
    %244 = vector.broadcast %cst_76 : f32 to vector<40x1xf32>
    %245 = arith.subf %244, %243 : vector<40x1xf32>
    %246 = arith.mulf %242, %245 : vector<40x1xf32>
    %247 = vector.broadcast %246 : vector<40x1xf32> to vector<40x40xf32>
    %248 = arith.mulf %239, %247 : vector<40x40xf32>
    %249 = arith.truncf %248 : vector<40x40xf32> to vector<40x40xbf16>
    %cst_77 = arith.constant dense<0.000000e+00> : vector<40x32xf32>
    %250 = tpu.matmul %249, %232, %cst_77 {dimension_numbers = #tpu.dot_dimension_numbers<[1], [0], [0], [1], [0, 0, 1, 1], [], []>} : vector<40x40xbf16>, vector<40x32xbf16>, vector<40x32xf32> -> vector<40x32xf32>
    %251 = tpu.concatenate %187, %208, %229, %250 in 1 : vector<40x32xf32>, vector<40x32xf32>, vector<40x32xf32>, vector<40x32xf32> -> vector<40x128xf32>
    %252 = arith.truncf %251 : vector<40x128xf32> to vector<40x128xbf16>
    %c0_78 = arith.constant 0 : index
    %c0_79 = arith.constant 0 : index
    %253 = vector.load %arg10[%c0_78, %c0_79] : memref<128x128xbf16, #tpu.memory_space<vmem>>, vector<128x128xbf16>
    %cst_80 = arith.constant dense<0.000000e+00> : vector<40x128xf32>
    %254 = tpu.matmul %252, %253, %cst_80 {dimension_numbers = #tpu.dot_dimension_numbers<[1], [0], [0], [1], [0, 0, 1, 1], [], []>} : vector<40x128xbf16>, vector<128x128xbf16>, vector<40x128xf32> -> vector<40x128xf32>
    %c0_81 = arith.constant 0 : index
    %c0_82 = arith.constant 0 : index
    %255 = vector.load %arg11[%c0_81, %c0_82] : memref<1x128xf32, #tpu.memory_space<vmem>>, vector<1x128xf32>
    %256 = vector.broadcast %255 : vector<1x128xf32> to vector<40x128xf32>
    %257 = arith.addf %254, %256 : vector<40x128xf32>
    %258 = arith.addf %0, %257 : vector<40x128xf32>
    %cst_83 = arith.constant dense<0.000000e+00> : vector<40xf32>
    %259 = vector.multi_reduction <add>, %258, %cst_83 [1] : vector<40x128xf32> to vector<40xf32>
    %260 = vector.shape_cast %259 : vector<40xf32> to vector<40x1xf32>
    %cst_84 = arith.constant 1.280000e+02 : f32
    %261 = vector.broadcast %cst_84 : f32 to vector<40x1xf32>
    %262 = arith.divf %260, %261 : vector<40x1xf32>
    %263 = vector.broadcast %262 : vector<40x1xf32> to vector<40x128xf32>
    %264 = arith.subf %258, %263 : vector<40x128xf32>
    %265 = arith.mulf %264, %264 : vector<40x128xf32>
    %cst_85 = arith.constant dense<0.000000e+00> : vector<40xf32>
    %266 = vector.multi_reduction <add>, %265, %cst_85 [1] : vector<40x128xf32> to vector<40xf32>
    %267 = vector.shape_cast %266 : vector<40xf32> to vector<40x1xf32>
    %cst_86 = arith.constant 1.280000e+02 : f32
    %268 = vector.broadcast %cst_86 : f32 to vector<40x1xf32>
    %269 = arith.divf %267, %268 : vector<40x1xf32>
    %cst_87 = arith.constant 9.99999974E-6 : f32
    %270 = vector.broadcast %cst_87 : f32 to vector<40x1xf32>
    %271 = arith.addf %269, %270 : vector<40x1xf32>
    %272 = math.rsqrt %271 : vector<40x1xf32>
    %273 = vector.broadcast %272 : vector<40x1xf32> to vector<40x128xf32>
    %274 = arith.mulf %264, %273 : vector<40x128xf32>
    %275 = vector.broadcast %3 : vector<1x128xf32> to vector<40x128xf32>
    %276 = arith.mulf %274, %275 : vector<40x128xf32>
    %277 = vector.broadcast %4 : vector<1x128xf32> to vector<40x128xf32>
    %278 = arith.addf %276, %277 : vector<40x128xf32>
    %279 = arith.truncf %278 : vector<40x128xf32> to vector<40x128xbf16>
    %c0_88 = arith.constant 0 : index
    %c0_89 = arith.constant 0 : index
    %280 = vector.load %arg12[%c0_88, %c0_89] : memref<128x512xbf16, #tpu.memory_space<vmem>>, vector<128x512xbf16>
    %cst_90 = arith.constant dense<0.000000e+00> : vector<40x512xf32>
    %281 = tpu.matmul %279, %280, %cst_90 {dimension_numbers = #tpu.dot_dimension_numbers<[1], [0], [0], [1], [0, 0, 1, 1], [], []>} : vector<40x128xbf16>, vector<128x512xbf16>, vector<40x512xf32> -> vector<40x512xf32>
    %c0_91 = arith.constant 0 : index
    %c0_92 = arith.constant 0 : index
    %282 = vector.load %arg13[%c0_91, %c0_92] : memref<1x512xf32, #tpu.memory_space<vmem>>, vector<1x512xf32>
    %283 = vector.broadcast %282 : vector<1x512xf32> to vector<40x512xf32>
    %284 = arith.addf %281, %283 : vector<40x512xf32>
    %cst_93 = arith.constant 5.000000e-01 : f32
    %285 = vector.broadcast %cst_93 : f32 to vector<40x512xf32>
    %286 = arith.mulf %285, %284 : vector<40x512xf32>
    %cst_94 = arith.constant 4.471500e-02 : f32
    %287 = vector.broadcast %cst_94 : f32 to vector<40x512xf32>
    %288 = arith.mulf %287, %284 : vector<40x512xf32>
    %289 = arith.mulf %288, %284 : vector<40x512xf32>
    %290 = arith.mulf %289, %284 : vector<40x512xf32>
    %291 = arith.addf %284, %290 : vector<40x512xf32>
    %cst_95 = arith.constant 0.797884583 : f32
    %292 = vector.broadcast %cst_95 : f32 to vector<40x512xf32>
    %293 = arith.mulf %292, %291 : vector<40x512xf32>
    %294 = math.tanh %293 : vector<40x512xf32>
    %cst_96 = arith.constant 1.000000e+00 : f32
    %295 = vector.broadcast %cst_96 : f32 to vector<40x512xf32>
    %296 = arith.addf %295, %294 : vector<40x512xf32>
    %297 = arith.mulf %286, %296 : vector<40x512xf32>
    %298 = arith.truncf %297 : vector<40x512xf32> to vector<40x512xbf16>
    %c0_97 = arith.constant 0 : index
    %c0_98 = arith.constant 0 : index
    %299 = vector.load %arg14[%c0_97, %c0_98] : memref<512x128xbf16, #tpu.memory_space<vmem>>, vector<512x128xbf16>
    %cst_99 = arith.constant dense<0.000000e+00> : vector<40x128xf32>
    %300 = tpu.matmul %298, %299, %cst_99 {dimension_numbers = #tpu.dot_dimension_numbers<[1], [0], [0], [1], [0, 0, 1, 1], [], []>} : vector<40x512xbf16>, vector<512x128xbf16>, vector<40x128xf32> -> vector<40x128xf32>
    %c0_100 = arith.constant 0 : index
    %c0_101 = arith.constant 0 : index
    %301 = vector.load %arg15[%c0_100, %c0_101] : memref<1x128xf32, #tpu.memory_space<vmem>>, vector<1x128xf32>
    %302 = vector.broadcast %301 : vector<1x128xf32> to vector<40x128xf32>
    %303 = arith.addf %300, %302 : vector<40x128xf32>
    %304 = arith.addf %258, %303 : vector<40x128xf32>
    %c0_102 = arith.constant 0 : index
    %c0_103 = arith.constant 0 : index
    %305 = vector.load %arg16[%c0_102, %c0_103] : memref<40x128xf32, #tpu.memory_space<vmem>>, vector<40x128xf32>
    tpu.vector_store %arg16[%c0_102, %c0_103], %304 {strides = array<i32>} : memref<40x128xf32, #tpu.memory_space<vmem>>, vector<40x128xf32>,
    return
  }
  func.func @transform_0(%arg0: i32) -> (i32, i32) {
    %c0_i32 = arith.constant 0 : i32
    %c0_i32_0 = arith.constant 0 : i32
    return %arg0, %c0_i32 : i32, i32
  }
  func.func @transform_1(%arg0: i32) -> (i32, i32) {
    %c0_i32 = arith.constant 0 : i32
    %c0_i32_0 = arith.constant 0 : i32
    %c0_i32_1 = arith.constant 0 : i32
    return %c0_i32, %c0_i32_0 : i32, i32
  }
  func.func @transform_2(%arg0: i32) -> (i32, i32, i32) {
    %c0_i32 = arith.constant 0 : i32
    %c0_i32_0 = arith.constant 0 : i32
    %c0_i32_1 = arith.constant 0 : i32
    %c0_i32_2 = arith.constant 0 : i32
    return %c0_i32, %c0_i32_0, %c0_i32_1 : i32, i32, i32
  }
  func.func @transform_3(%arg0: i32) -> (i32, i32) {
    %c0_i32 = arith.constant 0 : i32
    %c0_i32_0 = arith.constant 0 : i32
    %c0_i32_1 = arith.constant 0 : i32
    return %c0_i32, %c0_i32_0 : i32, i32
  }
  func.func @transform_4(%arg0: i32) -> (i32, i32) {
    %c0_i32 = arith.constant 0 : i32
    %c0_i32_0 = arith.constant 0 : i32
    %c0_i32_1 = arith.constant 0 : i32
    return %c0_i32, %c0_i32_0 : i32, i32
  }
  func.func @transform_5(%arg0: i32) -> (i32, i32) {
    %c0_i32 = arith.constant 0 : i32
    %c0_i32_0 = arith.constant 0 : i32
    %c0_i32_1 = arith.constant 0 : i32
    return %c0_i32, %c0_i32_0 : i32, i32
  }
  func.func @transform_6(%arg0: i32) -> (i32, i32) {
    %c0_i32 = arith.constant 0 : i32
    %c0_i32_0 = arith.constant 0 : i32
    %c0_i32_1 = arith.constant 0 : i32
    return %c0_i32, %c0_i32_0 : i32, i32
  }
  func.func @transform_7(%arg0: i32) -> (i32, i32) {
    %c0_i32 = arith.constant 0 : i32
    %c0_i32_0 = arith.constant 0 : i32
    %c0_i32_1 = arith.constant 0 : i32
    return %c0_i32, %c0_i32_0 : i32, i32
  }
  func.func @transform_8(%arg0: i32) -> (i32, i32) {
    %c0_i32 = arith.constant 0 : i32
    %c0_i32_0 = arith.constant 0 : i32
    %c0_i32_1 = arith.constant 0 : i32
    return %c0_i32, %c0_i32_0 : i32, i32
  }
  func.func @transform_9(%arg0: i32) -> (i32, i32) {
    %c0_i32 = arith.constant 0 : i32
    %c0_i32_0 = arith.constant 0 : i32
    %c0_i32_1 = arith.constant 0 : i32
    return %c0_i32, %c0_i32_0 : i32, i32
  }
  func.func @transform_10(%arg0: i32) -> (i32, i32) {
    %c0_i32 = arith.constant 0 : i32
    %c0_i32_0 = arith.constant 0 : i32
    %c0_i32_1 = arith.constant 0 : i32
    return %c0_i32, %c0_i32_0 : i32, i32
  }
  func.func @transform_11(%arg0: i32) -> (i32, i32) {
    %c0_i32 = arith.constant 0 : i32
    %c0_i32_0 = arith.constant 0 : i32
    %c0_i32_1 = arith.constant 0 : i32
    return %c0_i32, %c0_i32_0 : i32, i32
  }
  func.func @transform_12(%arg0: i32) -> (i32, i32) {
    %c0_i32 = arith.constant 0 : i32
    %c0_i32_0 = arith.constant 0 : i32
    %c0_i32_1 = arith.constant 0 : i32
    return %c0_i32, %c0_i32_0 : i32, i32
  }
  func.func @transform_13(%arg0: i32) -> (i32, i32) {
    %c0_i32 = arith.constant 0 : i32
    %c0_i32_0 = arith.constant 0 : i32
    %c0_i32_1 = arith.constant 0 : i32
    return %c0_i32, %c0_i32_0 : i32, i32
  }
  func.func @transform_14(%arg0: i32) -> (i32, i32) {
    %c0_i32 = arith.constant 0 : i32
    %c0_i32_0 = arith.constant 0 : i32
    %c0_i32_1 = arith.constant 0 : i32
    return %c0_i32, %c0_i32_0 : i32, i32
  }
  func.func @transform_15(%arg0: i32) -> (i32, i32) {
    %c0_i32 = arith.constant 0 : i32
    %c0_i32_0 = arith.constant 0 : i32
    return %arg0, %c0_i32 : i32, i32
  }
}

</mosaic_0001>

<bundles_post_ra>
// kernel: spacetime_block.1
= control target key start
LH: loop header
LB: loop body
LE: loop exit
PB: predicated region body
PF: predicated region fallthrough
CT: control target
= control target key end

     0   :  { %s6953_s0 = inlined_call_operand.vmem [shape: f32[80,128], index: 0, kind: input, shape index: {}]   ;;  %s6954_s1 = inlined_call_operand.vmem [shape: f32[6,128], index: 1, kind: input, shape index: {}]   ;;  %s6955_s2 = inlined_call_operand.hbm [shape: f32[2,40,40], index: 2, kind: input, shape index: {}]   ;;  %s6956_s3 = inlined_call_operand.hbm [shape: bf16[128,384], index: 3, kind: input, shape index: {}]   ;;  %s6957_s4 = inlined_call_operand.vmem [shape: f32[1,384], index: 4, kind: input, shape index: {}]   ;;  %s6958_s5 = inlined_call_operand.hbm [shape: bf16[128,128], index: 5, kind: input, shape index: {}]   ;;  %s6959_s6 = inlined_call_operand.vmem [shape: f32[1,128], index: 6, kind: input, shape index: {}]   ;;  %s6960_s7 = inlined_call_operand.hbm [shape: bf16[128,384], index: 7, kind: input, shape index: {}]   ;;  %s6961_s8 = inlined_call_operand.vmem [shape: f32[1,384], index: 8, kind: input, shape index: {}]   ;;  %s6962_s9 = inlined_call_operand.hbm [shape: bf16[128,128], index: 9, kind: input, shape index: {}]   ;;  %s6963_s10 = inlined_call_operand.vmem [shape: f32[1,128], index: 10, kind: input, shape index: {}]   ;;  %s6964_s11 = inlined_call_operand.vmem [shape: bf16[128,512], index: 11, kind: input, shape index: {}]   ;;  %s6965_s12 = inlined_call_operand.vmem [shape: f32[1,512], index: 12, kind: input, shape index: {}]   ;;  %s6966_s13 = inlined_call_operand.hbm [shape: bf16[512,128], index: 13, kind: input, shape index: {}]   ;;  %s6967_s14 = inlined_call_operand.vmem [shape: f32[1,128], index: 14, kind: input, shape index: {}]   ;;  %s6968_s15 = inlined_call_operand.vmem [shape: f32[80,128], index: 15, kind: output, shape index: {}]  }
   0x1   :  { %6970 = sst [smem:[#allocation16_spill]] %s6955_s2 }
   0x2   :  { %6971 = sst [smem:[#allocation17_spill]] %s6956_s3 }
   0x3   :  { %6972 = sst [smem:[#allocation18_spill]] %s6960_s7 }
   0x4   :  { %6973 = sst [smem:[#allocation19_spill]] %s6967_s14 }
   0x5   :  { %6974 = sst [smem:[#allocation20_spill]] %s6968_s15 }
   0x6   :  { %20 = vsyncpa [#allocation3], 0 }
   0x7   :  { %21 = vsyncpa [#allocation5], 0 }
   0x8   :  { %22 = vsyncpa [#allocation8], 0 }
   0x9   :  { %23 = vsyncpa [#allocation11], 0  ;;  %s5587_s18 = smov 0  }
   0xa LB: > { %s6975_s3 = sld [smem:[#allocation17_spill]]  ;;  %s6969_s22 = sadd.s32 4294967295, %s5489_s18   ;;  %s5489_s18 = sphi %s5587_s18, %s29_s18  }
   0xb   : > { %p4190_p0 = scmp.ge.s32.totalorder %s5489_s18, 1  ;;  %p380_p1 = scmp.lt.s32.totalorder %s5489_s18, 3 }
   0xc   : > { %p5600_p2 = scmp.eq.s32.totalorder %s6969_s22, 0  ;;  %s5491_s25 = smov [#allocation4]  }
   0xd   : > { %p5604_p3 = pnand %p4190_p0, %p380_p1  ;;  %s410_s26 = sshll.u32 %s5491_s25, 4  ;;  %s411_s26 = int_to_ptr.vmem [resolvable:$true] %s410_s26 }
   0xe   : > { %s6978_s7 = sld [smem:[#allocation18_spill]]  ;;  %s5492_s16 = smov [#allocation7]  }
   0xf   : > { %p4921_p4 = pneg %p5604_p3  ;;  %s444_s17 = sshll.u32 %s5492_s16, 4  ;;  %s445_s17 = int_to_ptr.vmem [resolvable:$true] %s444_s17 }
  0x10   : > { %s408_s21 = sshll.u32 %s6975_s3, 4  ;;  %s6980_s2 = sld [smem:[#allocation16_spill]]  ;;  %s409_s21 = int_to_ptr.hbm [resolvable:$true] %s408_s21 }
  0x11   : > { %p5615_p5 = pnand %p5600_p2, %p4921_p4  ;;  %s5493_s22 = smov 192  }
  0x12   : > { %s5494_s3 = smov 12   ;;  %s5495_s27 = smov [#allocation2]  }
  0x13   : > { %4927 = dma.hbm_to_vmem [thread:$0]  (!%p5615_p5), %s409_s21, 3072, %s411_s26, [#allocation5], %s5493_s22, %s5493_s22, %s5494_s3  }
  0x14   : > { %s442_s29 = sshll.u32 %s6978_s7, 4  ;;  %s396_s28 = sshll.u32 %s5495_s27, 4  ;;  %s443_s29 = int_to_ptr.hbm [resolvable:$true] %s442_s29  ;;  %s397_s28 = int_to_ptr.vmem [resolvable:$true] %s396_s28 }
  0x15   : > { %4933 = dma.hbm_to_vmem [thread:$0]  (!%p5615_p5), %s443_s29, 3072, %s445_s17, [#allocation8], %s5493_s22, %s5493_s22, %s5494_s3  }
  0x16   : > { %s394_s25 = sshll.u32 %s6980_s2, 4  ;;  %s5496_s7 = smov 128   ;;  %s395_s25 = int_to_ptr.hbm [resolvable:$true] %s394_s25 }
  0x17   : > { %s5497_s15 = smov 8   ;;  %s425_s20 = sshll.u32 %s6958_s5, 4  ;;  %s426_s20 = int_to_ptr.hbm [resolvable:$true] %s425_s20 }
  0x18   : > { %4924 = dma.hbm_to_vmem [thread:$0]  (!%p5615_p5), %s395_s25, 1280, %s397_s28, [#allocation3], %s5496_s7, %s5496_s7, %s5497_s15  }
  0x19   : > { %s5498_s2 = smov [#allocation6]   ;;  %s459_s22 = sshll.u32 %s6962_s9, 4  ;;  %s460_s22 = int_to_ptr.hbm [resolvable:$true] %s459_s22 }
  0x1a   : > { %s427_s14 = sshll.u32 %s5498_s2, 4  ;;  %s5499_s26 = smov 64   ;;  %s428_s14 = int_to_ptr.vmem [resolvable:$true] %s427_s14 }
  0x1b   : > { %s5500_s29 = smov 4   ;;  %s5501_s17 = smov [#allocation9]  }
  0x1c   : > { %4930 = dma.hbm_to_vmem [thread:$0]  (!%p5615_p5), %s426_s20, 1024, %s428_s14, [#allocation5], %s5499_s26, %s5499_s26, %s5500_s29  }
  0x1d   : > { %s461_s7 = sshll.u32 %s5501_s17, 4  ;;  %s482_s27 = sshll.u32 %s6966_s13, 4  ;;  %s462_s7 = int_to_ptr.vmem [resolvable:$true] %s461_s7  ;;  %s483_s27 = int_to_ptr.hbm [resolvable:$true] %s482_s27 }
  0x1e   : > { %4936 = dma.hbm_to_vmem [thread:$0]  (!%p5615_p5), %s460_s22, 1024, %s462_s7, [#allocation8], %s5499_s26, %s5499_s26, %s5500_s29  }
  0x1f   : > { %s5502_s2 = smov [#allocation10]   ;;  %512 = sbr.rel (%p5604_p3) target bundleno = 3677 (0xe5d), region = 80 }
  0x20   : > { %s484_s28 = sshll.u32 %s5502_s2, 4  ;;  %s485_s28 = int_to_ptr.vmem [resolvable:$true] %s484_s28 }
  0x21   : > { %4939 = dma.hbm_to_vmem [thread:$0]  (!%p5615_p5), %s483_s27, 4096, %s485_s28, [#allocation11], %s5499_s26, %s5499_s26, %s5500_s29  }
  0x24   : > { %5472 = dma.done.wait (%p5600_p2), [#allocation3], 1280  }
  0x25   : > { %5474 = vsyncadd (%p5600_p2), [#allocation3], 4294966016 }
  0x26   : > { %5476 = dma.done.wait (%p5600_p2), [#allocation5], 4096  }
  0x27   : > { %5478 = vsyncadd (%p5600_p2), [#allocation5], 4294963200 }
  0x28   : > { %5480 = dma.done.wait (%p5600_p2), [#allocation8], 4096  }
  0x29   : > { %5482 = vsyncadd (%p5600_p2), [#allocation8], 4294963200 }
  0x2a   : > { %5484 = dma.done.wait (%p5600_p2), [#allocation11], 4096  }
  0x2b   : > { %5486 = vsyncadd (%p5600_p2), [#allocation11], 4294963200  ;;  %s6981_s14 = sadd.s32 4294967295, %s5489_s18   ;;  %v5503_v5 = vmov 128.0   ;;  %v4293_v32 = vld [vmem:[#allocation4 + $0xa8] sm:$0xf] }
  0x2c   : > { %s586_s24 = smul.u32 5, %s6981_s14  ;;  %5045 = vrcp.f32 %v5503_v5  ;;  %v4791_v33 = vld [vmem:[#allocation4 + $0xb0] sm:$0xf0]  ;;  %v4790_v34 = vld [vmem:[#allocation4 + $0xac] sm:$0xf]  ;;  %s5504_s17 = smov 96  }
  0x2d   : > { %v4294_v35 = vor.u32 %v4791_v33, %v4293_v32  ;;  %v4295_v36 = vld [vmem:[#allocation4 + $0xb4] sm:$0xf0]  ;;  %v4301_v37 = vld [vmem:[#allocation4 + $0xb0] sm:$0xf]  ;;  %v4792_v38 = vld [vmem:[#allocation4 + $0xb8] sm:$0xf0] }
  0x2e   : > { %p587_p6 = scmp.lt.s32.totalorder %s586_s24, 9  ;;  %v4298_v39 = vor.u32 %v4790_v34, %v4295_v36  ;;  %v4302_v40 = vor.u32 %v4792_v38, %v4301_v37  ;;  %v4281_v41 = vld [vmem:[#allocation4 + $0x90] sm:$0xf]  ;;  %v4788_v42 = vld [vmem:[#allocation4 + $0x98] sm:$0xf0]  ;;  %s5505_s7 = smov 64  }
  0x2f   : > { %911 = vmatpush.bf16.msra.mxu0 %v4294_v35  ;;  %v4787_v43 = vld [vmem:[#allocation4 + $0x94] sm:$0xf]  ;;  %v4282_v44 = vor.u32 %v4788_v42, %v4281_v41  ;;  %v4283_v45 = vld [vmem:[#allocation4 + $0x9c] sm:$0xf0]  ;;  %v4289_v46 = vld [vmem:[#allocation4 + $0x98] sm:$0xf] }
  0x30   : > { %s6985_s24 = smov (!%p587_p6, %s586_s24), 9  ;;  %934 = vmatpush.bf16.msra.mxu1 %v4298_v39  ;;  %957 = vmatpush.bf16.msra.mxu2 %v4302_v40  ;;  %v4789_v47 = vld [vmem:[#allocation4 + $0xa0] sm:$0xf0]  ;;  %v4286_v48 = vor.u32 %v4787_v43, %v4283_v45  ;;  %v4269_v50 = vld [vmem:[#allocation4 + $0x78] sm:$0xf]  ;;  %s5506_s15 = smov 32  }
  0x31   : > { %s4205_s30 = sshll.u32 %s6985_s24, 3  ;;  %v4290_v49 = vor.u32 %v4789_v47, %v4289_v46  ;;  %v4785_v51 = vld [vmem:[#allocation4 + $0x80] sm:$0xf0]  ;;  %v4784_v52 = vld [vmem:[#allocation4 + $0x7c] sm:$0xf]  ;;  %s6983_s29 = sld [smem:[#allocation20_spill]] }
  0x32   : > { %s5671_s20 = scalar_lea.vmem %s6953_s0, %s4205_s30  ;;  %v5046_v6 = vpop.eup %5045  ;;  %v4270_v53 = vor.u32 %v4785_v51, %v4269_v50  ;;  %v4271_v54 = vld [vmem:[#allocation4 + $0x84] sm:$0xf0]  ;;  %v4277_v55 = vld [vmem:[#allocation4 + $0x80] sm:$0xf]  ;;  %v4786_v56 = vld [vmem:[#allocation4 + $0x88] sm:$0xf0] }
  0x33   : > { %v601_v0 = vld [vmem:[%s5671_s20 + $0x10] sm:$0xff]  ;;  %v599_v1 = vld [vmem:[%s5671_s20] sm:$0xff]  ;;  %v602_v3 = vld [vmem:[%s5671_s20 + $0x18] sm:$0xff]  ;;  %v632_v7 = vmul.f32 128.0, %v5046_v6  ;;  %vm636_vm0 = vweird.f32 %v5046_v6  ;;  %912 = vmatpush.bf16.msra.mxu0 %v4282_v44  ;;  %v4274_v57 = vor.u32 %v4784_v52, %v4271_v54  ;;  %v4278_v58 = vor.u32 %v4786_v56, %v4277_v55 }
  0x34   : > { %625 = vadd.xlane.f32.xlu1 %v601_v0  ;;  %621 = vadd.xlane.f32.xlu0 %v599_v1  ;;  %v603_v2 = vld [vmem:[%s5671_s20 + $0x20] sm:$0xff]  ;;  %v600_v4 = vld [vmem:[%s5671_s20 + $0x8] sm:$0xff]  ;;  %v4257_v59 = vld [vmem:[#allocation4 + $0x60] sm:$0xf] }
  0x35   : > { %629 = vadd.xlane.f32.xlu2 %v603_v2  ;;  %v633_v8 = vsub.f32 1.0, %v632_v7  ;;  %935 = vmatpush.bf16.msra.mxu1 %v4286_v48  ;;  %v4782_v60 = vld [vmem:[#allocation4 + $0x68] sm:$0xf0]  ;;  %v4781_v61 = vld [vmem:[#allocation4 + $0x64] sm:$0xf] }
  0x36   : > { %958 = vmatpush.bf16.msra.mxu2 %v4290_v49  ;;  %v4258_v62 = vor.u32 %v4782_v60, %v4257_v59  ;;  %v4259_v63 = vld [vmem:[#allocation4 + $0x6c] sm:$0xf0]  ;;  %v4779_v5 = vld [vmem:[#allocation4 + $0x50] sm:$0xf0]  ;;  %v4223_v32 = vld [vmem:[#allocation4 + $0x24] sm:$0xf0] }
  0x37   : > { %v634_v9 = vmul.f32 %v5046_v6, %v633_v8  ;;  %913 = vmatpush.bf16.msra.mxu0 %v4270_v53  ;;  %v4247_v8 = vld [vmem:[#allocation4 + $0x54] sm:$0xf0]  ;;  %v4229_v33 = vld [vmem:[#allocation4 + $0x20] sm:$0xf]  ;;  %v4774_v34 = vld [vmem:[#allocation4 + $0x28] sm:$0xf0] }
  0x38   : > { %v4230_v37 = vor.u32 %v4774_v34, %v4229_v33  ;;  %v4209_v40 = vld [vmem:[#allocation4] sm:$0xf]  ;;  %v4770_v41 = vld [vmem:[#allocation4 + $0x8] sm:$0xf0]  ;;  %v4769_v42 = vld [vmem:[#allocation4 + $0x4] sm:$0xf] }
  0x39   : > { %v635_v10 = vadd.f32 %v5046_v6, %v634_v9  ;;  %936 = vmatpush.bf16.msra.mxu1 %v4274_v57  ;;  %v4253_v9 = vld [vmem:[#allocation4 + $0x50] sm:$0xf]  ;;  %v4210_v44 = vor.u32 %v4770_v41, %v4209_v40  ;;  %v4217_v48 = vld [vmem:[#allocation4 + $0x8] sm:$0xf]  ;;  %v4771_v49 = vld [vmem:[#allocation4 + $0x10] sm:$0xf0] }
  0x3a   : > { %959 = vmatpush.bf16.msra.mxu2 %v4278_v58  ;;  %v4211_v45 = vld [vmem:[#allocation4 + $0xc] sm:$0xf0]  ;;  %v4218_v50 = vor.u32 %v4771_v49, %v4217_v48 }
  0x3b   : > { %v5678_v11 = vsel %vm636_vm0, %v5046_v6, %v635_v10  ;;  %914 = vmatpush.bf16.msra.mxu0 %v4258_v62  ;;  %v4778_v6 = vld [vmem:[#allocation4 + $0x4c] sm:$0xf]  ;;  %v4780_v10 = vld [vmem:[#allocation4 + $0x58] sm:$0xf0]  ;;  %v4214_v47 = vor.u32 %v4769_v42, %v4211_v45  ;;  %vm1021_vm0 = vcmask 261120  }
  0x3c   : > { %627 = vadd.xlane.f32.xlu1 %v602_v3  ;;  %623 = vadd.xlane.f32.xlu0 %v600_v4 }
  0xa7   : > { %v626_v12 = vpop.xlane.xlu1 %625  ;;  %v622_v13 = vpop.xlane.xlu0 %621 }
  0xa8   : > { %v640_v14 = vmul.f32 %v5678_v11, %v626_v12  ;;  %v638_v15 = vmul.f32 %v5678_v11, %v622_v13  ;;  %v630_v20 = vpop.xlane.xlu2 %629  ;;  %v4250_v12 = vor.u32 %v4778_v6, %v4247_v8  ;;  %v4254_v13 = vor.u32 %v4780_v10, %v4253_v9 }
  0xa9   : > { %v642_v27 = vmul.f32 %v5678_v11, %v630_v20  ;;  %v4235_v20 = vld [vmem:[#allocation4 + $0x3c] sm:$0xf0] }
  0xaa   : > { %v5682_v16 = vsub.f32 %v601_v0, %v640_v14  ;;  %v5684_v17 = vsub.f32 %v599_v1, %v638_v15  ;;  %v4265_v0 = vld [vmem:[#allocation4 + $0x68] sm:$0xf]  ;;  %v4783_v1 = vld [vmem:[#allocation4 + $0x70] sm:$0xf0]  ;;  %v4233_v14 = vld [vmem:[#allocation4 + $0x30] sm:$0xf] }
  0xab   : > { %v5701_v30 = vsub.f32 %v603_v2, %v642_v27  ;;  %v4262_v2 = vor.u32 %v4781_v61, %v4259_v63  ;;  %v4776_v15 = vld [vmem:[#allocation4 + $0x38] sm:$0xf0]  ;;  %v4221_v27 = vld [vmem:[#allocation4 + $0x18] sm:$0xf] }
  0xac   : > { %v650_v18 = vmul.f32 %v5682_v16, %v5682_v16  ;;  %v648_v19 = vmul.f32 %v5684_v17, %v5684_v17 }
  0xad   : > { %v652_v31 = vmul.f32 %v5701_v30, %v5701_v30  ;;  %937 = vmatpush.bf16.msra.mxu1 %v4262_v2 }
  0xae   : > { %657 = vadd.xlane.f32.xlu1 %v650_v18  ;;  %653 = vadd.xlane.f32.xlu2 %v648_v19  ;;  %v4775_v18 = vld [vmem:[#allocation4 + $0x34] sm:$0xf]  ;;  %v4234_v19 = vor.u32 %v4776_v15, %v4233_v14 }
  0xaf   : > { %v628_v21 = vpop.xlane.xlu1 %627  ;;  %v624_v22 = vpop.xlane.xlu0 %623 }
  0xb0   : > { %v641_v23 = vmul.f32 %v5678_v11, %v628_v21  ;;  %v639_v24 = vmul.f32 %v5678_v11, %v624_v22  ;;  %v4241_v21 = vld [vmem:[#allocation4 + $0x38] sm:$0xf]  ;;  %v4777_v22 = vld [vmem:[#allocation4 + $0x40] sm:$0xf0] }
  0xb1   : > { %938 = vmatpush.bf16.msra.mxu1 %v4250_v12 }
  0xb2   : > { %v5692_v25 = vsub.f32 %v602_v3, %v641_v23  ;;  %v5694_v26 = vsub.f32 %v600_v4, %v639_v24  ;;  %v4266_v3 = vor.u32 %v4783_v1, %v4265_v0  ;;  %v4245_v4 = vld [vmem:[#allocation4 + $0x48] sm:$0xf]  ;;  %v4238_v23 = vor.u32 %v4775_v18, %v4235_v20  ;;  %v5036_v20 = vld [vmem:[%s6954_s1 + $0x4] ss:$0 sm:$0xff] }
  0xb3   : > { %v4246_v7 = vor.u32 %v4779_v5, %v4245_v4  ;;  %v4242_v24 = vor.u32 %v4777_v22, %v4241_v21 }
  0xb4   : > { %v651_v28 = vmul.f32 %v5692_v25, %v5692_v25  ;;  %v649_v29 = vmul.f32 %v5694_v26, %v5694_v26  ;;  %960 = vmatpush.bf16.msra.mxu2 %v4266_v3 }
  0xb5   : > { %915 = vmatpush.bf16.msra.mxu0 %v4246_v7  ;;  %939 = vmatpush.bf16.msra.mxu1 %v4238_v23 }
  0xb6   : > { %659 = vadd.xlane.f32.xlu2 %v651_v28  ;;  %655 = vadd.xlane.f32.xlu0 %v649_v29  ;;  %v4773_v28 = vld [vmem:[#allocation4 + $0x20] sm:$0xf0]  ;;  %v4772_v29 = vld [vmem:[#allocation4 + $0x1c] sm:$0xf] }
  0xb7   : > { %v4226_v36 = vor.u32 %v4772_v29, %v4223_v32 }
  0xb8   : > { %961 = vmatpush.bf16.msra.mxu2 %v4254_v13 }
  0xb9   : > { %916 = vmatpush.bf16.msra.mxu0 %v4234_v19  ;;  %940 = vmatpush.bf16.msra.mxu1 %v4226_v36 }
  0xbc   : > { %962 = vmatpush.bf16.msra.mxu2 %v4242_v24 }
  0xbd   : > { %941 = vmatpush.bf16.msra.mxu1 %v4214_v47 }
  0xbe   : > { %661 = vadd.xlane.f32.xlu0 %v652_v31  ;;  %v4222_v31 = vor.u32 %v4773_v28, %v4221_v27 }
  0xc0   : > { %917 = vmatpush.bf16.msra.mxu0 %v4222_v31  ;;  %963 = vmatpush.bf16.msra.mxu2 %v4230_v37  ;;  %v5037_v31 = vld [vmem:[%s6954_s1 + $0x5] ss:$0 sm:$0xff] }
  0xc4   : > { %918 = vmatpush.bf16.msra.mxu0 %v4210_v44  ;;  %964 = vmatpush.bf16.msra.mxu2 %v4218_v50 }
 0x121   : > { %v654_v35 = vpop.xlane.xlu2 %653  ;;  %v658_v38 = vpop.xlane.xlu1 %657 }
 0x122   : > { %v663_v39 = vmul.f32 %v654_v35, %v5678_v11  ;;  %v665_v46 = vmul.f32 %v658_v38, %v5678_v11 }
 0x124   : > { %v668_v43 = vadd.f32 1e-05, %v663_v39  ;;  %v670_v51 = vadd.f32 1e-05, %v665_v46 }
 0x126   : > { %5047 = vrsqrt.f32 %v668_v43  ;;  %vm679_vm2 = vweird.f32 %v668_v43  ;;  %vm699_vm9 = vweird.f32 %v670_v51 }
 0x127   : > { %5049 = vrsqrt.f32 %v670_v51 }
 0x129   : > { %v660_v52 = vpop.xlane.xlu2 %659  ;;  %v656_v53 = vpop.xlane.xlu0 %655 }
 0x12a   : > { %v666_v54 = vmul.f32 %v660_v52, %v5678_v11  ;;  %v664_v55 = vmul.f32 %v656_v53, %v5678_v11 }
 0x12c   : > { %v671_v56 = vadd.f32 1e-05, %v666_v54  ;;  %v669_v57 = vadd.f32 1e-05, %v664_v55  ;;  %v5048_v58 = vpop.eup %5047 }
 0x12d   : > { %v674_v59 = vmul.f32 %v5048_v58, %v668_v43  ;;  %v5050_v63 = vpop.eup %5049  ;;  %vm680_vm1 = vweird.f32 %v5048_v58 }
 0x12e   : > { %5051 = vrsqrt.f32 %v671_v56  ;;  %v694_v5 = vmul.f32 %v5050_v63, %v670_v51  ;;  %vm681_vm3 = vmor %vm679_vm2, %vm680_vm1  ;;  %vm689_vm5 = vweird.f32 %v669_v57  ;;  %vm709_vm7 = vweird.f32 %v671_v56 }
 0x12f   : > { %5053 = vrsqrt.f32 %v669_v57  ;;  %v675_v60 = vmul.f32 %v5048_v58, %v674_v59  ;;  %vm700_vm10 = vweird.f32 %v5050_v63  ;;  %vm1161_vm1 = vcmask 1043456  }
 0x130   : > { %v695_v12 = vmul.f32 %v5050_v63, %v694_v5  ;;  %vm701_vm12 = vmor %vm699_vm9, %vm700_vm10  ;;  %vm1063_vm2 = vcmask 326656  }
 0x131   : > { %v662_v61 = vpop.xlane.xlu0 %661  ;;  %v676_v62 = vmul.f32 0.5, %v675_v60 }
 0x132   : > { %v667_v0 = vmul.f32 %v662_v61, %v5678_v11  ;;  %v696_v21 = vmul.f32 0.5, %v695_v12 }
 0x133   : > { %v677_v2 = vsub.f32 1.5, %v676_v62 }
 0x134   : > { %v5052_v1 = vpop.eup %5051  ;;  %v672_v8 = vadd.f32 1e-05, %v667_v0  ;;  %v697_v32 = vsub.f32 1.5, %v696_v21 }
 0x135   : > { %v5054_v3 = vpop.eup %5053  ;;  %v704_v4 = vmul.f32 %v5052_v1, %v671_v56  ;;  %v678_v6 = vmul.f32 %v5048_v58, %v677_v2  ;;  %vm710_vm8 = vweird.f32 %v5052_v1 }
 0x136   : > { %v684_v7 = vmul.f32 %v5054_v3, %v669_v57  ;;  %5055 = vrsqrt.f32 %v672_v8  ;;  %vm690_vm4 = vweird.f32 %v5054_v3  ;;  %vm711_vm11 = vmor %vm709_vm7, %vm710_vm8  ;;  %v698_v37 = vmul.f32 %v5050_v63, %v697_v32 }
 0x137   : > { %v705_v9 = vmul.f32 %v5052_v1, %v704_v4  ;;  %v682_v13 = vsel %vm681_vm3, %v5048_v58, %v678_v6  ;;  %vm691_vm6 = vmor %vm689_vm5, %vm690_vm4  ;;  %vm719_vm13 = vweird.f32 %v672_v8  ;;  %vm1760_vm3 = vcmask 523264  }
 0x138   : > { %v685_v10 = vmul.f32 %v5054_v3, %v684_v7  ;;  %v723_v19 = vmul.f32 %v682_v13, %v5684_v17  ;;  %v702_v40 = vsel %vm701_vm12, %v5050_v63, %v698_v37  ;;  %vm1766_vm4 = vcmask 785408  }
 0x139   : > { %v706_v15 = vmul.f32 0.5, %v705_v9  ;;  %v725_v43 = vmul.f32 %v702_v40, %v5682_v16  ;;  %v775_v16 = vld [vmem:[%s6957_s4] sm:$0x7] }
 0x13a   : > { %v686_v14 = vmul.f32 0.5, %v685_v10  ;;  %v729_v29 = vmul.f32 %v5036_v20, %v723_v19  ;;  %v778_v57 = vperm.slane %v775_v16, 1  ;;  %v777_v6 = vperm.slane %v775_v16, 0 }
 0x13b   : > { %v707_v23 = vsub.f32 1.5, %v706_v15  ;;  %v731_v46 = vmul.f32 %v5036_v20, %v725_v43  ;;  %v779_v43 = vperm.slane %v775_v16, 2 }
 0x13c   : > { %v687_v18 = vsub.f32 1.5, %v686_v14  ;;  %v5056_v27 = vpop.eup %5055  ;;  %v735_v35 = vadd.f32 %v5037_v31, %v729_v29 }
 0x13d   : > { %v708_v33 = vmul.f32 %v5052_v1, %v707_v23  ;;  %v714_v34 = vmul.f32 %v5056_v27, %v672_v8  ;;  %vm720_vm14 = vweird.f32 %v5056_v27  ;;  %v737_v49 = vadd.f32 %v5037_v31, %v731_v46 }
 0x13e   : > { %v688_v22 = vmul.f32 %v5054_v3, %v687_v18  ;;  %vm721_vm15 = vmor %vm719_vm13, %vm720_vm14 }
 0x13f   : > { %v715_v39 = vmul.f32 %v5056_v27, %v714_v34 }
 0x140   : > { %v692_v24 = vsel %vm691_vm6, %v5054_v3, %v688_v22 }
 0x141   : > { %v724_v28 = vmul.f32 %v692_v24, %v5694_v26  ;;  %v712_v26 = vsel %vm711_vm11, %v5052_v1, %v708_v33  ;;  %v716_v42 = vmul.f32 0.5, %v715_v39 }
 0x142   : > { %v726_v41 = vmul.f32 %v712_v26, %v5692_v25 }
 0x143   : > { %v730_v17 = vmul.f32 %v5036_v20, %v724_v28  ;;  %v717_v45 = vsub.f32 1.5, %v716_v42 }
 0x144   : > { %v732_v44 = vmul.f32 %v5036_v20, %v726_v41 }
 0x145   : > { %v736_v36 = vadd.f32 %v5037_v31, %v730_v17  ;;  %v718_v48 = vmul.f32 %v5056_v27, %v717_v45 }
 0x146   : > { %v738_v47 = vadd.f32 %v5037_v31, %v732_v44 }
 0x147   : > { %v740_v38 = vpack.c.bf16 %v736_v36, %v735_v35  ;;  %v722_v51 = vsel %vm721_vm15, %v5056_v27, %v718_v48 }
 0x148   : > { %v741_v50 = vpack.c.bf16 %v738_v47, %v737_v49  ;;  %v727_v52 = vmul.f32 %v722_v51, %v5701_v30 }
 0x149   : > { %919 = vmatmul.bf16.vlgmr.msra.gmra.mxu0 %v740_v38  ;;  %942 = vmatmul.bf16.vlgmr.msra.gmra.mxu1 %v740_v38 }
 0x14a   : > { %965 = vmatmul.bf16.vlgmr.msra.gmra.mxu2 %v740_v38  ;;  %v733_v25 = vmul.f32 %v5036_v20, %v727_v52 }
 0x14c   : > { %v739_v53 = vadd.f32 %v5037_v31, %v733_v25 }
 0x14e   : > { %v742_v54 = vpack.c.bf16 %v739_v53, %v739_v53 }
 0x159   : > { %924 = vmatmul.bf16.gmra.mxu0 %v741_v50  ;;  %947 = vmatmul.bf16.gmra.mxu1 %v741_v50 }
 0x15a   : > { %970 = vmatmul.bf16.gmra.mxu2 %v741_v50 }
 0x169   : > { %929 = vmatmul.bf16.gmra.mxu0 %v742_v54  ;;  %952 = vmatmul.bf16.gmra.mxu1 %v742_v54 }
 0x16a   : > { %975 = vmatmul.bf16.gmra.mxu2 %v742_v54 }
 0x1c6   : > { %v920_v55 = vpop.f32.mrf.mxu0  ;;  %v943_v56 = vpop.f32.mrf.mxu1 }
 0x1c7   : > { %v944_v58 = vadd.f32 %v943_v56, %v778_v57  ;;  %v921_v22 = vadd.f32 %v920_v55, %v777_v6 }
 0x1c9   : > { %v985_v62 = vpack.c.bf16 %v944_v58, %v944_v58  ;;  %v980_v35 = vpack.c.bf16 %v921_v22, %v921_v22 }
 0x1cb   : > { %v1013_v0 = vunpack.c.l.b16 %v985_v62  ;;  %v1000_v26 = vunpack.c.l.b16 %v980_v35 }
 0x1cd   : > { %v5724_v59 = vpop.f32.mrf.mxu2 }
 0x1ce   : > { %v922_v60 = vpop.f32.mrf.mxu0  ;;  %v945_v61 = vpop.f32.mrf.mxu1  ;;  %v967_v58 = vadd.f32 %v5724_v59, %v779_v43 }
 0x1cf   : > { %v946_v30 = vadd.f32 %v945_v61, %v778_v57  ;;  %v923_v19 = vadd.f32 %v922_v60, %v777_v6 }
 0x1d1   : > { %v986_v63 = vpack.c.bf16 %v946_v30, %v946_v30  ;;  %v981_v29 = vpack.c.bf16 %v923_v19, %v923_v19 }
 0x1d3   : > { %v1014_v1 = vunpack.c.l.b16 %v986_v63  ;;  %v1001_v37 = vunpack.c.l.b16 %v981_v29 }
 0x1d5   : > { %v5726_v2 = vpack.c.b16 %v1014_v1, %v1013_v0  ;;  %v5728_v3 = vpop.f32.mrf.mxu2  ;;  %v1005_v40 = vpack.c.b16 %v1001_v37, %v1000_v26  ;;  %v990_v0 = vpack.c.bf16 %v967_v58, %v967_v58 }
 0x1d6   : > { %v925_v4 = vpop.f32.mrf.mxu0  ;;  %v948_v5 = vpop.f32.mrf.mxu1  ;;  %v969_v55 = vadd.f32 %v5728_v3, %v779_v43 }
 0x1d7   : > { %1194 = vrot.lane.b32.xlu0 %v5726_v2, %s5504_s17  ;;  %v926_v7 = vadd.f32 %v925_v4, %v777_v6  ;;  %v949_v8 = vadd.f32 %v948_v5, %v778_v57  ;;  %v1032_v63 = vsel %vm1021_vm0, %v5726_v2, 0  ;;  %v1142_v5 = vunpack.c.l.b16 %v990_v0 }
 0x1d8   : > { %v991_v62 = vpack.c.bf16 %v969_v55, %v969_v55 }
 0x1d9   : > { %v982_v13 = vpack.c.bf16 %v926_v7, %v926_v7  ;;  %v987_v14 = vpack.c.bf16 %v949_v8, %v949_v8 }
 0x1da   : > { %v1143_v3 = vunpack.c.l.b16 %v991_v62 }
 0x1db   : > { %v1002_v23 = vunpack.c.l.b16 %v982_v13  ;;  %v1015_v24 = vunpack.c.l.b16 %v987_v14 }
 0x1dd   : > { %v971_v9 = vpop.f32.mrf.mxu2 }
 0x1de   : > { %v927_v10 = vpop.f32.mrf.mxu0  ;;  %v950_v12 = vpop.f32.mrf.mxu1  ;;  %v972_v54 = vadd.f32 %v971_v9, %v779_v43 }
 0x1df   : > { %v928_v15 = vadd.f32 %v927_v10, %v777_v6  ;;  %v951_v18 = vadd.f32 %v950_v12, %v778_v57 }
 0x1e0   : > { %v992_v60 = vpack.c.bf16 %v972_v54, %v972_v54 }
 0x1e1   : > { %v983_v20 = vpack.c.bf16 %v928_v15, %v928_v15  ;;  %v988_v21 = vpack.c.bf16 %v951_v18, %v951_v18 }
 0x1e2   : > { %v1144_v1 = vunpack.c.l.b16 %v992_v60  ;;  %v5831_v60 = vld [vmem:[#allocation2 + $0x20] sm:$0xff] }
 0x1e3   : > { %v1003_v27 = vunpack.c.l.b16 %v983_v20  ;;  %v1016_v28 = vunpack.c.l.b16 %v988_v21 }
 0x1e5   : > { %v5732_v31 = vpack.c.b16 %v1003_v27, %v1002_v23  ;;  %v5734_v32 = vpack.c.b16 %v1016_v28, %v1015_v24  ;;  %v973_v17 = vpop.f32.mrf.mxu2 }
 0x1e6   : > { %v930_v33 = vpop.f32.mrf.mxu0  ;;  %v953_v34 = vpop.f32.mrf.mxu1  ;;  %v974_v52 = vadd.f32 %v973_v17, %v779_v43 }
 0x1e7   : > { %v954_v36 = vadd.f32 %v953_v34, %v778_v57  ;;  %1196 = vrot.lane.b32.xlu2 %v5734_v32, %s5504_s17  ;;  %1190 = vrot.lane.b32.xlu0 %v5732_v31, %s5504_s17  ;;  %v931_v48 = vadd.f32 %v930_v33, %v777_v6  ;;  %v1035_v25 = vsel %vm1021_vm0, %v5734_v32, 0  ;;  %v5766_v6 = vpack.c.b16 %v1143_v3, %v1142_v5 }
 0x1e8   : > { %v993_v56 = vpack.c.bf16 %v974_v52, %v974_v52 }
 0x1e9   : > { %v989_v38 = vpack.c.bf16 %v954_v36, %v954_v36  ;;  %v984_v50 = vpack.c.bf16 %v931_v48, %v931_v48 }
 0x1ea   : > { %v1145_v30 = vunpack.c.l.b16 %v993_v56 }
 0x1eb   : > { %v1017_v39 = vunpack.c.l.b16 %v989_v38  ;;  %v1004_v16 = vunpack.c.l.b16 %v984_v50 }
 0x1ec   : > { %v5763_v4 = vpack.c.b16 %v1145_v30, %v1144_v1 }
 0x1ed   : > { %v1020_v41 = vpack.c.b16 %v1017_v39, %v1017_v39  ;;  %v976_v42 = vpop.f32.mrf.mxu2  ;;  %v1007_v61 = vpack.c.b16 %v1004_v16, %v1004_v16  ;;  %v5804_v39 = vld [vmem:[#allocation2] sm:$0xff]  ;;  %v5823_v16 = vld [vmem:[#allocation2 + $0x18] sm:$0xff] }
 0x1ee   : > { %v932_v44 = vpop.f32.mrf.mxu0  ;;  %v955_v45 = vpop.f32.mrf.mxu1  ;;  %v977_v47 = vadd.f32 %v976_v42, %v779_v43 }
 0x1ef   : > { %1363 = vrot.lane.b32.xlu0 %v5726_v2, %s5505_s7  ;;  %1188 = vrot.lane.b32.xlu2 %v1005_v40, %s5504_s17  ;;  %v1038_v46 = vsel %vm1021_vm0, %v1020_v41, 0  ;;  %v5809_v44 = vld [vmem:[#allocation2 + $0x8] sm:$0xff] }
 0x1f0   : > { %1198 = vrot.lane.b32.xlu1 %v1020_v41, %s5504_s17  ;;  %1045 = vmatpush.bf16.xpose.msra.mxu3 %v1038_v46  ;;  %v994_v49 = vpack.c.bf16 %v977_v47, %v977_v47 }
 0x1f2   : > { %v1146_v53 = vunpack.c.l.b16 %v994_v49  ;;  %v5814_v49 = vld [vmem:[#allocation2 + $0x10] sm:$0xff] }
 0x1f4   : > { %v5752_v57 = vpack.c.b16 %v1146_v53, %v1146_v53 }
 0x1f5   : > { %v978_v51 = vpop.f32.mrf.mxu2 }
 0x1f6   : > { %v1163_v59 = vsel %vm1161_vm1, %v5752_v57, 0 }
 0x1f7   : > { %1357 = vrot.lane.b32.xlu0 %v1005_v40, %s5505_s7  ;;  %1365 = vrot.lane.b32.xlu2 %v5734_v32, %s5505_s7 }
 0x1f8   : > { %1367 = vrot.lane.b32.xlu1 %v1020_v41, %s5505_s7  ;;  %1046 = vmatpush.bf16.xpose.msra.mxu3 %v1035_v25 }
 0x1ff   : > { %1359 = vrot.lane.b32.xlu0 %v5732_v31, %s5505_s7  ;;  %1192 = vrot.lane.b32.xlu2 %v1007_v61, %s5504_s17 }
 0x200   : > { %1536 = vrot.lane.b32.xlu1 %v1020_v41, %s5506_s15  ;;  %1047 = vmatpush.bf16.xpose.msra.mxu3 %v1032_v63 }
 0x207   : > { %4303 = vmatmul.msk.bf16.vlgmr.msra.gmra.mxu3 %vm1021_vm0, %v1005_v40  ;;  %1530 = vrot.lane.b32.xlu0 %v1007_v61, %s5506_s15 }
 0x208   : > { %1170 = vmatpush.bf16.msrb.mxu3 %v1163_v59  ;;  %1534 = vrot.lane.b32.xlu1 %v5734_v32, %s5506_s15 }
 0x209   : > { %1532 = vrot.lane.b32.xlu2 %v5726_v2, %s5506_s15 }
 0x20c   : > { %1171 = vmatpush.bf16.msrb.mxu3 %v5763_v4 }
 0x20f   : > { %1318 = vrot.lane.b32.xlu0 %v5752_v57, %s5504_s17 }
 0x210   : > { %1172 = vmatpush.bf16.msrb.mxu3 %v5766_v6  ;;  %1526 = vrot.lane.b32.xlu1 %v1005_v40, %s5506_s15 }
 0x211   : > { %1528 = vrot.lane.b32.xlu2 %v5732_v31, %s5506_s15 }
 0x217   : > { %4304 = vmatmul.msk.bf16.gmra.mxu3 %vm1021_vm0, %v5732_v31 }
 0x218   : > { %1361 = vrot.lane.b32.xlu1 %v1007_v61, %s5505_s7 }
 0x219   : > { %1316 = vrot.lane.b32.xlu2 %v5763_v4, %s5504_s17 }
 0x220   : > { %1314 = vrot.lane.b32.xlu1 %v5766_v6, %s5504_s17 }
 0x221   : > { %1485 = vrot.lane.b32.xlu2 %v5763_v4, %s5505_s7 }
 0x227   : > { %4305 = vmatmul.msk.bf16.gmra.mxu3 %vm1021_vm0, %v1007_v61 }
 0x228   : > { %1487 = vrot.lane.b32.xlu1 %v5752_v57, %s5505_s7 }
 0x241   : > { %v1197_v2 = vpop.permute.xlu2 %1196 }
 0x242   : > { %v1213_v20 = vsel %vm1021_vm0, %v1197_v2, 0 }
 0x249   : > { %v1195_v7 = vpop.permute.xlu0 %1194  ;;  %v1189_v8 = vpop.permute.xlu2 %1188 }
 0x24a   : > { %v1210_v28 = vsel %vm1021_vm0, %v1195_v7, 0 }
 0x251   : > { %v1366_v10 = vpop.permute.xlu2 %1365 }
 0x252   : > { %v1382_v29 = vsel %vm1021_vm0, %v1366_v10, 0 }
 0x259   : > { %v1191_v9 = vpop.permute.xlu0 %1190  ;;  %v1193_v15 = vpop.permute.xlu2 %1192 }
 0x261   : > { %v1364_v12 = vpop.permute.xlu0 %1363 }
 0x262   : > { %v1199_v13 = vpop.permute.xlu1 %1198  ;;  %v1379_v17 = vsel %vm1021_vm0, %v1364_v12, 0 }
 0x263   : > { %v1216_v14 = vsel %vm1021_vm0, %v1199_v13, 0  ;;  %v1533_v23 = vpop.permute.xlu2 %1532 }
 0x264   : > { %1223 = vmatpush.bf16.xpose.msrb.mxu0 %v1216_v14  ;;  %v1548_v38 = vsel %vm1021_vm0, %v1533_v23, 0 }
 0x269   : > { %v1358_v18 = vpop.permute.xlu0 %1357 }
 0x26a   : > { %v1368_v19 = vpop.permute.xlu1 %1367 }
 0x26b   : > { %v1385_v21 = vsel %vm1021_vm0, %v1368_v19, 0  ;;  %v1529_v34 = vpop.permute.xlu2 %1528 }
 0x26c   : > { %1224 = vmatpush.bf16.xpose.msrb.mxu0 %v1213_v20  ;;  %1392 = vmatpush.bf16.xpose.msrb.mxu2 %v1385_v21 }
 0x271   : > { %v1360_v22 = vpop.permute.xlu0 %1359 }
 0x272   : > { %v1537_v24 = vpop.permute.xlu1 %1536 }
 0x273   : > { %v1554_v27 = vsel %vm1021_vm0, %v1537_v24, 0  ;;  %v1317_v26 = vpop.permute.xlu2 %1316 }
 0x274   : > { %1225 = vmatpush.bf16.xpose.msrb.mxu0 %v1210_v28  ;;  %1393 = vmatpush.bf16.xpose.msrb.mxu2 %v1382_v29 }
 0x279   : > { %v1531_v31 = vpop.permute.xlu0 %1530 }
 0x27a   : > { %v1535_v32 = vpop.permute.xlu1 %1534 }
 0x27b   : > { %4309 = vmatmul.msk.bf16.vlgmr.msrb.gmra.mxu0 %vm1021_vm0, %v1189_v8  ;;  %v1551_v33 = vsel %vm1021_vm0, %v1535_v32, 0  ;;  %v1486_v54 = vpop.permute.xlu2 %1485 }
 0x27c   : > { %1561 = vmatpush.bf16.xpose.msra.mxu0 %v1554_v27  ;;  %1394 = vmatpush.bf16.xpose.msrb.mxu2 %v1379_v17 }
 0x281   : > { %v1319_v35 = vpop.permute.xlu0 %1318 }
 0x282   : > { %v1527_v36 = vpop.permute.xlu1 %1526  ;;  %v1332_v37 = vsel %vm1161_vm1, %v1319_v35, 0 }
 0x283   : > { %4315 = vmatmul.msk.bf16.vlgmr.msrb.gmra.mxu2 %vm1021_vm0, %v1358_v18  ;;  %1339 = vmatpush.bf16.msrb.mxu1 %v1332_v37 }
 0x284   : > { %1562 = vmatpush.bf16.xpose.msra.mxu0 %v1551_v33 }
 0x287   : > { %1340 = vmatpush.bf16.msrb.mxu1 %v1317_v26 }
 0x28a   : > { %v1362_v40 = vpop.permute.xlu1 %1361  ;;  %v1049_v41 = vpop.f32.mrf.mxu3 }
 0x28b   : > { %v1050_v42 = vadd.f32 %v1049_v41, %v5804_v39  ;;  %4310 = vmatmul.msk.bf16.gmra.mxu0 %vm1021_vm0, %v1191_v9 }
 0x28c   : > { %1563 = vmatpush.bf16.xpose.msra.mxu0 %v1548_v38 }
 0x28d   : > { %v1064_v43 = vsel %vm1063_vm2, %v1050_v42, -inf }
 0x28e   : > { %1065 = vmax.xlane.f32.xlu2 %v1064_v43 }
 0x292   : > { %v1315_v45 = vpop.permute.xlu1 %1314  ;;  %v1051_v46 = vpop.f32.mrf.mxu3 }
 0x293   : > { %v1052_v47 = vadd.f32 %v1051_v46, %v5809_v44  ;;  %1341 = vmatpush.bf16.msrb.mxu1 %v1315_v45  ;;  %4316 = vmatmul.msk.bf16.gmra.mxu2 %vm1021_vm0, %v1360_v22 }
 0x295   : > { %v1067_v48 = vsel %vm1063_vm2, %v1052_v47, -inf }
 0x296   : > { %1068 = vmax.xlane.f32.xlu1 %v1067_v48 }
 0x29a   : > { %v1488_v50 = vpop.permute.xlu1 %1487  ;;  %v1054_v51 = vpop.f32.mrf.mxu3 }
 0x29b   : > { %v1501_v52 = vsel %vm1161_vm1, %v1488_v50, 0  ;;  %v5818_v25 = vadd.f32 %v1054_v51, %v5814_v49  ;;  %4311 = vmatmul.msk.bf16.gmra.mxu0 %vm1021_vm0, %v1193_v15 }
 0x29c   : > { %1508 = vmatpush.bf16.msra.mxu3 %v1501_v52 }
 0x29d   : > { %v1070_v53 = vsel %vm1063_vm2, %v5818_v25, -inf }
 0x29e   : > { %1071 = vmax.xlane.f32.xlu1 %v1070_v53 }
 0x2a0   : > { %1509 = vmatpush.bf16.msra.mxu3 %v1486_v54 }
 0x2a2   : > { %v1056_v55 = vpop.f32.mrf.mxu3 }
 0x2a3   : > { %v5826_v56 = vadd.f32 %v1056_v55, %v5823_v16  ;;  %4317 = vmatmul.msk.bf16.gmra.mxu2 %vm1021_vm0, %v1362_v40 }
 0x2a5   : > { %v1073_v58 = vsel %vm1063_vm2, %v5826_v56, -inf }
 0x2a6   : > { %1074 = vmax.xlane.f32.xlu0 %v1073_v58 }
 0x2aa   : > { %v1059_v61 = vpop.f32.mrf.mxu3 }
 0x2ab   : > { %v5834_v62 = vadd.f32 %v1059_v61, %v5831_v60  ;;  %4321 = vmatmul.msk.bf16.vlgmr.msra.gmra.mxu0 %vm1021_vm0, %v1527_v36 }
 0x2ad   : > { %v1076_v30 = vsel %vm1063_vm2, %v5834_v62, -inf }
 0x2ae   : > { %1077 = vmax.xlane.f32.xlu0 %v1076_v30 }
 0x2b2   : > { %v1061_v63 = vpop.f32.mrf.mxu3 }
 0x2bb   : > { %4322 = vmatmul.msk.bf16.gmra.mxu0 %vm1021_vm0, %v1529_v34 }
 0x2cb   : > { %4323 = vmatmul.msk.bf16.gmra.mxu0 %vm1021_vm0, %v1531_v31 }
 0x2f8   : > { %v1227_v59 = vpop.f32.mrf.mxu0 }
 0x2f9   : > { %v5842_v0 = vadd.f32 %v1227_v59, %v5804_v39 }
 0x2fb   : > { %v1241_v1 = vsel %vm1063_vm2, %v5842_v0, -inf }
 0x2fc   : > { %1242 = vmax.xlane.f32.xlu0 %v1241_v1 }
 0x300   : > { %v1229_v3 = vpop.f32.mrf.mxu0 }
 0x301   : > { %v5847_v5 = vadd.f32 %v1229_v3, %v5809_v44  ;;  %v1066_v2 = vpop.xlane.xlu2 %1065 }
 0x302   : > { %v1079_v7 = vsub.f32 %v1050_v42, %v1066_v2 }
 0x303   : > { %v1244_v8 = vsel %vm1063_vm2, %v5847_v5, -inf }
 0x304   : > { %1245 = vmax.xlane.f32.xlu2 %v1244_v8  ;;  %v1084_v9 = vmul.f32 1.442695, %v1079_v7 }
 0x306   : > { %v1396_v10 = vpop.f32.mrf.mxu2  ;;  %5057 = vpow2.f32 %v1084_v9 }
 0x307   : > { %v5852_v12 = vadd.f32 %v1396_v10, %v5804_v39 }
 0x308   : > { %v1232_v13 = vpop.f32.mrf.mxu0 }
 0x309   : > { %v5855_v14 = vadd.f32 %v1232_v13, %v5814_v49  ;;  %v1069_v15 = vpop.xlane.xlu1 %1068  ;;  %v1410_v18 = vsel %vm1063_vm2, %v5852_v12, -inf }
 0x30a   : > { %v1080_v19 = vsub.f32 %v1052_v47, %v1069_v15  ;;  %1411 = vmax.xlane.f32.xlu1 %v1410_v18 }
 0x30b   : > { %v1247_v20 = vsel %vm1063_vm2, %v5855_v14, -inf }
 0x30c   : > { %1248 = vmax.xlane.f32.xlu2 %v1247_v20  ;;  %v1086_v21 = vmul.f32 1.442695, %v1080_v19  ;;  %v5864_v24 = vpop.eup %5057 }
 0x30d   : > { %v1094_v31 = vsel %vm1063_vm2, %v5864_v24, 0.0 }
 0x30e   : > { %v1398_v22 = vpop.f32.mrf.mxu2  ;;  %5059 = vpow2.f32 %v1086_v21 }
 0x30f   : > { %v5862_v23 = vadd.f32 %v1398_v22, %v5809_v44 }
 0x310   : > { %v1234_v27 = vpop.f32.mrf.mxu0 }
 0x311   : > { %v5867_v28 = vadd.f32 %v1234_v27, %v5823_v16  ;;  %v1413_v29 = vsel %vm1063_vm2, %v5862_v23, -inf  ;;  %v1072_v33 = vpop.xlane.xlu1 %1071 }
 0x312   : > { %1414 = vmax.xlane.f32.xlu0 %v1413_v29  ;;  %v1081_v38 = vsub.f32 %v5818_v25, %v1072_v33 }
 0x313   : > { %v1250_v32 = vsel %vm1063_vm2, %v5867_v28, -inf }
 0x314   : > { %1095 = vadd.xlane.f32.xlu2 %v1094_v31  ;;  %1251 = vmax.xlane.f32.xlu1 %v1250_v32  ;;  %v5878_v35 = vpop.eup %5059  ;;  %v1088_v42 = vmul.f32 1.442695, %v1081_v38 }
 0x315   : > { %v1097_v40 = vsel %vm1063_vm2, %v5878_v35, 0.0 }
 0x316   : > { %v1401_v17 = vpop.f32.mrf.mxu2  ;;  %5061 = vpow2.f32 %v1088_v42 }
 0x317   : > { %v5876_v34 = vadd.f32 %v1401_v17, %v5814_v49 }
 0x318   : > { %v1237_v36 = vpop.f32.mrf.mxu0 }
 0x319   : > { %v1075_v37 = vpop.xlane.xlu0 %1074  ;;  %v1416_v41 = vsel %vm1063_vm2, %v5876_v34, -inf  ;;  %v5887_v45 = vadd.f32 %v1237_v36, %v5831_v60 }
 0x31a   : > { %v1082_v26 = vsub.f32 %v5826_v56, %v1075_v37 }
 0x31b   : > { %v1253_v25 = vsel %vm1063_vm2, %v5887_v45, -inf }
 0x31c   : > { %1098 = vadd.xlane.f32.xlu1 %v1097_v40  ;;  %1417 = vmax.xlane.f32.xlu2 %v1416_v41  ;;  %v1090_v46 = vmul.f32 1.442695, %v1082_v26  ;;  %v5897_v55 = vpop.eup %5061 }
 0x31d   : > { %v1100_v30 = vsel %vm1063_vm2, %v5897_v55, 0.0 }
 0x31e   : > { %v1403_v43 = vpop.f32.mrf.mxu2  ;;  %5063 = vpow2.f32 %v1090_v46 }
 0x31f   : > { %v5890_v47 = vadd.f32 %v1403_v43, %v5823_v16 }
 0x320   : > { %v1239_v48 = vpop.f32.mrf.mxu0 }
 0x321   : > { %v1078_v50 = vpop.xlane.xlu0 %1077  ;;  %v1419_v52 = vsel %vm1063_vm2, %v5890_v47, -inf }
 0x322   : > { %v1083_v51 = vsub.f32 %v5834_v62, %v1078_v50 }
 0x324   : > { %1420 = vmax.xlane.f32.xlu1 %v1419_v52  ;;  %1254 = vmax.xlane.f32.xlu2 %v1253_v25  ;;  %v1092_v53 = vmul.f32 1.442695, %v1083_v51  ;;  %v5899_v58 = vpop.eup %5063 }
 0x325   : > { %v1103_v63 = vsel %vm1063_vm2, %v5899_v58, 0.0 }
 0x326   : > { %v1406_v54 = vpop.f32.mrf.mxu2  ;;  %5065 = vpow2.f32 %v1092_v53 }
 0x327   : > { %v5911_v1 = vadd.f32 %v1406_v54, %v5831_v60 }
 0x328   : > { %v1565_v56 = vpop.f32.mrf.mxu0 }
 0x329   : > { %v5902_v61 = vadd.f32 %v1565_v56, %v5804_v39  ;;  %v1422_v2 = vsel %vm1063_vm2, %v5911_v1, -inf }
 0x32b   : > { %v1579_v62 = vsel %vm1063_vm2, %v5902_v61, -inf }
 0x32c   : > { %1580 = vmax.xlane.f32.xlu0 %v1579_v62  ;;  %1101 = vadd.xlane.f32.xlu2 %v1100_v30  ;;  %v5913_v3 = vpop.eup %5065 }
 0x32d   : > { %1104 = vadd.xlane.f32.xlu1 %v1103_v63  ;;  %v1106_v7 = vsel %vm1063_vm2, %v5913_v3, 0.0 }
 0x32e   : > { %v1408_v59 = vpop.f32.mrf.mxu2 }
 0x330   : > { %v1567_v39 = vpop.f32.mrf.mxu0 }
 0x331   : > { %v5920_v8 = vadd.f32 %v1567_v39, %v5809_v44 }
 0x333   : > { %v1582_v13 = vsel %vm1063_vm2, %v5920_v8, -inf }
 0x334   : > { %1423 = vmax.xlane.f32.xlu2 %v1422_v2  ;;  %1107 = vadd.xlane.f32.xlu0 %v1106_v7 }
 0x338   : > { %v1570_v9 = vpop.f32.mrf.mxu0 }
 0x339   : > { %v5923_v10 = vadd.f32 %v1570_v9, %v5814_v49 }
 0x33b   : > { %v1585_v15 = vsel %vm1063_vm2, %v5923_v10, -inf }
 0x33c   : > { %1583 = vmax.xlane.f32.xlu2 %v1582_v13  ;;  %1586 = vmax.xlane.f32.xlu1 %v1585_v15 }
 0x340   : > { %v1572_v18 = vpop.f32.mrf.mxu0 }
 0x341   : > { %v5930_v19 = vadd.f32 %v1572_v18, %v5823_v16 }
 0x343   : > { %v1588_v44 = vsel %vm1063_vm2, %v5930_v19, -inf }
 0x344   : > { %1589 = vmax.xlane.f32.xlu0 %v1588_v44 }
 0x348   : > { %v1575_v20 = vpop.f32.mrf.mxu0 }
 0x349   : > { %v5935_v49 = vadd.f32 %v1575_v20, %v5831_v60 }
 0x34b   : > { %v1591_v21 = vsel %vm1063_vm2, %v5935_v49, -inf }
 0x34c   : > { %1592 = vmax.xlane.f32.xlu0 %v1591_v21 }
 0x350   : > { %v1577_v22 = vpop.f32.mrf.mxu0 }
 0x36f   : > { %v1243_v27 = vpop.xlane.xlu0 %1242 }
 0x370   : > { %v1256_v29 = vsub.f32 %v5842_v0, %v1243_v27 }
 0x372   : > { %v1261_v31 = vmul.f32 1.442695, %v1256_v29 }
 0x374   : > { %5067 = vpow2.f32 %v1261_v31 }
 0x377   : > { %v1246_v16 = vpop.xlane.xlu2 %1245 }
 0x378   : > { %v1257_v36 = vsub.f32 %v5847_v5, %v1246_v16 }
 0x37a   : > { %v5940_v32 = vpop.eup %5067  ;;  %v1263_v26 = vmul.f32 1.442695, %v1257_v36 }
 0x37b   : > { %v1271_v17 = vsel %vm1063_vm2, %v5940_v32, 0.0 }
 0x37c   : > { %1272 = vadd.xlane.f32.xlu1 %v1271_v17 }
 0x37d   : > { %v1412_v33 = vpop.xlane.xlu1 %1411 }
 0x37e   : > { %v1425_v60 = vsub.f32 %v5852_v12, %v1412_v33 }
 0x37f   : > { %v1249_v37 = vpop.xlane.xlu2 %1248 }
 0x380   : > { %v1430_v38 = vmul.f32 1.442695, %v1425_v60  ;;  %v1258_v41 = vsub.f32 %v5855_v14, %v1249_v37 }
 0x382   : > { %5069 = vpow2.f32 %v1430_v38  ;;  %v1265_v51 = vmul.f32 1.442695, %v1258_v41 }
 0x383   : > { %5071 = vpow2.f32 %v1263_v26 }
 0x385   : > { %v1415_v40 = vpop.xlane.xlu0 %1414 }
 0x386   : > { %v1426_v0 = vsub.f32 %v5862_v23, %v1415_v40 }
 0x387   : > { %v1096_v42 = vpop.xlane.xlu2 %1095  ;;  %v1252_v43 = vpop.xlane.xlu1 %1251 }
 0x388   : > { %v5948_v46 = vpop.eup %5069  ;;  %v1432_v48 = vmul.f32 1.442695, %v1426_v0  ;;  %5073 = vrcp.f32 %v1096_v42  ;;  %v1259_v12 = vsub.f32 %v5867_v28, %v1252_v43 }
 0x389   : > { %v1440_v5 = vsel %vm1063_vm2, %v5948_v46, 0.0  ;;  %v5953_v23 = vpop.eup %5071 }
 0x38a   : > { %5075 = vpow2.f32 %v1432_v48  ;;  %v1267_v50 = vmul.f32 1.442695, %v1259_v12  ;;  %1441 = vadd.xlane.f32.xlu0 %v1440_v5  ;;  %v1274_v28 = vsel %vm1063_vm2, %v5953_v23, 0.0 }
 0x38c   : > { %5077 = vpow2.f32 %v1267_v50 }
 0x38d   : > { %5079 = vpow2.f32 %v1265_v51 }
 0x38e   : > { %v5074_v52 = vpop.eup %5073 }
 0x38f   : > { %v1099_v14 = vpop.xlane.xlu1 %1098  ;;  %v5955_v25 = vpop.xlane.xlu2 %1417  ;;  %v1114_v54 = vmul.f32 %v5074_v52, %v1096_v42 }
 0x390   : > { %v5957_v53 = vpop.eup %5075  ;;  %5081 = vrcp.f32 %v1099_v14 }
 0x391   : > { %v1443_v56 = vsel %vm1063_vm2, %v5957_v53, 0.0  ;;  %v1119_v59 = vsub.f32 2.0, %v1114_v54 }
 0x392   : > { %v5963_v62 = vpop.eup %5077  ;;  %1275 = vadd.xlane.f32.xlu0 %v1274_v28  ;;  %1444 = vadd.xlane.f32.xlu2 %v1443_v56 }
 0x393   : > { %v1280_v30 = vsel %vm1063_vm2, %v5963_v62, 0.0  ;;  %v5967_v63 = vpop.eup %5079  ;;  %v1124_v15 = vmul.f32 %v5074_v52, %v1119_v59 }
 0x394   : > { %1281 = vadd.xlane.f32.xlu1 %v1280_v30  ;;  %v1277_v44 = vsel %vm1063_vm2, %v5967_v63, 0.0 }
 0x395   : > { %v1129_v22 = vmul.f32 %v5864_v24, %v1124_v15 }
 0x396   : > { %v5082_v39 = vpop.eup %5081 }
 0x397   : > { %v1115_v2 = vmul.f32 %v5082_v39, %v1099_v14  ;;  %v5969_v7 = vpop.xlane.xlu1 %1420  ;;  %v1255_v9 = vpop.xlane.xlu2 %1254 }
 0x398   : > { %v1260_v13 = vsub.f32 %v5887_v45, %v1255_v9 }
 0x399   : > { %v1120_v18 = vsub.f32 2.0, %v1115_v2 }
 0x39a   : > { %v1269_v20 = vmul.f32 1.442695, %v1260_v13  ;;  %1278 = vadd.xlane.f32.xlu2 %v1277_v44 }
 0x39b   : > { %v1125_v21 = vmul.f32 %v5082_v39, %v1120_v18 }
 0x39c   : > { %5083 = vpow2.f32 %v1269_v20 }
 0x39d   : > { %v1130_v27 = vmul.f32 %v5878_v35, %v1125_v21 }
 0x39f   : > { %v1102_v29 = vpop.xlane.xlu2 %1101  ;;  %v1581_v31 = vpop.xlane.xlu0 %1580  ;;  %v1134_v16 = vpack.c.bf16 %v1130_v27, %v1129_v22  ;;  %v1428_v22 = vsub.f32 %v5890_v47, %v5969_v7 }
 0x3a0   : > { %5085 = vrcp.f32 %v1102_v29  ;;  %v1105_v17 = vpop.xlane.xlu1 %1104  ;;  %v1594_v45 = vsub.f32 %v5902_v61, %v1581_v31 }
 0x3a1   : > { %5087 = vrcp.f32 %v1105_v17  ;;  %4306 = vmatmul.msk.bf16.vlgmr.msrb.gmra.mxu3 %vm1063_vm2, %v1134_v16  ;;  %v1436_v27 = vmul.f32 1.442695, %v1428_v22 }
 0x3a2   : > { %v1599_v33 = vmul.f32 1.442695, %v1594_v45  ;;  %v5978_v60 = vpop.eup %5083 }
 0x3a3   : > { %v1283_v24 = vsel %vm1063_vm2, %v5978_v60, 0.0 }
 0x3a4   : > { %5089 = vpow2.f32 %v1599_v33  ;;  %1284 = vadd.xlane.f32.xlu0 %v1283_v24 }
 0x3a6   : > { %v5086_v35 = vpop.eup %5085 }
 0x3a7   : > { %v5088_v36 = vpop.eup %5087  ;;  %v1116_v37 = vmul.f32 %v5086_v35, %v1102_v29  ;;  %v1424_v38 = vpop.xlane.xlu2 %1423 }
 0x3a8   : > { %v1108_v26 = vpop.xlane.xlu0 %1107  ;;  %v1117_v40 = vmul.f32 %v5088_v36, %v1105_v17  ;;  %v1429_v29 = vsub.f32 %v5911_v1, %v1424_v38 }
 0x3a9   : > { %5091 = vrcp.f32 %v1108_v26  ;;  %v1121_v0 = vsub.f32 2.0, %v1116_v37 }
 0x3aa   : > { %v5982_v61 = vpop.eup %5089  ;;  %v1122_v41 = vsub.f32 2.0, %v1117_v40  ;;  %v1438_v16 = vmul.f32 1.442695, %v1429_v29 }
 0x3ab   : > { %v1126_v42 = vmul.f32 %v5086_v35, %v1121_v0  ;;  %v1609_v43 = vsel %vm1063_vm2, %v5982_v61, 0.0 }
 0x3ac   : > { %v1127_v48 = vmul.f32 %v5088_v36, %v1122_v41  ;;  %1610 = vadd.xlane.f32.xlu2 %v1609_v43 }
 0x3ad   : > { %1483 = vrot.lane.b32.xlu1 %v5766_v6, %s5505_s7  ;;  %v1131_v12 = vmul.f32 %v5897_v55, %v1126_v42 }
 0x3ae   : > { %v1132_v50 = vmul.f32 %v5899_v58, %v1127_v48 }
 0x3af   : > { %v5092_v5 = vpop.eup %5091  ;;  %v1584_v51 = vpop.xlane.xlu2 %1583 }
 0x3b0   : > { %v1118_v52 = vmul.f32 %v5092_v5, %v1108_v26  ;;  %v1595_v14 = vsub.f32 %v5920_v8, %v1584_v51  ;;  %v1135_v54 = vpack.c.bf16 %v1132_v50, %v1131_v12  ;;  %v1427_v8 = vsub.f32 %v5876_v34, %v5955_v25 }
 0x3b2   : > { %v1601_v28 = vmul.f32 1.442695, %v1595_v14  ;;  %4307 = vmatmul.msk.bf16.gmra.mxu3 %vm1063_vm2, %v1135_v54  ;;  %v1123_v56 = vsub.f32 2.0, %v1118_v52  ;;  %v1434_v9 = vmul.f32 1.442695, %v1427_v8 }
 0x3b4   : > { %5093 = vpow2.f32 %v1601_v28  ;;  %v1128_v30 = vmul.f32 %v5092_v5, %v1123_v56 }
 0x3b5   : > { %5095 = vpow2.f32 %v1434_v9 }
 0x3b6   : > { %v1133_v55 = vmul.f32 %v5913_v3, %v1128_v30 }
 0x3b7   : > { %v1590_v2 = vpop.xlane.xlu0 %1589 }
 0x3b8   : > { %v1136_v58 = vpack.c.bf16 %v1133_v55, %v1133_v55  ;;  %v1597_v13 = vsub.f32 %v5930_v19, %v1590_v2 }
 0x3ba   : > { %v5992_v59 = vpop.eup %5093  ;;  %v1605_v3 = vmul.f32 1.442695, %v1597_v13 }
 0x3bb   : > { %v1612_v39 = vsel %vm1063_vm2, %v5992_v59, 0.0  ;;  %v6007_v18 = vpop.eup %5095 }
 0x3bc   : > { %1613 = vadd.xlane.f32.xlu0 %v1612_v39  ;;  %5097 = vpow2.f32 %v1605_v3  ;;  %v1446_v34 = vsel %vm1063_vm2, %v6007_v18, 0.0 }
 0x3bf   : > { %v1593_v15 = vpop.xlane.xlu0 %1592 }
 0x3c2   : > { %4308 = vmatmul.msk.bf16.gmra.mxu3 %vm1063_vm2, %v1136_v58  ;;  %v6012_v44 = vpop.eup %5097 }
 0x3c4   : > { %1654 = vrot.lane.b32.xlu2 %v5763_v4, %s5506_s15  ;;  %v1598_v4 = vsub.f32 %v5935_v49, %v1593_v15 }
 0x3c6   : > { %v1607_v25 = vmul.f32 1.442695, %v1598_v4 }
 0x3c8   : > { %5099 = vpow2.f32 %v1607_v25 }
 0x3cc   : > { %1652 = vrot.lane.b32.xlu2 %v5766_v6, %s5506_s15  ;;  %v1618_v6 = vsel %vm1063_vm2, %v6012_v44, 0.0 }
 0x3ce   : > { %v6016_v19 = vpop.eup %5099 }
 0x3cf   : > { %v1621_v49 = vsel %vm1063_vm2, %v6016_v19, 0.0 }
 0x3d0   : > { %1656 = vrot.lane.b32.xlu0 %v5752_v57, %s5506_s15  ;;  %v1587_v57 = vpop.xlane.xlu1 %1586 }
 0x3d1   : > { %v1596_v20 = vsub.f32 %v5923_v10, %v1587_v57 }
 0x3d3   : > { %v1603_v21 = vmul.f32 1.442695, %v1596_v20 }
 0x3d5   : > { %5101 = vpow2.f32 %v1603_v21 }
 0x3d6   : > { %5103 = vpow2.f32 %v1436_v27 }
 0x3d7   : > { %1447 = vadd.xlane.f32.xlu1 %v1446_v34  ;;  %5105 = vpow2.f32 %v1438_v16 }
 0x3db   : > { %v6024_v31 = vpop.eup %5101 }
 0x3dc   : > { %v1615_v17 = vsel %vm1063_vm2, %v6024_v31, 0.0  ;;  %v6028_v10 = vpop.eup %5103 }
 0x3dd   : > { %v1449_v45 = vsel %vm1063_vm2, %v6028_v10, 0.0  ;;  %v6032_v33 = vpop.eup %5105 }
 0x3de   : > { %v1452_v1 = vsel %vm1063_vm2, %v6032_v33, 0.0 }
 0x3df   : > { %1619 = vadd.xlane.f32.xlu1 %v1618_v6 }
 0x3e7   : > { %1622 = vadd.xlane.f32.xlu1 %v1621_v49 }
 0x3ef   : > { %v1273_v47 = vpop.xlane.xlu1 %1272 }
 0x3f0   : > { %5107 = vrcp.f32 %v1273_v47 }
 0x3f5   : > { %1616 = vadd.xlane.f32.xlu2 %v1615_v17 }
 0x3f6   : > { %v5108_v24 = vpop.eup %5107 }
 0x3f7   : > { %v1291_v37 = vmul.f32 %v5108_v24, %v1273_v47 }
 0x3f9   : > { %v1296_v38 = vsub.f32 2.0, %v1291_v37 }
 0x3fa   : > { %1450 = vadd.xlane.f32.xlu0 %v1449_v45 }
 0x3fb   : > { %v1301_v48 = vmul.f32 %v5108_v24, %v1296_v38 }
 0x3fd   : > { %v1442_v7 = vpop.xlane.xlu0 %1441  ;;  %v1306_v14 = vmul.f32 %v5940_v32, %v1301_v48 }
 0x402   : > { %1453 = vadd.xlane.f32.xlu0 %v1452_v1 }
 0x405   : > { %v1445_v35 = vpop.xlane.xlu2 %1444  ;;  %v1276_v36 = vpop.xlane.xlu0 %1275 }
 0x406   : > { %5109 = vrcp.f32 %v1276_v36 }
 0x407   : > { %5111 = vrcp.f32 %v1445_v35  ;;  %v1282_v26 = vpop.xlane.xlu1 %1281 }
 0x408   : > { %5113 = vrcp.f32 %v1442_v7 }
 0x40c   : > { %v5110_v40 = vpop.eup %5109 }
 0x40d   : > { %v1279_v0 = vpop.xlane.xlu2 %1278  ;;  %v5112_v41 = vpop.eup %5111  ;;  %v1292_v42 = vmul.f32 %v5110_v40, %v1276_v36 }
 0x40e   : > { %5115 = vrcp.f32 %v1279_v0  ;;  %v5114_v43 = vpop.eup %5113  ;;  %v1461_v5 = vmul.f32 %v5112_v41, %v1445_v35 }
 0x40f   : > { %5117 = vrcp.f32 %v1282_v26  ;;  %v1297_v12 = vsub.f32 2.0, %v1292_v42  ;;  %v1460_v51 = vmul.f32 %v5114_v43, %v1442_v7 }
 0x410   : > { %v1466_v56 = vsub.f32 2.0, %v1461_v5 }
 0x411   : > { %v1302_v50 = vmul.f32 %v5110_v40, %v1297_v12  ;;  %v1465_v55 = vsub.f32 2.0, %v1460_v51 }
 0x412   : > { %v1471_v8 = vmul.f32 %v5112_v41, %v1466_v56 }
 0x413   : > { %v1307_v54 = vmul.f32 %v5953_v23, %v1302_v50  ;;  %v1470_v13 = vmul.f32 %v5114_v43, %v1465_v55 }
 0x414   : > { %v5116_v52 = vpop.eup %5115  ;;  %v1476_v15 = vmul.f32 %v5957_v53, %v1471_v8 }
 0x415   : > { %v5118_v28 = vpop.eup %5117  ;;  %v1293_v30 = vmul.f32 %v5116_v52, %v1279_v0  ;;  %v1311_v39 = vpack.c.bf16 %v1307_v54, %v1306_v14  ;;  %v1475_v32 = vmul.f32 %v5948_v46, %v1470_v13 }
 0x416   : > { %v1294_v58 = vmul.f32 %v5118_v28, %v1282_v26 }
 0x417   : > { %4312 = vmatmul.msk.bf16.vlgmr.msrb.gmra.mxu1 %vm1063_vm2, %v1311_v39  ;;  %v1298_v2 = vsub.f32 2.0, %v1293_v30  ;;  %v1285_v9 = vpop.xlane.xlu0 %1284  ;;  %v1480_v25 = vpack.c.bf16 %v1476_v15, %v1475_v32 }
 0x418   : > { %v1299_v3 = vsub.f32 2.0, %v1294_v58  ;;  %5119 = vrcp.f32 %v1285_v9 }
 0x419   : > { %v1303_v4 = vmul.f32 %v5116_v52, %v1298_v2 }
 0x41a   : > { %v1304_v34 = vmul.f32 %v5118_v28, %v1299_v3 }
 0x41b   : > { %v1308_v6 = vmul.f32 %v5967_v63, %v1303_v4 }
 0x41c   : > { %v1309_v49 = vmul.f32 %v5963_v62, %v1304_v34 }
 0x41e   : > { %v5120_v57 = vpop.eup %5119  ;;  %v1312_v22 = vpack.c.bf16 %v1309_v49, %v1308_v6 }
 0x41f   : > { %v1484_v23 = vpop.permute.xlu1 %1483  ;;  %v1295_v21 = vmul.f32 %v5120_v57, %v1285_v9  ;;  %v1611_v17 = vpop.xlane.xlu2 %1610 }
 0x420   : > { %1510 = vmatpush.bf16.msra.mxu3 %v1484_v23 }
 0x421   : > { %v1300_v53 = vsub.f32 2.0, %v1295_v21 }
 0x423   : > { %4318 = vmatmul.msk.bf16.vlgmr.msra.gmra.mxu3 %vm1063_vm2, %v1480_v25  ;;  %v1305_v46 = vmul.f32 %v5120_v57, %v1300_v53 }
 0x424   : > { %v6043_v20 = vpop.f32.mrf.mxu3 }
 0x425   : > { %v1310_v16 = vmul.f32 %v5978_v60, %v1305_v46 }
 0x427   : > { %4313 = vmatmul.msk.bf16.gmra.mxu1 %vm1063_vm2, %v1312_v22  ;;  %v1313_v45 = vpack.c.bf16 %v1310_v16, %v1310_v16  ;;  %v1655_v35 = vpop.permute.xlu2 %1654 }
 0x42c   : > { %v6047_v27 = vpop.f32.mrf.mxu3 }
 0x42f   : > { %v1614_v29 = vpop.xlane.xlu0 %1613  ;;  %v1653_v43 = vpop.permute.xlu2 %1652 }
 0x430   : > { %5121 = vrcp.f32 %v1614_v29 }
 0x431   : > { %5123 = vrcp.f32 %v1611_v17 }
 0x435   : > { %v6050_v63 = vpop.f32.mrf.mxu3 }
 0x436   : > { %v5122_v62 = vpop.eup %5121 }
 0x437   : > { %4314 = vmatmul.msk.bf16.gmra.mxu1 %vm1063_vm2, %v1313_v45  ;;  %v5124_v47 = vpop.eup %5123  ;;  %v1630_v7 = vmul.f32 %v5122_v62, %v1614_v29 }
 0x438   : > { %v1629_v24 = vmul.f32 %v5124_v47, %v1611_v17 }
 0x439   : > { %v1635_v36 = vsub.f32 2.0, %v1630_v7 }
 0x43a   : > { %v1634_v38 = vsub.f32 2.0, %v1629_v24 }
 0x43b   : > { %v1640_v26 = vmul.f32 %v5122_v62, %v1635_v36 }
 0x43c   : > { %v1639_v0 = vmul.f32 %v5124_v47, %v1634_v38 }
 0x43d   : > { %v6053_v1 = vpop.f32.mrf.mxu3  ;;  %v1645_v41 = vmul.f32 %v5992_v59, %v1640_v26 }
 0x43e   : > { %v1644_v42 = vmul.f32 %v5982_v61, %v1639_v0 }
 0x440   : > { %v1649_v48 = vpack.c.bf16 %v1645_v41, %v1644_v42  ;;  %v4800_v42 = vld [vmem:[#allocation6 + $0x38] sm:$0xff] }
 0x441   : > { %1843 = vmatpush.bf16.msra.mxu2 %v4800_v42 }
 0x442   : > { %v1657_v37 = vpop.permute.xlu0 %1656 }
 0x443   : > { %v1670_v60 = vsel %vm1161_vm1, %v1657_v37, 0 }
 0x444   : > { %1677 = vmatpush.bf16.msra.mxu1 %v1670_v60 }
 0x445   : > { %v6056_v40 = vpop.f32.mrf.mxu3 }
 0x448   : > { %1678 = vmatpush.bf16.msra.mxu1 %v1655_v35 }
 0x44a   : > { %v1448_v5 = vpop.xlane.xlu1 %1447 }
 0x44c   : > { %1679 = vmatpush.bf16.msra.mxu1 %v1653_v43 }
 0x44d   : > { %v1186_v12 = vpop.f32.mrf.mxu3 }
 0x44e   : > { %v4798_v12 = vld [vmem:[#allocation6 + $0x28] sm:$0xff] }
 0x44f   : > { %4324 = vmatmul.msk.bf16.vlgmr.msra.gmra.mxu1 %vm1063_vm2, %v1649_v48  ;;  %v4799_v48 = vld [vmem:[#allocation6 + $0x30] sm:$0xff] }
 0x450   : > { %1844 = vmatpush.bf16.msra.mxu2 %v4799_v48 }
 0x452   : > { %v1620_v50 = vpop.xlane.xlu1 %1619 }
 0x453   : > { %5125 = vrcp.f32 %v1620_v50 }
 0x454   : > { %5127 = vrcp.f32 %v1448_v5  ;;  %1845 = vmatpush.bf16.msra.mxu2 %v4798_v12 }
 0x459   : > { %v5126_v51 = vpop.eup %5125 }
 0x45a   : > { %v1632_v14 = vmul.f32 %v5126_v51, %v1620_v50  ;;  %v5128_v54 = vpop.eup %5127  ;;  %v1623_v28 = vpop.xlane.xlu1 %1622 }
 0x45b   : > { %v1462_v30 = vmul.f32 %v5128_v54, %v1448_v5 }
 0x45c   : > { %v1637_v59 = vsub.f32 2.0, %v1632_v14  ;;  %v4796_v14 = vld [vmem:[#allocation6 + $0x18] sm:$0xff] }
 0x45d   : > { %v1467_v8 = vsub.f32 2.0, %v1462_v30 }
 0x45e   : > { %v1642_v55 = vmul.f32 %v5126_v51, %v1637_v59 }
 0x45f   : > { %v1472_v23 = vmul.f32 %v5128_v54, %v1467_v8 }
 0x460   : > { %v1647_v32 = vmul.f32 %v6012_v44, %v1642_v55  ;;  %v4793_v55 = vld [vmem:[#allocation6] sm:$0xff] }
 0x461   : > { %v1477_v49 = vmul.f32 %v6007_v18, %v1472_v23 }
 0x468   : > { %v1617_v52 = vpop.xlane.xlu2 %1616 }
 0x469   : > { %5129 = vrcp.f32 %v1617_v52 }
 0x46d   : > { %v1451_v56 = vpop.xlane.xlu0 %1450 }
 0x46e   : > { %5131 = vrcp.f32 %v1451_v56 }
 0x46f   : > { %v5130_v61 = vpop.eup %5129  ;;  %5133 = vrcp.f32 %v1623_v28 }
 0x470   : > { %v1631_v39 = vmul.f32 %v5130_v61, %v1617_v52  ;;  %v4797_v52 = vld [vmem:[#allocation6 + $0x20] sm:$0xff] }
 0x471   : > { %1846 = vmatpush.bf16.msra.mxu2 %v4797_v52 }
 0x472   : > { %v1636_v58 = vsub.f32 2.0, %v1631_v39 }
 0x474   : > { %v5132_v2 = vpop.eup %5131  ;;  %v1641_v9 = vmul.f32 %v5130_v61, %v1636_v58  ;;  %v4794_v61 = vld [vmem:[#allocation6 + $0x8] sm:$0xff] }
 0x475   : > { %v5134_v13 = vpop.eup %5133  ;;  %v1463_v3 = vmul.f32 %v5132_v2, %v1451_v56  ;;  %v1454_v15 = vpop.xlane.xlu0 %1453  ;;  %1847 = vmatpush.bf16.msra.mxu2 %v4796_v14 }
 0x476   : > { %5135 = vrcp.f32 %v1454_v15  ;;  %v1646_v4 = vmul.f32 %v6024_v31, %v1641_v9  ;;  %v1633_v25 = vmul.f32 %v5134_v13, %v1623_v28  ;;  %v4795_v28 = vld [vmem:[#allocation6 + $0x10] sm:$0xff] }
 0x477   : > { %v1468_v34 = vsub.f32 2.0, %v1463_v3 }
 0x478   : > { %v1650_v6 = vpack.c.bf16 %v1647_v32, %v1646_v4  ;;  %v1638_v53 = vsub.f32 2.0, %v1633_v25 }
 0x479   : > { %v1473_v57 = vmul.f32 %v5132_v2, %v1468_v34  ;;  %1848 = vmatpush.bf16.msra.mxu2 %v4795_v28 }
 0x47a   : > { %4325 = vmatmul.msk.bf16.gmra.mxu1 %vm1063_vm2, %v1650_v6  ;;  %v1643_v31 = vmul.f32 %v5134_v13, %v1638_v53 }
 0x47b   : > { %v1478_v21 = vmul.f32 %v6028_v10, %v1473_v57 }
 0x47c   : > { %v5136_v22 = vpop.eup %5135  ;;  %v1648_v44 = vmul.f32 %v6016_v19, %v1643_v31 }
 0x47d   : > { %v1464_v46 = vmul.f32 %v5136_v22, %v1454_v15  ;;  %v1481_v29 = vpack.c.bf16 %v1478_v21, %v1477_v49  ;;  %1849 = vmatpush.bf16.msra.mxu2 %v4794_v61  ;;  %v5281_v61 = vld [vmem:[%s5671_s20 + $0x20] sm:$0xff] }
 0x47e   : > { %v1651_v45 = vpack.c.bf16 %v1648_v44, %v1648_v44 }
 0x47f   : > { %4319 = vmatmul.msk.bf16.gmra.mxu3 %vm1063_vm2, %v1481_v29  ;;  %v1469_v16 = vsub.f32 2.0, %v1464_v46 }
 0x481   : > { %v1474_v17 = vmul.f32 %v5136_v22, %v1469_v16  ;;  %1850 = vmatpush.bf16.msra.mxu2 %v4793_v55 }
 0x483   : > { %v1479_v62 = vmul.f32 %v6032_v33, %v1474_v17 }
 0x485   : > { %v1482_v47 = vpack.c.bf16 %v1479_v62, %v1479_v62 }
 0x48a   : > { %4326 = vmatmul.msk.bf16.gmra.mxu1 %vm1063_vm2, %v1651_v45 }
 0x48f   : > { %4320 = vmatmul.msk.bf16.gmra.mxu3 %vm1063_vm2, %v1482_v47 }
 0x494   : > { %v1343_v18 = vpop.f32.mrf.mxu1 }
 0x49c   : > { %v1345_v10 = vpop.f32.mrf.mxu1 }
 0x49d   : > { %v4976_v7 = vpack.i.bf16 %v1345_v10, %v1343_v18 }
 0x49f   : > { %4977 = vrot.lane.b32.xlu0 %v4976_v7, %s5506_s15 }
 0x4a4   : > { %v1348_v24 = vpop.f32.mrf.mxu1 }
 0x4a6   : > { %v1512_v35 = vpop.f32.mrf.mxu3 }
 0x4ac   : > { %v1350_v36 = vpop.f32.mrf.mxu1 }
 0x4ad   : > { %v4991_v37 = vpack.i.bf16 %v1350_v36, %v1348_v24 }
 0x4ae   : > { %v1514_v38 = vpop.f32.mrf.mxu3 }
 0x4af   : > { %v4981_v19 = vpack.i.bf16 %v1514_v38, %v1512_v35  ;;  %4992 = vrot.lane.b32.xlu0 %v4991_v37, %s5506_s15 }
 0x4b1   : > { %4982 = vrot.lane.b32.xlu1 %v4981_v19, %s5505_s7 }
 0x4b4   : > { %v1353_v33 = vpop.f32.mrf.mxu1 }
 0x4bc   : > { %v1355_v60 = vpop.f32.mrf.mxu1 }
 0x4cc   : > { %v1681_v26 = vpop.f32.mrf.mxu1 }
 0x4d4   : > { %v1683_v0 = vpop.f32.mrf.mxu1 }
 0x4d5   : > { %v4986_v41 = vpack.i.bf16 %v1683_v0, %v1681_v26  ;;  %v5277_v0 = vld [vmem:[%s5671_s20] sm:$0xff] }
 0x4d7   : > { %4987 = vrot.lane.b32.xlu2 %v4986_v41, %s5504_s17 }
 0x4df   : > { %1708 = vrot.lane.b32.xlu2 %v1353_v33, %s5506_s15  ;;  %v5038_v33 = vld [vmem:[%s6959_s6] ss:$0 sm:$0xff] }
 0x4f7   : > { %v1686_v43 = vpop.f32.mrf.mxu1 }
 0x4ff   : > { %v1688_v5 = vpop.f32.mrf.mxu1 }
 0x500   : > { %v5001_v50 = vpack.i.bf16 %v1688_v5, %v1686_v43  ;;  %v5278_v43 = vld [vmem:[%s5671_s20 + $0x8] sm:$0xff] }
 0x502   : > { %5002 = vrot.lane.b32.xlu1 %v5001_v50, %s5504_s17  ;;  %v1517_v51 = vpop.f32.mrf.mxu3  ;;  %v5279_v50 = vld [vmem:[%s5671_s20 + $0x10] sm:$0xff] }
 0x507   : > { %v1691_v54 = vpop.f32.mrf.mxu1 }
 0x50a   : > { %1748 = vrot.lane.b32.xlu1 %v1691_v54, %s5504_s17  ;;  %v1519_v56 = vpop.f32.mrf.mxu3  ;;  %v5280_v54 = vld [vmem:[%s5671_s20 + $0x18] sm:$0xff] }
 0x50b   : > { %v4996_v59 = vpack.i.bf16 %v1519_v56, %v1517_v51 }
 0x50d   : > { %4997 = vrot.lane.b32.xlu0 %v4996_v59, %s5505_s7 }
 0x50f   : > { %v1693_v30 = vpop.f32.mrf.mxu1 }
 0x511   : > { %v4978_v8 = vpop.permute.xlu0 %4977 }
 0x512   : > { %v1522_v39 = vpop.f32.mrf.mxu3  ;;  %v4980_v9 = vunpack.i.h.bf16 %v4978_v8  ;;  %v4979_v13 = vunpack.i.l.bf16 %v4978_v8 }
 0x514   : > { %v1756_v32 = vsel %vm1021_vm0, %v6047_v27, %v4980_v9  ;;  %v1755_v23 = vsel %vm1021_vm0, %v6043_v20, %v4979_v13 }
 0x515   : > { %1728 = vrot.lane.b32.xlu0 %v1522_v39, %s5505_s7 }
 0x51a   : > { %v1524_v58 = vpop.f32.mrf.mxu3 }
 0x521   : > { %v4993_v53 = vpop.permute.xlu0 %4992 }
 0x522   : > { %v4995_v46 = vunpack.i.h.bf16 %v4993_v53  ;;  %v4994_v29 = vunpack.i.l.bf16 %v4993_v53  ;;  %v4445_v53 = vld [vmem:[#allocation7 + $0xa8] sm:$0xf] }
 0x523   : > { %v4983_v2 = vpop.permute.xlu1 %4982 }
 0x524   : > { %v4985_v3 = vunpack.i.h.bf16 %v4983_v2  ;;  %v4984_v15 = vunpack.i.l.bf16 %v4983_v2  ;;  %v1758_v20 = vsel %vm1021_vm0, %v6053_v1, %v4995_v46  ;;  %v1757_v17 = vsel %vm1021_vm0, %v6050_v63, %v4994_v29  ;;  %v4823_v46 = vld [vmem:[#allocation7 + $0xb0] sm:$0xf0]  ;;  %v4822_v29 = vld [vmem:[#allocation7 + $0xac] sm:$0xf] }
 0x526   : > { %v1761_v6 = vsel %vm1760_vm3, %v1755_v23, %v4984_v15  ;;  %v1762_v57 = vsel %vm1760_vm3, %v1756_v32, %v4985_v3 }
 0x531   : > { %v4988_v4 = vpop.permute.xlu2 %4987 }
 0x532   : > { %v4990_v34 = vunpack.i.h.bf16 %v4988_v4  ;;  %v4989_v25 = vunpack.i.l.bf16 %v4988_v4 }
 0x534   : > { %v1767_v49 = vsel %vm1766_vm4, %v1761_v6, %v4989_v25  ;;  %v1768_v21 = vsel %vm1766_vm4, %v1762_v57, %v4990_v34 }
 0x535   : > { %v1772_v22 = vpack.c.bf16 %v1768_v21, %v1767_v49 }
 0x537   : > { %1851 = vmatmul.bf16.vlgmr.msra.gmra.mxu2 %v1772_v22 }
 0x539   : > { %v1709_v35 = vpop.permute.xlu2 %1708 }
 0x53a   : > { %v1759_v1 = vsel %vm1021_vm0, %v6056_v40, %v1709_v35  ;;  %v4441_v35 = vld [vmem:[#allocation7 + $0x98] sm:$0xf] }
 0x574   : > { %v5003_v31 = vpop.permute.xlu1 %5002 }
 0x575   : > { %v5005_v45 = vunpack.i.h.bf16 %v5003_v31  ;;  %v5004_v62 = vunpack.i.l.bf16 %v5003_v31  ;;  %v4446_v31 = vor.u32 %v4823_v46, %v4445_v53  ;;  %v4375_v46 = vld [vmem:[#allocation7 + $0x24] sm:$0xf0] }
 0x577   : > { %2154 = vmatpush.bf16.msrb.mxu3 %v4446_v31  ;;  %v4806_v31 = vld [vmem:[#allocation7 + $0x28] sm:$0xf0] }
 0x57c   : > { %v1749_v37 = vpop.permute.xlu1 %1748 }
 0x57f   : > { %v4998_v27 = vpop.permute.xlu0 %4997 }
 0x580   : > { %v5000_v16 = vunpack.i.h.bf16 %v4998_v27  ;;  %v4999_v44 = vunpack.i.l.bf16 %v4998_v27  ;;  %v4447_v27 = vld [vmem:[#allocation7 + $0xb4] sm:$0xf0] }
 0x582   : > { %v1763_v47 = vsel %vm1760_vm3, %v1757_v17, %v4999_v44  ;;  %v1764_v18 = vsel %vm1760_vm3, %v1758_v20, %v5000_v16  ;;  %v4453_v16 = vld [vmem:[#allocation7 + $0xb0] sm:$0xf]  ;;  %v4824_v44 = vld [vmem:[#allocation7 + $0xb8] sm:$0xf0]  ;;  %v4450_v17 = vor.u32 %v4822_v29, %v4447_v27  ;;  %v4381_v29 = vld [vmem:[#allocation7 + $0x20] sm:$0xf] }
 0x583   : > { %v1769_v10 = vsel %vm1766_vm4, %v1763_v47, %v5004_v62  ;;  %v1770_v7 = vsel %vm1766_vm4, %v1764_v18, %v5005_v45  ;;  %v4454_v45 = vor.u32 %v4824_v44, %v4453_v16  ;;  %v4433_v47 = vld [vmem:[#allocation7 + $0x90] sm:$0xf]  ;;  %v4820_v18 = vld [vmem:[#allocation7 + $0x98] sm:$0xf0]  ;;  %v4382_v44 = vor.u32 %v4806_v31, %v4381_v29 }
 0x584   : > { %v1773_v24 = vpack.c.bf16 %v1770_v7, %v1769_v10  ;;  %2177 = vmatpush.bf16.msrb.mxu0 %v4450_v17  ;;  %v4819_v10 = vld [vmem:[#allocation7 + $0x94] sm:$0xf]  ;;  %v4434_v7 = vor.u32 %v4820_v18, %v4433_v47  ;;  %v4361_v17 = vld [vmem:[#allocation7] sm:$0xf] }
 0x585   : > { %2200 = vmatpush.bf16.msrb.mxu1 %v4454_v45  ;;  %v4802_v45 = vld [vmem:[#allocation7 + $0x8] sm:$0xf0] }
 0x586   : > { %1856 = vmatmul.bf16.gmra.mxu2 %v1773_v24  ;;  %v4435_v24 = vld [vmem:[#allocation7 + $0x9c] sm:$0xf0]  ;;  %2155 = vmatpush.bf16.msrb.mxu3 %v4434_v7  ;;  %v4362_v18 = vor.u32 %v4802_v45, %v4361_v17  ;;  %v4369_v7 = vld [vmem:[#allocation7 + $0x8] sm:$0xf] }
 0x587   : > { %v1729_v36 = vpop.permute.xlu0 %1728 }
 0x588   : > { %v1765_v63 = vsel %vm1760_vm3, %v1759_v1, %v1729_v36  ;;  %v4821_v36 = vld [vmem:[#allocation7 + $0xa0] sm:$0xf0]  ;;  %v4438_v1 = vor.u32 %v4819_v10, %v4435_v24  ;;  %v4363_v10 = vld [vmem:[#allocation7 + $0xc] sm:$0xf0]  ;;  %v4803_v24 = vld [vmem:[#allocation7 + $0x10] sm:$0xf0] }
 0x589   : > { %v1771_v38 = vsel %vm1766_vm4, %v1765_v63, %v1749_v37  ;;  %v4442_v63 = vor.u32 %v4821_v36, %v4441_v35  ;;  %v4421_v37 = vld [vmem:[#allocation7 + $0x78] sm:$0xf]  ;;  %v4370_v36 = vor.u32 %v4803_v24, %v4369_v7 }
 0x58a   : > { %v1774_v19 = vpack.c.bf16 %v1771_v38, %v1771_v38  ;;  %2178 = vmatpush.bf16.msrb.mxu0 %v4438_v1  ;;  %v4817_v38 = vld [vmem:[#allocation7 + $0x80] sm:$0xf0] }
 0x58b   : > { %2201 = vmatpush.bf16.msrb.mxu1 %v4442_v63 }
 0x596   : > { %1861 = vmatmul.bf16.gmra.mxu2 %v1774_v19  ;;  %v4816_v19 = vld [vmem:[#allocation7 + $0x7c] sm:$0xf] }
 0x5ba   : > { %v1852_v60 = vpop.f32.mrf.mxu2 }
 0x5bb   : > { %v1853_v26 = vadd.f32 %v5038_v33, %v1852_v60  ;;  %v4423_v60 = vld [vmem:[#allocation7 + $0x84] sm:$0xf0] }
 0x5bd   : > { %v1866_v41 = vadd.f32 %v5277_v0, %v1853_v26  ;;  %v4429_v26 = vld [vmem:[#allocation7 + $0x80] sm:$0xf]  ;;  %v4818_v0 = vld [vmem:[#allocation7 + $0x88] sm:$0xf0] }
 0x5bf   : > { %1871 = vadd.xlane.f32.xlu2 %v1866_v41 }
 0x5c2   : > { %v1854_v42 = vpop.f32.mrf.mxu2 }
 0x5c3   : > { %v1855_v40 = vadd.f32 %v5038_v33, %v1854_v42  ;;  %v4430_v42 = vor.u32 %v4818_v0, %v4429_v26 }
 0x5c5   : > { %v1867_v48 = vadd.f32 %v5278_v43, %v1855_v40  ;;  %2202 = vmatpush.bf16.msrb.mxu1 %v4430_v42  ;;  %v4409_v40 = vld [vmem:[#allocation7 + $0x60] sm:$0xf]  ;;  %v4814_v43 = vld [vmem:[#allocation7 + $0x68] sm:$0xf0] }
 0x5c7   : > { %1873 = vadd.xlane.f32.xlu0 %v1867_v48 }
 0x609   : > { %v1857_v12 = vpop.f32.mrf.mxu2 }
 0x60a   : > { %v1858_v5 = vadd.f32 %v5038_v33, %v1857_v12  ;;  %v4410_v12 = vor.u32 %v4814_v43, %v4409_v40 }
 0x60c   : > { %v1868_v51 = vadd.f32 %v5279_v50, %v1858_v5  ;;  %v4411_v5 = vld [vmem:[#allocation7 + $0x6c] sm:$0xf0]  ;;  %v4417_v50 = vld [vmem:[#allocation7 + $0x68] sm:$0xf] }
 0x60e   : > { %1875 = vadd.xlane.f32.xlu1 %v1868_v51 }
 0x611   : > { %v1859_v52 = vpop.f32.mrf.mxu2 }
 0x612   : > { %v1860_v14 = vadd.f32 %v5038_v33, %v1859_v52 }
 0x614   : > { %v1869_v28 = vadd.f32 %v5280_v54, %v1860_v14  ;;  %v4397_v54 = vld [vmem:[#allocation7 + $0x48] sm:$0xf] }
 0x616   : > { %1877 = vadd.xlane.f32.xlu2 %v1869_v28 }
 0x619   : > { %v1862_v56 = vpop.f32.mrf.mxu2 }
 0x61a   : > { %v1863_v59 = vadd.f32 %v5038_v33, %v1862_v56  ;;  %v4422_v33 = vor.u32 %v4817_v38, %v4421_v37  ;;  %v4810_v56 = vld [vmem:[#allocation7 + $0x4c] sm:$0xf] }
 0x61c   : > { %v1870_v30 = vadd.f32 %v5281_v61, %v1863_v59  ;;  %2156 = vmatpush.bf16.msrb.mxu3 %v4422_v33  ;;  %v4399_v61 = vld [vmem:[#allocation7 + $0x54] sm:$0xf0] }
 0x61e   : > { %1879 = vadd.xlane.f32.xlu0 %v1870_v30 }
 0x620   : > { %2157 = vmatpush.bf16.msrb.mxu3 %v4410_v12 }
 0x621   : > { %v1864_v39 = vpop.f32.mrf.mxu2 }
 0x622   : > { %v4812_v39 = vld [vmem:[#allocation7 + $0x58] sm:$0xf0] }
 0x632   : > { %v1872_v55 = vpop.xlane.xlu2 %1871 }
 0x633   : > { %v1881_v58 = vmul.f32 %v1872_v55, %v5678_v11  ;;  %v4402_v55 = vor.u32 %v4810_v56, %v4399_v61  ;;  %v5040_v56 = vld [vmem:[%s6954_s1 + $0x1] ss:$0 sm:$0xff] }
 0x635   : > { %v6109_v8 = vsub.f32 %v1866_v41, %v1881_v58  ;;  %v4426_v41 = vor.u32 %v4816_v19, %v4423_v60 }
 0x637   : > { %v1891_v2 = vmul.f32 %v6109_v8, %v6109_v8  ;;  %2179 = vmatpush.bf16.msrb.mxu0 %v4426_v41 }
 0x639   : > { %1896 = vadd.xlane.f32.xlu1 %v1891_v2  ;;  %v4385_v2 = vld [vmem:[#allocation7 + $0x30] sm:$0xf] }
 0x63a   : > { %v1874_v9 = vpop.xlane.xlu0 %1873 }
 0x63b   : > { %v1882_v13 = vmul.f32 %v1874_v9, %v5678_v11  ;;  %v4808_v9 = vld [vmem:[#allocation7 + $0x38] sm:$0xf0] }
 0x63d   : > { %v6114_v3 = vsub.f32 %v1867_v48, %v1882_v13  ;;  %v4813_v48 = vld [vmem:[#allocation7 + $0x64] sm:$0xf]  ;;  %v4807_v13 = vld [vmem:[#allocation7 + $0x34] sm:$0xf] }
 0x63e   : > { %v4414_v52 = vor.u32 %v4813_v48, %v4411_v5 }
 0x63f   : > { %v1892_v15 = vmul.f32 %v6114_v3, %v6114_v3 }
 0x640   : > { %2180 = vmatpush.bf16.msrb.mxu0 %v4414_v52 }
 0x641   : > { %1898 = vadd.xlane.f32.xlu2 %v1892_v15  ;;  %v4386_v15 = vor.u32 %v4808_v9, %v4385_v2 }
 0x644   : > { %2181 = vmatpush.bf16.msrb.mxu0 %v4402_v55 }
 0x681   : > { %v1876_v4 = vpop.xlane.xlu1 %1875 }
 0x682   : > { %v1883_v32 = vmul.f32 %v1876_v4, %v5678_v11  ;;  %v4387_v4 = vld [vmem:[#allocation7 + $0x3c] sm:$0xf0] }
 0x684   : > { %v6119_v23 = vsub.f32 %v1868_v51, %v1883_v32  ;;  %v4815_v51 = vld [vmem:[#allocation7 + $0x70] sm:$0xf0]  ;;  %v4393_v32 = vld [vmem:[#allocation7 + $0x38] sm:$0xf] }
 0x685   : > { %v4418_v14 = vor.u32 %v4815_v51, %v4417_v50  ;;  %v6139_v51 = vld [vmem:[%s6954_s1] ss:$0 sm:$0xff] }
 0x686   : > { %v1893_v34 = vmul.f32 %v6119_v23, %v6119_v23 }
 0x687   : > { %2203 = vmatpush.bf16.msrb.mxu1 %v4418_v14 }
 0x688   : > { %1900 = vadd.xlane.f32.xlu0 %v1893_v34  ;;  %v4809_v34 = vld [vmem:[#allocation7 + $0x40] sm:$0xf0] }
 0x689   : > { %v1878_v25 = vpop.xlane.xlu2 %1877 }
 0x68a   : > { %v1884_v6 = vmul.f32 %v1878_v25, %v5678_v11  ;;  %v4390_v25 = vor.u32 %v4807_v13, %v4387_v4 }
 0x68c   : > { %v6124_v57 = vsub.f32 %v1869_v28, %v1884_v6  ;;  %v4811_v28 = vld [vmem:[#allocation7 + $0x50] sm:$0xf0]  ;;  %v4394_v6 = vor.u32 %v4809_v34, %v4393_v32  ;;  %2182 = vmatpush.bf16.msrb.mxu0 %v4390_v25 }
 0x68d   : > { %v4398_v59 = vor.u32 %v4811_v28, %v4397_v54 }
 0x68e   : > { %v1894_v49 = vmul.f32 %v6124_v57, %v6124_v57 }
 0x68f   : > { %2158 = vmatpush.bf16.msrb.mxu3 %v4398_v59 }
 0x690   : > { %1902 = vadd.xlane.f32.xlu1 %v1894_v49  ;;  %v4373_v49 = vld [vmem:[#allocation7 + $0x18] sm:$0xf] }
 0x691   : > { %v1880_v21 = vpop.xlane.xlu0 %1879 }
 0x692   : > { %v1885_v22 = vmul.f32 %v1880_v21, %v5678_v11  ;;  %v4805_v21 = vld [vmem:[#allocation7 + $0x20] sm:$0xf0] }
 0x693   : > { %2159 = vmatpush.bf16.msrb.mxu3 %v4386_v15  ;;  %v4374_v53 = vor.u32 %v4805_v21, %v4373_v49 }
 0x694   : > { %v6129_v20 = vsub.f32 %v1870_v30, %v1885_v22  ;;  %v4405_v30 = vld [vmem:[#allocation7 + $0x50] sm:$0xf]  ;;  %v4804_v22 = vld [vmem:[#allocation7 + $0x1c] sm:$0xf] }
 0x695   : > { %v4406_v58 = vor.u32 %v4812_v39, %v4405_v30  ;;  %v4378_v16 = vor.u32 %v4804_v22, %v4375_v46 }
 0x696   : > { %v1895_v62 = vmul.f32 %v6129_v20, %v6129_v20 }
 0x697   : > { %2204 = vmatpush.bf16.msrb.mxu1 %v4406_v58  ;;  %2160 = vmatpush.bf16.msrb.mxu3 %v4374_v53 }
 0x698   : > { %1904 = vadd.xlane.f32.xlu2 %v1895_v62  ;;  %v4801_v62 = vld [vmem:[#allocation7 + $0x4] sm:$0xf]  ;;  %2183 = vmatpush.bf16.msrb.mxu0 %v4378_v16 }
 0x699   : > { %v4366_v35 = vor.u32 %v4801_v62, %v4363_v10 }
 0x69b   : > { %2205 = vmatpush.bf16.msrb.mxu1 %v4394_v6  ;;  %2161 = vmatpush.bf16.msrb.mxu3 %v4362_v18 }
 0x69c   : > { %2184 = vmatpush.bf16.msrb.mxu0 %v4366_v35 }
 0x69f   : > { %2206 = vmatpush.bf16.msrb.mxu1 %v4382_v44 }
 0x6a3   : > { %2207 = vmatpush.bf16.msrb.mxu1 %v4370_v36 }
 0x6ac   : > { %v1897_v27 = vpop.xlane.xlu1 %1896 }
 0x6ad   : > { %v1906_v47 = vmul.f32 %v1897_v27, %v5678_v11 }
 0x6af   : > { %v1911_v1 = vadd.f32 1e-05, %v1906_v47 }
 0x6b1   : > { %5137 = vrsqrt.f32 %v1911_v1  ;;  %vm1922_vm6 = vweird.f32 %v1911_v1 }
 0x6b4   : > { %v1899_v63 = vpop.xlane.xlu2 %1898 }
 0x6b5   : > { %v1907_v37 = vmul.f32 %v1899_v63, %v5678_v11 }
 0x6b7   : > { %v5138_v38 = vpop.eup %5137  ;;  %v1912_v19 = vadd.f32 1e-05, %v1907_v37 }
 0x6b8   : > { %v1917_v33 = vmul.f32 %v5138_v38, %v1911_v1  ;;  %vm1923_vm5 = vweird.f32 %v5138_v38 }
 0x6b9   : > { %5139 = vrsqrt.f32 %v1912_v19  ;;  %vm1924_vm7 = vmor %vm1922_vm6, %vm1923_vm5  ;;  %vm1932_vm9 = vweird.f32 %v1912_v19 }
 0x6ba   : > { %v1918_v60 = vmul.f32 %v5138_v38, %v1917_v33 }
 0x6bc   : > { %v1919_v26 = vmul.f32 0.5, %v1918_v60  ;;  %v2018_v60 = vld [vmem:[%s6961_s8] sm:$0x7] }
 0x6be   : > { %v1920_v0 = vsub.f32 1.5, %v1919_v26 }
 0x6bf   : > { %v5140_v41 = vpop.eup %5139 }
 0x6c0   : > { %v1921_v42 = vmul.f32 %v5138_v38, %v1920_v0  ;;  %v1927_v40 = vmul.f32 %v5140_v41, %v1912_v19  ;;  %vm1933_vm8 = vweird.f32 %v5140_v41  ;;  %v2021_v0 = vperm.slane %v2018_v60, 1 }
 0x6c1   : > { %vm1934_vm10 = vmor %vm1932_vm9, %vm1933_vm8 }
 0x6c2   : > { %v1928_v43 = vmul.f32 %v5140_v41, %v1927_v40  ;;  %v1925_v48 = vsel %vm1924_vm7, %v5138_v38, %v1921_v42 }
 0x6c3   : > { %v1966_v50 = vmul.f32 %v1925_v48, %v6109_v8 }
 0x6c4   : > { %v1929_v12 = vmul.f32 0.5, %v1928_v43 }
 0x6c5   : > { %v1972_v28 = vmul.f32 %v6139_v51, %v1966_v50 }
 0x6c6   : > { %v1930_v5 = vsub.f32 1.5, %v1929_v12 }
 0x6c7   : > { %v1978_v8 = vadd.f32 %v5040_v56, %v1972_v28 }
 0x6c8   : > { %v1931_v52 = vmul.f32 %v5140_v41, %v1930_v5 }
 0x6ca   : > { %v1935_v14 = vsel %vm1934_vm10, %v5140_v41, %v1931_v52 }
 0x6cb   : > { %v1967_v54 = vmul.f32 %v1935_v14, %v6114_v3 }
 0x6cd   : > { %v1973_v59 = vmul.f32 %v6139_v51, %v1967_v54 }
 0x6cf   : > { %v1979_v61 = vadd.f32 %v5040_v56, %v1973_v59 }
 0x6d1   : > { %v1983_v30 = vpack.c.bf16 %v1979_v61, %v1978_v8  ;;  %v6163_v61 = vperm.slane %v2018_v60, 0 }
 0x6d3   : > { %2162 = vmatmul.bf16.vlgmr.msrb.gmra.mxu3 %v1983_v30  ;;  %2185 = vmatmul.bf16.vlgmr.msrb.gmra.mxu0 %v1983_v30 }
 0x6d4   : > { %2208 = vmatmul.bf16.vlgmr.msrb.gmra.mxu1 %v1983_v30 }
 0x6fb   : > { %v1901_v39 = vpop.xlane.xlu0 %1900 }
 0x6fc   : > { %v1908_v55 = vmul.f32 %v1901_v39, %v5678_v11 }
 0x6fe   : > { %v1913_v58 = vadd.f32 1e-05, %v1908_v55 }
 0x700   : > { %5141 = vrsqrt.f32 %v1913_v58  ;;  %vm1942_vm12 = vweird.f32 %v1913_v58 }
 0x703   : > { %v1903_v3 = vpop.xlane.xlu1 %1902 }
 0x704   : > { %v1909_v2 = vmul.f32 %v1903_v3, %v5678_v11 }
 0x706   : > { %v5142_v9 = vpop.eup %5141  ;;  %v1914_v13 = vadd.f32 1e-05, %v1909_v2 }
 0x707   : > { %v1937_v15 = vmul.f32 %v5142_v9, %v1913_v58  ;;  %vm1943_vm11 = vweird.f32 %v5142_v9 }
 0x708   : > { %5143 = vrsqrt.f32 %v1914_v13  ;;  %vm1944_vm13 = vmor %vm1942_vm12, %vm1943_vm11  ;;  %vm1952_vm15 = vweird.f32 %v1914_v13 }
 0x709   : > { %v1938_v4 = vmul.f32 %v5142_v9, %v1937_v15  ;;  %v2022_v15 = vperm.slane %v2018_v60, 2 }
 0x70b   : > { %v1939_v32 = vmul.f32 0.5, %v1938_v4  ;;  %v1905_v34 = vpop.xlane.xlu2 %1904 }
 0x70c   : > { %v1910_v25 = vmul.f32 %v1905_v34, %v5678_v11 }
 0x70d   : > { %v1940_v6 = vsub.f32 1.5, %v1939_v32 }
 0x70e   : > { %v5144_v49 = vpop.eup %5143  ;;  %v1915_v21 = vadd.f32 1e-05, %v1910_v25 }
 0x70f   : > { %v1941_v22 = vmul.f32 %v5142_v9, %v1940_v6  ;;  %v1947_v53 = vmul.f32 %v5144_v49, %v1914_v13  ;;  %vm1953_vm14 = vweird.f32 %v5144_v49 }
 0x710   : > { %5145 = vrsqrt.f32 %v1915_v21  ;;  %vm1954_vm5 = vmor %vm1952_vm15, %vm1953_vm14  ;;  %vm1962_vm7 = vweird.f32 %v1915_v21 }
 0x711   : > { %v1948_v46 = vmul.f32 %v5144_v49, %v1947_v53  ;;  %v1945_v29 = vsel %vm1944_vm13, %v5142_v9, %v1941_v22 }
 0x712   : > { %v1968_v44 = vmul.f32 %v1945_v29, %v6119_v23 }
 0x713   : > { %v1949_v31 = vmul.f32 0.5, %v1948_v46 }
 0x714   : > { %v1974_v10 = vmul.f32 %v6139_v51, %v1968_v44 }
 0x715   : > { %v1950_v27 = vsub.f32 1.5, %v1949_v31 }
 0x716   : > { %v5146_v16 = vpop.eup %5145  ;;  %v1980_v36 = vadd.f32 %v5040_v56, %v1974_v10 }
 0x717   : > { %v1951_v17 = vmul.f32 %v5144_v49, %v1950_v27  ;;  %v1957_v45 = vmul.f32 %v5146_v16, %v1915_v21  ;;  %vm1963_vm6 = vweird.f32 %v5146_v16 }
 0x718   : > { %vm1964_vm8 = vmor %vm1962_vm7, %vm1963_vm6 }
 0x719   : > { %v1955_v62 = vsel %vm1954_vm5, %v5144_v49, %v1951_v17  ;;  %v1958_v47 = vmul.f32 %v5146_v16, %v1957_v45 }
 0x71a   : > { %v1969_v18 = vmul.f32 %v1955_v62, %v6124_v57 }
 0x71b   : > { %v1959_v7 = vmul.f32 0.5, %v1958_v47 }
 0x71c   : > { %v1975_v24 = vmul.f32 %v6139_v51, %v1969_v18 }
 0x71d   : > { %v1960_v35 = vsub.f32 1.5, %v1959_v7 }
 0x71e   : > { %v1981_v1 = vadd.f32 %v5040_v56, %v1975_v24 }
 0x71f   : > { %v1961_v63 = vmul.f32 %v5146_v16, %v1960_v35 }
 0x720   : > { %v1984_v23 = vpack.c.bf16 %v1981_v1, %v1980_v36 }
 0x721   : > { %v1965_v37 = vsel %vm1964_vm8, %v5146_v16, %v1961_v63 }
 0x722   : > { %2167 = vmatmul.bf16.gmra.mxu3 %v1984_v23  ;;  %2190 = vmatmul.bf16.gmra.mxu0 %v1984_v23  ;;  %v1970_v38 = vmul.f32 %v1965_v37, %v6129_v20 }
 0x723   : > { %2213 = vmatmul.bf16.gmra.mxu1 %v1984_v23 }
 0x724   : > { %v1976_v57 = vmul.f32 %v6139_v51, %v1970_v38 }
 0x726   : > { %v1982_v19 = vadd.f32 %v5040_v56, %v1976_v57 }
 0x728   : > { %v1985_v33 = vpack.c.bf16 %v1982_v19, %v1982_v19 }
 0x732   : > { %2172 = vmatmul.bf16.gmra.mxu3 %v1985_v33  ;;  %2195 = vmatmul.bf16.gmra.mxu0 %v1985_v33 }
 0x733   : > { %2218 = vmatmul.bf16.gmra.mxu1 %v1985_v33 }
 0x750   : > { %v2186_v26 = vpop.f32.mrf.mxu0 }
 0x751   : > { %v2187_v41 = vadd.f32 %v2186_v26, %v2021_v0  ;;  %v2209_v50 = vpop.f32.mrf.mxu1 }
 0x752   : > { %v2210_v24 = vadd.f32 %v2209_v50, %v2022_v15 }
 0x753   : > { %v2228_v40 = vpack.c.bf16 %v2187_v41, %v2187_v41 }
 0x754   : > { %v2233_v26 = vpack.c.bf16 %v2210_v24, %v2210_v24  ;;  %v6240_v24 = vld [vmem:[#allocation2 + $0x38] sm:$0xff] }
 0x755   : > { %v2256_v12 = vunpack.c.l.b16 %v2228_v40 }
 0x756   : > { %v2163_v51 = vpop.f32.mrf.mxu3 }
 0x757   : > { %v2164_v44 = vadd.f32 %v2163_v51, %v6163_v61 }
 0x758   : > { %v2188_v42 = vpop.f32.mrf.mxu0 }
 0x759   : > { %v2189_v43 = vadd.f32 %v2188_v42, %v2021_v0  ;;  %v2211_v52 = vpop.f32.mrf.mxu1  ;;  %v2223_v37 = vpack.c.bf16 %v2164_v44, %v2164_v44 }
 0x75a   : > { %v2212_v45 = vadd.f32 %v2211_v52, %v2022_v15 }
 0x75b   : > { %v2229_v48 = vpack.c.bf16 %v2189_v43, %v2189_v43  ;;  %v2243_v42 = vunpack.c.l.b16 %v2223_v37 }
 0x75c   : > { %v2234_v38 = vpack.c.bf16 %v2212_v45, %v2212_v45 }
 0x75d   : > { %v2257_v20 = vunpack.c.l.b16 %v2229_v48 }
 0x75e   : > { %v2165_v14 = vpop.f32.mrf.mxu3  ;;  %v2384_v40 = vunpack.c.l.b16 %v2234_v38 }
 0x75f   : > { %v6159_v5 = vpack.c.b16 %v2257_v20, %v2256_v12  ;;  %v2166_v53 = vadd.f32 %v2165_v14, %v6163_v61  ;;  %v2383_v12 = vunpack.c.l.b16 %v2233_v26 }
 0x761   : > { %2434 = vrot.lane.b32.xlu2 %v6159_v5, %s5504_s17  ;;  %v2224_v35 = vpack.c.bf16 %v2166_v53, %v2166_v53  ;;  %v6187_v50 = vpack.c.b16 %v2384_v40, %v2383_v12 }
 0x79f   : > { %v2191_v54 = vpop.f32.mrf.mxu0 }
 0x7a0   : > { %v2214_v28 = vpop.f32.mrf.mxu1  ;;  %v2192_v56 = vadd.f32 %v2191_v54, %v2021_v0  ;;  %v2274_v54 = vsel %vm1021_vm0, %v6159_v5, 0 }
 0x7a1   : > { %v2215_v29 = vadd.f32 %v2214_v28, %v2022_v15 }
 0x7a2   : > { %v2230_v30 = vpack.c.bf16 %v2192_v56, %v2192_v56 }
 0x7a3   : > { %v2235_v36 = vpack.c.bf16 %v2215_v29, %v2215_v29 }
 0x7a4   : > { %v2258_v2 = vunpack.c.l.b16 %v2230_v30 }
 0x7a5   : > { %v2168_v59 = vpop.f32.mrf.mxu3  ;;  %v2385_v41 = vunpack.c.l.b16 %v2235_v36 }
 0x7a6   : > { %v2169_v58 = vadd.f32 %v2168_v59, %v6163_v61 }
 0x7a7   : > { %v2193_v8 = vpop.f32.mrf.mxu0 }
 0x7a8   : > { %v2194_v39 = vadd.f32 %v2193_v8, %v2021_v0  ;;  %v2216_v55 = vpop.f32.mrf.mxu1  ;;  %v2225_v4 = vpack.c.bf16 %v2169_v58, %v2169_v58 }
 0x7a9   : > { %v2217_v6 = vadd.f32 %v2216_v55, %v2022_v15 }
 0x7aa   : > { %v2231_v3 = vpack.c.bf16 %v2194_v39, %v2194_v39  ;;  %v2245_v31 = vunpack.c.l.b16 %v2225_v4 }
 0x7ab   : > { %v2236_v62 = vpack.c.bf16 %v2217_v6, %v2217_v6 }
 0x7ac   : > { %v2259_v9 = vunpack.c.l.b16 %v2231_v3 }
 0x7ad   : > { %v2170_v13 = vpop.f32.mrf.mxu3  ;;  %v2386_v57 = vunpack.c.l.b16 %v2236_v62 }
 0x7ae   : > { %v6166_v32 = vpack.c.b16 %v2259_v9, %v2258_v2  ;;  %v2171_v34 = vadd.f32 %v2170_v13, %v6163_v61 }
 0x7af   : > { %v2196_v25 = vpop.f32.mrf.mxu0  ;;  %v6182_v43 = vpack.c.b16 %v2386_v57, %v2385_v41  ;;  %v6250_v57 = vld [vmem:[#allocation2 + $0x40] sm:$0xff] }
 0x7b0   : > { %v2226_v49 = vpack.c.bf16 %v2171_v34, %v2171_v34  ;;  %v2197_v21 = vadd.f32 %v2196_v25, %v2021_v0  ;;  %v2219_v22 = vpop.f32.mrf.mxu1  ;;  %2436 = vrot.lane.b32.xlu1 %v6166_v32, %s5504_s17  ;;  %v2244_v0 = vunpack.c.l.b16 %v2224_v35  ;;  %v2277_v51 = vsel %vm1021_vm0, %v6166_v32, 0 }
 0x7b1   : > { %v2220_v46 = vadd.f32 %v2219_v22, %v2022_v15  ;;  %v6229_v22 = vld [vmem:[#allocation2 + $0x28] sm:$0xff] }
 0x7b2   : > { %v2246_v27 = vunpack.c.l.b16 %v2226_v49  ;;  %v2232_v16 = vpack.c.bf16 %v2197_v21, %v2197_v21  ;;  %v2248_v20 = vpack.c.b16 %v2244_v0, %v2243_v42  ;;  %v6258_v42 = vld [vmem:[#allocation2 + $0x48] sm:$0xff] }
 0x7b3   : > { %v2237_v17 = vpack.c.bf16 %v2220_v46, %v2220_v46 }
 0x7b4   : > { %v2249_v47 = vpack.c.b16 %v2246_v27, %v2245_v31  ;;  %v2260_v18 = vunpack.c.l.b16 %v2232_v16 }
 0x7b5   : > { %v2387_v10 = vunpack.c.l.b16 %v2237_v17  ;;  %v2173_v7 = vpop.f32.mrf.mxu3  ;;  %v6236_v17 = vld [vmem:[#allocation2 + $0x30] sm:$0xff] }
 0x7b6   : > { %v2263_v1 = vpack.c.b16 %v2260_v18, %v2260_v18  ;;  %2430 = vrot.lane.b32.xlu2 %v2249_v47, %s5504_s17  ;;  %v2174_v52 = vadd.f32 %v2173_v7, %v6163_v61 }
 0x7b7   : > { %v6174_v63 = vpack.c.b16 %v2387_v10, %v2387_v10  ;;  %v2198_v23 = vpop.f32.mrf.mxu0 }
 0x7b8   : > { %v2221_v19 = vpop.f32.mrf.mxu1  ;;  %2605 = vrot.lane.b32.xlu1 %v6166_v32, %s5505_s7  ;;  %2438 = vrot.lane.b32.xlu0 %v2263_v1, %s5504_s17  ;;  %v2280_v33 = vsel %vm1021_vm0, %v2263_v1, 0  ;;  %v2227_v14 = vpack.c.bf16 %v2174_v52, %v2174_v52 }
 0x7b9   : > { %2287 = vmatpush.bf16.xpose.msrb.mxu2 %v2280_v33  ;;  %v2403_v60 = vsel %vm1161_vm1, %v6174_v63, 0 }
 0x7ba   : > { %2410 = vmatpush.bf16.msra.mxu3 %v2403_v60  ;;  %v2247_v28 = vunpack.c.l.b16 %v2227_v14 }
 0x7bb   : > { %v2435_v61 = vpop.permute.xlu2 %2434 }
 0x7bc   : > { %v2250_v56 = vpack.c.b16 %v2247_v28, %v2247_v28  ;;  %v2450_v3 = vsel %vm1021_vm0, %v2435_v61, 0 }
 0x7bd   : > { %v2175_v48 = vpop.f32.mrf.mxu3 }
 0x7be   : > { %2411 = vmatpush.bf16.msra.mxu3 %v6182_v43  ;;  %2603 = vrot.lane.b32.xlu2 %v6159_v5, %s5505_s7 }
 0x7c0   : > { %2772 = vrot.lane.b32.xlu1 %v6159_v5, %s5506_s15  ;;  %2428 = vrot.lane.b32.xlu0 %v2248_v20, %s5504_s17 }
 0x7c1   : > { %2288 = vmatpush.bf16.xpose.msrb.mxu2 %v2277_v51 }
 0x7c2   : > { %2412 = vmatpush.bf16.msra.mxu3 %v6187_v50 }
 0x7c6   : > { %2597 = vrot.lane.b32.xlu2 %v2248_v20, %s5505_s7 }
 0x7c8   : > { %2768 = vrot.lane.b32.xlu1 %v2249_v47, %s5506_s15  ;;  %2607 = vrot.lane.b32.xlu0 %v2263_v1, %s5505_s7 }
 0x7c9   : > { %2289 = vmatpush.bf16.xpose.msrb.mxu2 %v2274_v54 }
 0x7ce   : > { %2599 = vrot.lane.b32.xlu2 %v2249_v47, %s5505_s7 }
 0x7d0   : > { %2776 = vrot.lane.b32.xlu0 %v2263_v1, %s5506_s15  ;;  %4455 = vmatmul.msk.bf16.vlgmr.msrb.gmra.mxu2 %vm1021_vm0, %v2248_v20 }
 0x7d1   : > { %2432 = vrot.lane.b32.xlu1 %v2250_v56, %s5504_s17 }
 0x7d6   : > { %2770 = vrot.lane.b32.xlu2 %v2250_v56, %s5506_s15 }
 0x7d8   : > { %2774 = vrot.lane.b32.xlu0 %v6166_v32, %s5506_s15 }
 0x7d9   : > { %2556 = vrot.lane.b32.xlu1 %v6182_v43, %s5504_s17 }
 0x7de   : > { %2554 = vrot.lane.b32.xlu2 %v6187_v50, %s5504_s17 }
 0x7e0   : > { %2766 = vrot.lane.b32.xlu0 %v2248_v20, %s5506_s15  ;;  %4456 = vmatmul.msk.bf16.gmra.mxu2 %vm1021_vm0, %v2249_v47 }
 0x7e8   : > { %2601 = vrot.lane.b32.xlu0 %v2250_v56, %s5505_s7 }
 0x7f0   : > { %2558 = vrot.lane.b32.xlu0 %v6174_v63, %s5504_s17  ;;  %4457 = vmatmul.msk.bf16.gmra.mxu2 %vm1021_vm0, %v2250_v56 }
 0x7f8   : > { %2727 = vrot.lane.b32.xlu0 %v6174_v63, %s5505_s7 }
 0x810   : > { %v2431_v55 = vpop.permute.xlu2 %2430 }
 0x818   : > { %v2604_v15 = vpop.permute.xlu2 %2603 }
 0x819   : > { %v2619_v6 = vsel %vm1021_vm0, %v2604_v15, 0 }
 0x820   : > { %v2598_v21 = vpop.permute.xlu2 %2597 }
 0x822   : > { %v2437_v8 = vpop.permute.xlu1 %2436 }
 0x823   : > { %v2453_v39 = vsel %vm1021_vm0, %v2437_v8, 0 }
 0x828   : > { %v2600_v44 = vpop.permute.xlu2 %2599 }
 0x82a   : > { %v2439_v5 = vpop.permute.xlu0 %2438  ;;  %v2606_v9 = vpop.permute.xlu1 %2605 }
 0x82b   : > { %v2456_v59 = vsel %vm1021_vm0, %v2439_v5, 0  ;;  %v2622_v4 = vsel %vm1021_vm0, %v2606_v9, 0 }
 0x82c   : > { %2463 = vmatpush.bf16.xpose.msra.mxu0 %v2456_v59 }
 0x830   : > { %v2771_v7 = vpop.permute.xlu2 %2770 }
 0x832   : > { %v2429_v30 = vpop.permute.xlu0 %2428  ;;  %v2773_v34 = vpop.permute.xlu1 %2772 }
 0x833   : > { %v2788_v46 = vsel %vm1021_vm0, %v2773_v34, 0 }
 0x834   : > { %2464 = vmatpush.bf16.xpose.msra.mxu0 %v2453_v39 }
 0x838   : > { %v2555_v33 = vpop.permute.xlu2 %2554 }
 0x83a   : > { %v2608_v58 = vpop.permute.xlu0 %2607  ;;  %v2769_v29 = vpop.permute.xlu1 %2768 }
 0x83b   : > { %v2625_v2 = vsel %vm1021_vm0, %v2608_v58, 0 }
 0x83c   : > { %2465 = vmatpush.bf16.xpose.msra.mxu0 %v2450_v3  ;;  %2632 = vmatpush.bf16.xpose.msra.mxu2 %v2625_v2 }
 0x842   : > { %v2777_v13 = vpop.permute.xlu0 %2776 }
 0x843   : > { %v2794_v32 = vsel %vm1021_vm0, %v2777_v13, 0  ;;  %4461 = vmatmul.msk.bf16.vlgmr.msra.gmra.mxu0 %vm1021_vm0, %v2429_v30  ;;  %v2433_v18 = vpop.permute.xlu1 %2432 }
 0x844   : > { %2633 = vmatpush.bf16.xpose.msra.mxu2 %v2622_v4  ;;  %2801 = vmatpush.bf16.xpose.msrb.mxu0 %v2794_v32 }
 0x84a   : > { %v2775_v25 = vpop.permute.xlu0 %2774 }
 0x84b   : > { %v2791_v49 = vsel %vm1021_vm0, %v2775_v25, 0  ;;  %v2557_v38 = vpop.permute.xlu1 %2556 }
 0x84c   : > { %2634 = vmatpush.bf16.xpose.msra.mxu2 %v2619_v6  ;;  %2802 = vmatpush.bf16.xpose.msrb.mxu0 %v2791_v49 }
 0x852   : > { %v2767_v53 = vpop.permute.xlu0 %2766 }
 0x853   : > { %v2291_v31 = vpop.f32.mrf.mxu2  ;;  %4462 = vmatmul.msk.bf16.gmra.mxu0 %vm1021_vm0, %v2431_v55  ;;  %4467 = vmatmul.msk.bf16.vlgmr.msra.gmra.mxu2 %vm1021_vm0, %v2598_v21 }
 0x854   : > { %v2292_v27 = vadd.f32 %v2291_v31, %v6229_v22  ;;  %2803 = vmatpush.bf16.xpose.msrb.mxu0 %v2788_v46 }
 0x856   : > { %v2305_v16 = vsel %vm1063_vm2, %v2292_v27, -inf }
 0x857   : > { %2306 = vmax.xlane.f32.xlu1 %v2305_v16 }
 0x85a   : > { %v2602_v45 = vpop.permute.xlu0 %2601 }
 0x85b   : > { %v2293_v62 = vpop.f32.mrf.mxu2 }
 0x85c   : > { %v2294_v47 = vadd.f32 %v2293_v62, %v6236_v17 }
 0x85e   : > { %v2308_v10 = vsel %vm1063_vm2, %v2294_v47, -inf }
 0x85f   : > { %2309 = vmax.xlane.f32.xlu0 %v2308_v10 }
 0x862   : > { %v2559_v35 = vpop.permute.xlu0 %2558 }
 0x863   : > { %v2572_v36 = vsel %vm1161_vm1, %v2559_v35, 0  ;;  %v2296_v1 = vpop.f32.mrf.mxu2  ;;  %4463 = vmatmul.msk.bf16.gmra.mxu0 %vm1021_vm0, %v2433_v18  ;;  %4468 = vmatmul.msk.bf16.gmra.mxu2 %vm1021_vm0, %v2600_v44 }
 0x864   : > { %v6246_v23 = vadd.f32 %v2296_v1, %v6240_v24  ;;  %2579 = vmatpush.bf16.msra.mxu1 %v2572_v36 }
 0x866   : > { %v2311_v37 = vsel %vm1063_vm2, %v6246_v23, -inf }
 0x867   : > { %2312 = vmax.xlane.f32.xlu2 %v2311_v37 }
 0x868   : > { %2580 = vmatpush.bf16.msra.mxu1 %v2557_v38 }
 0x86a   : > { %v2728_v19 = vpop.permute.xlu0 %2727 }
 0x86b   : > { %v2741_v60 = vsel %vm1161_vm1, %v2728_v19, 0  ;;  %v2298_v26 = vpop.f32.mrf.mxu2 }
 0x86c   : > { %v6254_v0 = vadd.f32 %v2298_v26, %v6250_v57  ;;  %2581 = vmatpush.bf16.msra.mxu1 %v2555_v33  ;;  %2748 = vmatpush.bf16.msrb.mxu3 %v2741_v60 }
 0x86e   : > { %v2314_v41 = vsel %vm1063_vm2, %v6254_v0, -inf }
 0x86f   : > { %2315 = vmax.xlane.f32.xlu0 %v2314_v41 }
 0x873   : > { %v2301_v40 = vpop.f32.mrf.mxu2  ;;  %4469 = vmatmul.msk.bf16.gmra.mxu2 %vm1021_vm0, %v2602_v45  ;;  %4473 = vmatmul.msk.bf16.vlgmr.msrb.gmra.mxu0 %vm1021_vm0, %v2767_v53 }
 0x874   : > { %v2302_v48 = vadd.f32 %v2301_v40, %v6258_v42 }
 0x876   : > { %v2317_v12 = vsel %vm1063_vm2, %v2302_v48, -inf }
 0x877   : > { %2318 = vmax.xlane.f32.xlu0 %v2317_v12 }
 0x87b   : > { %v2303_v20 = vpop.f32.mrf.mxu2 }
 0x883   : > { %4474 = vmatmul.msk.bf16.gmra.mxu0 %vm1021_vm0, %v2769_v29 }
 0x893   : > { %4475 = vmatmul.msk.bf16.gmra.mxu0 %vm1021_vm0, %v2771_v7 }
 0x8c0   : > { %v2467_v51 = vpop.f32.mrf.mxu0 }
 0x8c1   : > { %v6267_v52 = vadd.f32 %v2467_v51, %v6229_v22 }
 0x8c3   : > { %v2481_v14 = vsel %vm1063_vm2, %v6267_v52, -inf }
 0x8c4   : > { %2482 = vmax.xlane.f32.xlu2 %v2481_v14 }
 0x8c8   : > { %v2469_v54 = vpop.f32.mrf.mxu0 }
 0x8c9   : > { %v6272_v28 = vadd.f32 %v2469_v54, %v6236_v17 }
 0x8ca   : > { %v2307_v56 = vpop.xlane.xlu1 %2306 }
 0x8cb   : > { %v2320_v5 = vsub.f32 %v2292_v27, %v2307_v56  ;;  %v2484_v59 = vsel %vm1063_vm2, %v6272_v28, -inf }
 0x8cc   : > { %2485 = vmax.xlane.f32.xlu1 %v2484_v59 }
 0x8cd   : > { %v2325_v8 = vmul.f32 1.442695, %v2320_v5 }
 0x8cf   : > { %5147 = vpow2.f32 %v2325_v8 }
 0x8d0   : > { %v2472_v61 = vpop.f32.mrf.mxu0 }
 0x8d1   : > { %v6277_v30 = vadd.f32 %v2472_v61, %v6240_v24 }
 0x8d2   : > { %v2310_v55 = vpop.xlane.xlu0 %2309 }
 0x8d3   : > { %v2487_v39 = vsel %vm1063_vm2, %v6277_v30, -inf  ;;  %v2321_v9 = vsub.f32 %v2294_v47, %v2310_v55 }
 0x8d4   : > { %2488 = vmax.xlane.f32.xlu1 %v2487_v39 }
 0x8d5   : > { %v6284_v2 = vpop.eup %5147  ;;  %v2327_v32 = vmul.f32 1.442695, %v2321_v9 }
 0x8d6   : > { %v2636_v58 = vpop.f32.mrf.mxu2  ;;  %v2335_v4 = vsel %vm1063_vm2, %v6284_v2, 0.0 }
 0x8d7   : > { %v6282_v3 = vadd.f32 %v2636_v58, %v6229_v22  ;;  %5149 = vpow2.f32 %v2327_v32 }
 0x8d8   : > { %v2474_v13 = vpop.f32.mrf.mxu0 }
 0x8d9   : > { %v2650_v15 = vsel %vm1063_vm2, %v6282_v3, -inf  ;;  %v6291_v34 = vadd.f32 %v2474_v13, %v6250_v57 }
 0x8da   : > { %2651 = vmax.xlane.f32.xlu2 %v2650_v15  ;;  %v2313_v29 = vpop.xlane.xlu2 %2312 }
 0x8db   : > { %v2490_v53 = vsel %vm1063_vm2, %v6291_v34, -inf  ;;  %v2322_v16 = vsub.f32 %v6246_v23, %v2313_v29 }
 0x8dc   : > { %2336 = vadd.xlane.f32.xlu1 %v2335_v4 }
 0x8dd   : > { %v6300_v31 = vpop.eup %5149  ;;  %v2329_v7 = vmul.f32 1.442695, %v2322_v16 }
 0x8de   : > { %v2638_v25 = vpop.f32.mrf.mxu2  ;;  %v2338_v47 = vsel %vm1063_vm2, %v6300_v31, 0.0 }
 0x8df   : > { %v6294_v6 = vadd.f32 %v2638_v25, %v6236_v17  ;;  %5151 = vpow2.f32 %v2329_v7 }
 0x8e0   : > { %v2477_v49 = vpop.f32.mrf.mxu0 }
 0x8e1   : > { %v2653_v21 = vsel %vm1063_vm2, %v6294_v6, -inf  ;;  %v6312_v1 = vadd.f32 %v2477_v49, %v6258_v42 }
 0x8e2   : > { %v2316_v46 = vpop.xlane.xlu0 %2315  ;;  %2654 = vmax.xlane.f32.xlu0 %v2653_v21  ;;  %2491 = vmax.xlane.f32.xlu2 %v2490_v53 }
 0x8e3   : > { %v2323_v45 = vsub.f32 %v6254_v0, %v2316_v46  ;;  %v2493_v26 = vsel %vm1063_vm2, %v6312_v1, -inf }
 0x8e5   : > { %v2331_v36 = vmul.f32 1.442695, %v2323_v45  ;;  %v6326_v41 = vpop.eup %5151 }
 0x8e6   : > { %v2641_v27 = vpop.f32.mrf.mxu2  ;;  %v2341_v51 = vsel %vm1063_vm2, %v6326_v41, 0.0 }
 0x8e7   : > { %v6304_v44 = vadd.f32 %v2641_v27, %v6240_v24  ;;  %5153 = vpow2.f32 %v2331_v36 }
 0x8e8   : > { %v2479_v62 = vpop.f32.mrf.mxu0 }
 0x8e9   : > { %v2656_v18 = vsel %vm1063_vm2, %v6304_v44, -inf }
 0x8ea   : > { %v2319_v10 = vpop.xlane.xlu0 %2318  ;;  %2339 = vadd.xlane.f32.xlu2 %v2338_v47  ;;  %2657 = vmax.xlane.f32.xlu1 %v2656_v18 }
 0x8eb   : > { %v2324_v35 = vsub.f32 %v2302_v48, %v2319_v10 }
 0x8ed   : > { %v2333_v23 = vmul.f32 1.442695, %v2324_v35  ;;  %v6328_v40 = vpop.eup %5153 }
 0x8ee   : > { %v2643_v37 = vpop.f32.mrf.mxu2  ;;  %v2344_v20 = vsel %vm1063_vm2, %v6328_v40, 0.0 }
 0x8ef   : > { %v6315_v38 = vadd.f32 %v2643_v37, %v6250_v57  ;;  %5155 = vpow2.f32 %v2333_v23 }
 0x8f0   : > { %v2805_v19 = vpop.f32.mrf.mxu0 }
 0x8f1   : > { %v6318_v33 = vadd.f32 %v2805_v19, %v6229_v22  ;;  %v2659_v60 = vsel %vm1063_vm2, %v6315_v38, -inf }
 0x8f2   : > { %2660 = vmax.xlane.f32.xlu2 %v2659_v60  ;;  %2494 = vmax.xlane.f32.xlu1 %v2493_v26 }
 0x8f3   : > { %v2819_v0 = vsel %vm1063_vm2, %v6318_v33, -inf }
 0x8f4   : > { %2820 = vmax.xlane.f32.xlu0 %v2819_v0 }
 0x8f5   : > { %v6330_v22 = vpop.eup %5155 }
 0x8f6   : > { %v2646_v48 = vpop.f32.mrf.mxu2  ;;  %v2347_v14 = vsel %vm1063_vm2, %v6330_v22, 0.0 }
 0x8f7   : > { %v6339_v54 = vadd.f32 %v2646_v48, %v6258_v42 }
 0x8f8   : > { %v2807_v12 = vpop.f32.mrf.mxu0 }
 0x8f9   : > { %v2662_v8 = vsel %vm1063_vm2, %v6339_v54, -inf  ;;  %v6349_v39 = vadd.f32 %v2807_v12, %v6236_v17 }
 0x8fa   : > { %2345 = vadd.xlane.f32.xlu2 %v2344_v20  ;;  %2342 = vadd.xlane.f32.xlu1 %v2341_v51 }
 0x8fb   : > { %v2822_v9 = vsel %vm1063_vm2, %v6349_v39, -inf }
 0x8fc   : > { %2348 = vadd.xlane.f32.xlu0 %v2347_v14 }
 0x8fe   : > { %v2648_v56 = vpop.f32.mrf.mxu2 }
 0x900   : > { %v2810_v5 = vpop.f32.mrf.mxu0 }
 0x901   : > { %v6342_v59 = vadd.f32 %v2810_v5, %v6240_v24 }
 0x902   : > { %2663 = vmax.xlane.f32.xlu1 %v2662_v8 }
 0x903   : > { %v2825_v61 = vsel %vm1063_vm2, %v6342_v59, -inf }
 0x904   : > { %2826 = vmax.xlane.f32.xlu2 %v2825_v61 }
 0x908   : > { %v2812_v55 = vpop.f32.mrf.mxu0 }
 0x909   : > { %v6352_v58 = vadd.f32 %v2812_v55, %v6250_v57 }
 0x90a   : > { %2823 = vmax.xlane.f32.xlu1 %v2822_v9 }
 0x90b   : > { %v2828_v24 = vsel %vm1063_vm2, %v6352_v58, -inf }
 0x90c   : > { %2829 = vmax.xlane.f32.xlu0 %v2828_v24 }
 0x910   : > { %v2815_v13 = vpop.f32.mrf.mxu0 }
 0x911   : > { %v6391_v56 = vadd.f32 %v2815_v13, %v6258_v42 }
 0x918   : > { %v2817_v15 = vpop.f32.mrf.mxu0 }
 0x937   : > { %v2483_v4 = vpop.xlane.xlu2 %2482 }
 0x938   : > { %v2496_v32 = vsub.f32 %v6267_v52, %v2483_v4 }
 0x93a   : > { %v2501_v25 = vmul.f32 1.442695, %v2496_v32 }
 0x93c   : > { %5157 = vpow2.f32 %v2501_v25 }
 0x93f   : > { %v2486_v17 = vpop.xlane.xlu1 %2485 }
 0x940   : > { %v2497_v49 = vsub.f32 %v6272_v28, %v2486_v17  ;;  %v2831_v17 = vsel %vm1063_vm2, %v6391_v56, -inf }
 0x942   : > { %v6360_v57 = vpop.eup %5157  ;;  %v2503_v21 = vmul.f32 1.442695, %v2497_v49 }
 0x943   : > { %v2511_v53 = vsel %vm1063_vm2, %v6360_v57, 0.0 }
 0x944   : > { %5159 = vpow2.f32 %v2503_v21  ;;  %2512 = vadd.xlane.f32.xlu2 %v2511_v53 }
 0x947   : > { %v2489_v46 = vpop.xlane.xlu1 %2488 }
 0x948   : > { %v2498_v28 = vsub.f32 %v6277_v30, %v2489_v46 }
 0x94a   : > { %v6364_v29 = vpop.eup %5159  ;;  %v2505_v47 = vmul.f32 1.442695, %v2498_v28 }
 0x94b   : > { %v2514_v27 = vsel %vm1063_vm2, %v6364_v29, 0.0 }
 0x94c   : > { %2515 = vadd.xlane.f32.xlu0 %v2514_v27 }
 0x94d   : > { %v2652_v52 = vpop.xlane.xlu2 %2651 }
 0x94e   : > { %v2665_v16 = vsub.f32 %v6282_v3, %v2652_v52 }
 0x94f   : > { %v2337_v62 = vpop.xlane.xlu1 %2336 }
 0x950   : > { %v2670_v45 = vmul.f32 1.442695, %v2665_v16 }
 0x952   : > { %5161 = vpow2.f32 %v2670_v45 }
 0x953   : > { %5163 = vrcp.f32 %v2337_v62 }
 0x954   : > { %5165 = vpow2.f32 %v2505_v47 }
 0x955   : > { %v2655_v18 = vpop.xlane.xlu0 %2654  ;;  %v2492_v10 = vpop.xlane.xlu2 %2491 }
 0x956   : > { %v2666_v7 = vsub.f32 %v6294_v6, %v2655_v18  ;;  %v2499_v35 = vsub.f32 %v6291_v34, %v2492_v10 }
 0x958   : > { %v6372_v36 = vpop.eup %5161  ;;  %v2672_v23 = vmul.f32 1.442695, %v2666_v7  ;;  %v2507_v37 = vmul.f32 1.442695, %v2499_v35 }
 0x959   : > { %v2680_v3 = vsel %vm1063_vm2, %v6372_v36, 0.0  ;;  %v5164_v30 = vpop.eup %5163 }
 0x95a   : > { %5167 = vpow2.f32 %v2672_v23  ;;  %2681 = vadd.xlane.f32.xlu1 %v2680_v3  ;;  %v6378_v26 = vpop.eup %5165  ;;  %v2355_v6 = vmul.f32 %v5164_v30, %v2337_v62 }
 0x95b   : > { %5169 = vpow2.f32 %v2507_v37  ;;  %v2517_v12 = vsel %vm1063_vm2, %v6378_v26, 0.0 }
 0x95c   : > { %v2360_v51 = vsub.f32 2.0, %v2355_v6 }
 0x95d   : > { %v6376_v19 = vpop.xlane.xlu1 %2657  ;;  %v2340_v60 = vpop.xlane.xlu2 %2339 }
 0x95e   : > { %5171 = vrcp.f32 %v2340_v60  ;;  %v2365_v9 = vmul.f32 %v5164_v30, %v2360_v51 }
 0x960   : > { %v6380_v34 = vpop.eup %5167  ;;  %v2370_v42 = vmul.f32 %v6284_v2, %v2365_v9 }
 0x961   : > { %v6382_v0 = vpop.eup %5169  ;;  %v2683_v48 = vsel %vm1063_vm2, %v6380_v34, 0.0 }
 0x962   : > { %2684 = vadd.xlane.f32.xlu0 %v2683_v48  ;;  %2518 = vadd.xlane.f32.xlu1 %v2517_v12  ;;  %v2520_v20 = vsel %vm1063_vm2, %v6382_v0, 0.0  ;;  %v2667_v48 = vsub.f32 %v6304_v44, %v6376_v19 }
 0x963   : > { %2521 = vadd.xlane.f32.xlu2 %v2520_v20 }
 0x964   : > { %v5172_v14 = vpop.eup %5171  ;;  %v2674_v20 = vmul.f32 1.442695, %v2667_v48 }
 0x965   : > { %v2356_v5 = vmul.f32 %v5172_v14, %v2340_v60  ;;  %v2495_v8 = vpop.xlane.xlu1 %2494  ;;  %v2661_v61 = vpop.xlane.xlu2 %2660 }
 0x966   : > { %v2500_v55 = vsub.f32 %v6312_v1, %v2495_v8  ;;  %v2668_v51 = vsub.f32 %v6315_v38, %v2661_v61 }
 0x967   : > { %v2361_v24 = vsub.f32 2.0, %v2356_v5  ;;  %v2821_v15 = vpop.xlane.xlu0 %2820 }
 0x968   : > { %v2509_v4 = vmul.f32 1.442695, %v2500_v55  ;;  %v2834_v32 = vsub.f32 %v6318_v33, %v2821_v15 }
 0x969   : > { %v2366_v25 = vmul.f32 %v5172_v14, %v2361_v24  ;;  %v2676_v14 = vmul.f32 1.442695, %v2668_v51 }
 0x96a   : > { %5173 = vpow2.f32 %v2509_v4  ;;  %v2839_v49 = vmul.f32 1.442695, %v2834_v32  ;;  %2832 = vmax.xlane.f32.xlu1 %v2831_v17 }
 0x96b   : > { %v2371_v13 = vmul.f32 %v6300_v31, %v2366_v25 }
 0x96c   : > { %5175 = vpow2.f32 %v2839_v49 }
 0x96d   : > { %v2375_v21 = vpack.c.bf16 %v2371_v13, %v2370_v42  ;;  %v2343_v1 = vpop.xlane.xlu1 %2342  ;;  %v2346_v53 = vpop.xlane.xlu2 %2345 }
 0x96e   : > { %5177 = vrcp.f32 %v2343_v1 }
 0x96f   : > { %5179 = vrcp.f32 %v2346_v53  ;;  %4458 = vmatmul.msk.bf16.vlgmr.msra.gmra.mxu3 %vm1063_vm2, %v2375_v21  ;;  %v2349_v52 = vpop.xlane.xlu0 %2348 }
 0x970   : > { %v6400_v33 = vpop.eup %5173  ;;  %5181 = vrcp.f32 %v2349_v52 }
 0x971   : > { %v2523_v46 = vsel %vm1063_vm2, %v6400_v33, 0.0  ;;  %5183 = vpow2.f32 %v2674_v20 }
 0x972   : > { %v6404_v27 = vpop.eup %5175  ;;  %2524 = vadd.xlane.f32.xlu0 %v2523_v46  ;;  %5185 = vpow2.f32 %v2676_v14 }
 0x973   : > { %v2849_v2 = vsel %vm1063_vm2, %v6404_v27, 0.0 }
 0x974   : > { %v5178_v31 = vpop.eup %5177  ;;  %2850 = vadd.xlane.f32.xlu2 %v2849_v2 }
 0x975   : > { %v5180_v16 = vpop.eup %5179  ;;  %v2357_v28 = vmul.f32 %v5178_v31, %v2343_v1 }
 0x976   : > { %v2358_v45 = vmul.f32 %v5180_v16, %v2346_v53  ;;  %v5182_v7 = vpop.eup %5181 }
 0x977   : > { %v2362_v62 = vsub.f32 2.0, %v2357_v28  ;;  %v2359_v37 = vmul.f32 %v5182_v7, %v2349_v52  ;;  %v6427_v9 = vpop.eup %5183  ;;  %v6429_v19 = vpop.xlane.xlu2 %2826 }
 0x978   : > { %v2363_v47 = vsub.f32 2.0, %v2358_v45  ;;  %v2686_v38 = vsel %vm1063_vm2, %v6427_v9, 0.0 }
 0x979   : > { %v2367_v18 = vmul.f32 %v5178_v31, %v2362_v62  ;;  %v2364_v30 = vsub.f32 2.0, %v2359_v37 }
 0x97a   : > { %v2368_v10 = vmul.f32 %v5180_v16, %v2363_v47 }
 0x97b   : > { %v2372_v35 = vmul.f32 %v6326_v41, %v2367_v18  ;;  %v2369_v60 = vmul.f32 %v5182_v7, %v2364_v30 }
 0x97c   : > { %v2373_v23 = vmul.f32 %v6328_v40, %v2368_v10  ;;  %v2664_v40 = vpop.xlane.xlu1 %2663 }
 0x97d   : > { %v2374_v6 = vmul.f32 %v6330_v22, %v2369_v60  ;;  %v2669_v55 = vsub.f32 %v6339_v54, %v2664_v40 }
 0x97e   : > { %v2376_v3 = vpack.c.bf16 %v2373_v23, %v2372_v35 }
 0x97f   : > { %v2377_v41 = vpack.c.bf16 %v2374_v6, %v2374_v6  ;;  %v2830_v22 = vpop.xlane.xlu0 %2829  ;;  %v2678_v44 = vmul.f32 1.442695, %v2669_v55 }
 0x980   : > { %4459 = vmatmul.msk.bf16.gmra.mxu3 %vm1063_vm2, %v2376_v3  ;;  %v2837_v5 = vsub.f32 %v6352_v58, %v2830_v22 }
 0x983   : > { %2723 = vrot.lane.b32.xlu1 %v6187_v50, %s5505_s7 }
 0x984   : > { %v2824_v12 = vpop.xlane.xlu1 %2823 }
 0x986   : > { %2896 = vrot.lane.b32.xlu0 %v6174_v63, %s5506_s15  ;;  %v2835_v63 = vsub.f32 %v6349_v39, %v2824_v12  ;;  %v6433_v39 = vpop.eup %5185  ;;  %v2836_v12 = vsub.f32 %v6342_v59, %v6429_v19 }
 0x987   : > { %v2689_v24 = vsel %vm1063_vm2, %v6433_v39, 0.0 }
 0x988   : > { %v2841_v8 = vmul.f32 1.442695, %v2835_v63 }
 0x98a   : > { %5187 = vpow2.f32 %v2841_v8 }
 0x98b   : > { %2894 = vrot.lane.b32.xlu1 %v6182_v43, %s5506_s15 }
 0x98c   : > { %2725 = vrot.lane.b32.xlu2 %v6182_v43, %s5505_s7  ;;  %v2845_v43 = vmul.f32 1.442695, %v2837_v5 }
 0x98e   : > { %5189 = vpow2.f32 %v2845_v43 }
 0x98f   : > { %5191 = vpow2.f32 %v2678_v44 }
 0x990   : > { %4460 = vmatmul.msk.bf16.gmra.mxu3 %vm1063_vm2, %v2377_v41  ;;  %v6435_v61 = vpop.eup %5187 }
 0x991   : > { %v2852_v54 = vsel %vm1063_vm2, %v6435_v61, 0.0 }
 0x994   : > { %v6437_v58 = vpop.eup %5189 }
 0x995   : > { %v2858_v4 = vsel %vm1063_vm2, %v6437_v58, 0.0  ;;  %v6445_v32 = vpop.eup %5191 }
 0x996   : > { %v2692_v25 = vsel %vm1063_vm2, %v6445_v32, 0.0 }
 0x9b0   : > { %2687 = vadd.xlane.f32.xlu0 %v2686_v38 }
 0x9b5   : > { %2853 = vadd.xlane.f32.xlu1 %v2852_v54  ;;  %2690 = vadd.xlane.f32.xlu2 %v2689_v24 }
 0x9b7   : > { %v2513_v15 = vpop.xlane.xlu2 %2512 }
 0x9b8   : > { %5193 = vrcp.f32 %v2513_v15  ;;  %2859 = vadd.xlane.f32.xlu0 %v2858_v4 }
 0x9bd   : > { %2693 = vadd.xlane.f32.xlu2 %v2692_v25 }
 0x9be   : > { %v5194_v17 = vpop.eup %5193 }
 0x9bf   : > { %v2516_v49 = vpop.xlane.xlu0 %2515  ;;  %v2531_v42 = vmul.f32 %v5194_v17, %v2513_v15 }
 0x9c0   : > { %5195 = vrcp.f32 %v2516_v49 }
 0x9c1   : > { %v2536_v13 = vsub.f32 2.0, %v2531_v42 }
 0x9c3   : > { %v2541_v53 = vmul.f32 %v5194_v17, %v2536_v13 }
 0x9c5   : > { %v2546_v2 = vmul.f32 %v6360_v57, %v2541_v53 }
 0x9c6   : > { %v5196_v21 = vpop.eup %5195 }
 0x9c7   : > { %v2532_v1 = vmul.f32 %v5196_v21, %v2516_v49 }
 0x9c9   : > { %v2537_v46 = vsub.f32 2.0, %v2532_v1 }
 0x9cb   : > { %v2542_v52 = vmul.f32 %v5196_v21, %v2537_v46 }
 0x9cd   : > { %v2547_v31 = vmul.f32 %v6364_v29, %v2542_v52  ;;  %v2682_v16 = vpop.xlane.xlu1 %2681 }
 0x9ce   : > { %2892 = vrot.lane.b32.xlu1 %v6187_v50, %s5506_s15 }
 0x9cf   : > { %v2551_v28 = vpack.c.bf16 %v2547_v31, %v2546_v2 }
 0x9d1   : > { %4464 = vmatmul.msk.bf16.vlgmr.msra.gmra.mxu1 %vm1063_vm2, %v2551_v28 }
 0x9d5   : > { %v2519_v45 = vpop.xlane.xlu1 %2518  ;;  %v2685_v47 = vpop.xlane.xlu0 %2684 }
 0x9d6   : > { %v2522_v62 = vpop.xlane.xlu2 %2521  ;;  %5197 = vrcp.f32 %v2519_v45 }
 0x9d7   : > { %5199 = vrcp.f32 %v2522_v62 }
 0x9d8   : > { %5201 = vrcp.f32 %v2685_v47 }
 0x9d9   : > { %5203 = vrcp.f32 %v2682_v16 }
 0x9dc   : > { %v5198_v18 = vpop.eup %5197 }
 0x9dd   : > { %v2833_v10 = vpop.xlane.xlu1 %2832  ;;  %v5200_v7 = vpop.eup %5199  ;;  %v2533_v35 = vmul.f32 %v5198_v18, %v2519_v45 }
 0x9de   : > { %v2838_v57 = vsub.f32 %v6391_v56, %v2833_v10  ;;  %v2534_v29 = vmul.f32 %v5200_v7, %v2522_v62  ;;  %v5202_v60 = vpop.eup %5201 }
 0x9df   : > { %v2538_v23 = vsub.f32 2.0, %v2533_v35  ;;  %v5204_v48 = vpop.eup %5203  ;;  %v2701_v56 = vmul.f32 %v5202_v60, %v2685_v47 }
 0x9e0   : > { %v2847_v37 = vmul.f32 1.442695, %v2838_v57  ;;  %v2539_v50 = vsub.f32 2.0, %v2534_v29  ;;  %v2700_v22 = vmul.f32 %v5204_v48, %v2682_v16 }
 0x9e1   : > { %v2543_v3 = vmul.f32 %v5198_v18, %v2538_v23 }
 0x9e2   : > { %5205 = vpow2.f32 %v2847_v37  ;;  %v2544_v30 = vmul.f32 %v5200_v7, %v2539_v50  ;;  %v2705_v8 = vsub.f32 2.0, %v2700_v22 }
 0x9e3   : > { %v2548_v6 = vmul.f32 %v6378_v26, %v2543_v3  ;;  %v2843_v26 = vmul.f32 1.442695, %v2836_v12 }
 0x9e4   : > { %v2549_v41 = vmul.f32 %v6382_v0, %v2544_v30  ;;  %v2706_v0 = vsub.f32 2.0, %v2701_v56  ;;  %v2710_v19 = vmul.f32 %v5204_v48, %v2705_v8 }
 0x9e5   : > { %v2525_v40 = vpop.xlane.xlu0 %2524 }
 0x9e6   : > { %5207 = vrcp.f32 %v2525_v40  ;;  %v2552_v20 = vpack.c.bf16 %v2549_v41, %v2548_v6  ;;  %v2711_v59 = vmul.f32 %v5202_v60, %v2706_v0  ;;  %v2715_v25 = vmul.f32 %v6372_v36, %v2710_v19 }
 0x9e7   : > { %v2851_v51 = vpop.xlane.xlu2 %2850  ;;  %5209 = vpow2.f32 %v2843_v26 }
 0x9e8   : > { %v6459_v63 = vpop.eup %5205  ;;  %4465 = vmatmul.msk.bf16.gmra.mxu1 %vm1063_vm2, %v2552_v20  ;;  %v2716_v24 = vmul.f32 %v6380_v34, %v2711_v59 }
 0x9e9   : > { %v2861_v14 = vsel %vm1063_vm2, %v6459_v63, 0.0 }
 0x9ea   : > { %2862 = vadd.xlane.f32.xlu0 %v2861_v14  ;;  %v2720_v42 = vpack.c.bf16 %v2716_v24, %v2715_v25 }
 0x9ec   : > { %v5208_v5 = vpop.eup %5207 }
 0x9ed   : > { %v2535_v43 = vmul.f32 %v5208_v5, %v2525_v40  ;;  %v6468_v4 = vpop.eup %5209 }
 0x9ee   : > { %v2855_v13 = vsel %vm1063_vm2, %v6468_v4, 0.0 }
 0x9ef   : > { %v2540_v55 = vsub.f32 2.0, %v2535_v43  ;;  %v2726_v44 = vpop.permute.xlu2 %2725 }
 0x9f0   : > { %2749 = vmatpush.bf16.msrb.mxu3 %v2726_v44 }
 0x9f1   : > { %v2545_v38 = vmul.f32 %v5208_v5, %v2540_v55 }
 0x9f2   : > { %v6464_v54 = vpop.f32.mrf.mxu3 }
 0x9f3   : > { %v2550_v15 = vmul.f32 %v6400_v33, %v2545_v38 }
 0x9f5   : > { %v2553_v17 = vpack.c.bf16 %v2550_v15, %v2550_v15  ;;  %v2724_v49 = vpop.permute.xlu1 %2723 }
 0x9f6   : > { %2750 = vmatpush.bf16.msrb.mxu3 %v2724_v49 }
 0x9f8   : > { %v2897_v21 = vpop.permute.xlu0 %2896  ;;  %2856 = vadd.xlane.f32.xlu1 %v2855_v13  ;;  %4466 = vmatmul.msk.bf16.gmra.mxu1 %vm1063_vm2, %v2553_v17 }
 0x9f9   : > { %v2910_v1 = vsel %vm1161_vm1, %v2897_v21, 0  ;;  %4470 = vmatmul.msk.bf16.vlgmr.msrb.gmra.mxu3 %vm1063_vm2, %v2720_v42 }
 0x9fa   : > { %v6476_v34 = vpop.f32.mrf.mxu3  ;;  %2917 = vmatpush.bf16.msrb.mxu1 %v2910_v1 }
 0x9fd   : > { %v2895_v33 = vpop.permute.xlu1 %2894 }
 0x9fe   : > { %2918 = vmatpush.bf16.msrb.mxu1 %v2895_v33 }
 0xa03   : > { %v6478_v36 = vpop.f32.mrf.mxu3 }
 0xa0b   : > { %v6480_v53 = vpop.f32.mrf.mxu3 }
 0xa13   : > { %v6482_v46 = vpop.f32.mrf.mxu3 }
 0xa1b   : > { %v2426_v52 = vpop.f32.mrf.mxu3 }
 0xa23   : > { %v2688_v2 = vpop.xlane.xlu0 %2687 }
 0xa24   : > { %5211 = vrcp.f32 %v2688_v2 }
 0xa28   : > { %v2854_v31 = vpop.xlane.xlu1 %2853  ;;  %v2691_v16 = vpop.xlane.xlu2 %2690 }
 0xa29   : > { %5213 = vrcp.f32 %v2854_v31 }
 0xa2a   : > { %v5212_v28 = vpop.eup %5211  ;;  %5215 = vrcp.f32 %v2691_v16 }
 0xa2b   : > { %5217 = vrcp.f32 %v2851_v51  ;;  %v2702_v45 = vmul.f32 %v5212_v28, %v2688_v2  ;;  %v2860_v59 = vpop.xlane.xlu0 %2859 }
 0xa2d   : > { %v2707_v47 = vsub.f32 2.0, %v2702_v45 }
 0xa2f   : > { %v5214_v62 = vpop.eup %5213  ;;  %v2712_v29 = vmul.f32 %v5212_v28, %v2707_v47 }
 0xa30   : > { %v5216_v18 = vpop.eup %5215  ;;  %v2694_v10 = vpop.xlane.xlu2 %2693  ;;  %v2870_v57 = vmul.f32 %v5214_v62, %v2854_v31 }
 0xa31   : > { %v5218_v7 = vpop.eup %5217  ;;  %v2703_v35 = vmul.f32 %v5216_v18, %v2691_v16  ;;  %5219 = vrcp.f32 %v2694_v10  ;;  %v2717_v60 = vmul.f32 %v6427_v9, %v2712_v29 }
 0xa32   : > { %v2869_v37 = vmul.f32 %v5218_v7, %v2851_v51  ;;  %v2875_v3 = vsub.f32 2.0, %v2870_v57  ;;  %5221 = vrcp.f32 %v2860_v59 }
 0xa33   : > { %v2708_v23 = vsub.f32 2.0, %v2703_v35 }
 0xa34   : > { %v2874_v41 = vsub.f32 2.0, %v2869_v37  ;;  %v2880_v12 = vmul.f32 %v5214_v62, %v2875_v3 }
 0xa35   : > { %v2713_v50 = vmul.f32 %v5216_v18, %v2708_v23 }
 0xa36   : > { %v2879_v56 = vmul.f32 %v5218_v7, %v2874_v41  ;;  %v2885_v22 = vmul.f32 %v6435_v61, %v2880_v12  ;;  %v4830_v41 = vld [vmem:[#allocation9 + $0x28] sm:$0xff]  ;;  %v4828_v12 = vld [vmem:[#allocation9 + $0x18] sm:$0xff] }
 0xa37   : > { %v5220_v30 = vpop.eup %5219  ;;  %v2718_v6 = vmul.f32 %v6433_v39, %v2713_v50 }
 0xa38   : > { %v2704_v40 = vmul.f32 %v5220_v30, %v2694_v10  ;;  %v2884_v14 = vmul.f32 %v6404_v27, %v2879_v56  ;;  %v5222_v27 = vpop.eup %5221  ;;  %v4827_v56 = vld [vmem:[#allocation9 + $0x10] sm:$0xff] }
 0xa39   : > { %v2721_v48 = vpack.c.bf16 %v2718_v6, %v2717_v60  ;;  %v2872_v44 = vmul.f32 %v5222_v27, %v2860_v59  ;;  %v4831_v60 = vld [vmem:[#allocation9 + $0x30] sm:$0xff] }
 0xa3a   : > { %v2709_v20 = vsub.f32 2.0, %v2704_v40  ;;  %v2889_v0 = vpack.c.bf16 %v2885_v22, %v2884_v14  ;;  %v4829_v40 = vld [vmem:[#allocation9 + $0x20] sm:$0xff] }
 0xa3b   : > { %4471 = vmatmul.msk.bf16.gmra.mxu3 %vm1063_vm2, %v2721_v48  ;;  %v2877_v24 = vsub.f32 2.0, %v2872_v44  ;;  %v4825_v22 = vld [vmem:[#allocation9] sm:$0xff] }
 0xa3c   : > { %v2714_v26 = vmul.f32 %v5220_v30, %v2709_v20  ;;  %v4832_v30 = vld [vmem:[#allocation9 + $0x38] sm:$0xff]  ;;  %v4826_v20 = vld [vmem:[#allocation9 + $0x8] sm:$0xff] }
 0xa3d   : > { %v2882_v25 = vmul.f32 %v5222_v27, %v2877_v24  ;;  %3081 = vmatpush.bf16.msrb.mxu2 %v4832_v30 }
 0xa3e   : > { %v2719_v9 = vmul.f32 %v6445_v32, %v2714_v26 }
 0xa3f   : > { %v2887_v21 = vmul.f32 %v6437_v58, %v2882_v25 }
 0xa40   : > { %v2893_v51 = vpop.permute.xlu1 %2892  ;;  %v2722_v39 = vpack.c.bf16 %v2719_v9, %v2719_v9 }
 0xa41   : > { %2919 = vmatpush.bf16.msrb.mxu1 %v2893_v51  ;;  %3082 = vmatpush.bf16.msrb.mxu2 %v4831_v60  ;;  %v5285_v60 = vld [vmem:[%s5671_s20 + $0x18] sm:$0xff] }
 0xa44   : > { %4476 = vmatmul.msk.bf16.vlgmr.msrb.gmra.mxu1 %vm1063_vm2, %v2889_v0 }
 0xa45   : > { %3083 = vmatpush.bf16.msrb.mxu2 %v4830_v41 }
 0xa49   : > { %3084 = vmatpush.bf16.msrb.mxu2 %v4829_v40 }
 0xa4b   : > { %4472 = vmatmul.msk.bf16.gmra.mxu3 %vm1063_vm2, %v2722_v39 }
 0xa4d   : > { %3085 = vmatpush.bf16.msrb.mxu2 %v4828_v12 }
 0xa4e   : > { %v2583_v5 = vpop.f32.mrf.mxu1 }
 0xa51   : > { %3086 = vmatpush.bf16.msrb.mxu2 %v4827_v56 }
 0xa55   : > { %3087 = vmatpush.bf16.msrb.mxu2 %v4826_v20 }
 0xa56   : > { %v2585_v8 = vpop.f32.mrf.mxu1 }
 0xa57   : > { %v5006_v43 = vpack.i.bf16 %v2585_v8, %v2583_v5 }
 0xa59   : > { %5007 = vrot.lane.b32.xlu2 %v5006_v43, %s5506_s15  ;;  %3088 = vmatpush.bf16.msrb.mxu2 %v4825_v22 }
 0xa5d   : > { %v2863_v38 = vpop.xlane.xlu0 %2862 }
 0xa65   : > { %v2588_v61 = vpop.f32.mrf.mxu1 }
 0xa6b   : > { %v2857_v55 = vpop.xlane.xlu1 %2856 }
 0xa6c   : > { %5223 = vrcp.f32 %v2857_v55 }
 0xa6d   : > { %v2590_v19 = vpop.f32.mrf.mxu1  ;;  %5225 = vrcp.f32 %v2863_v38 }
 0xa6e   : > { %v5021_v10 = vpack.i.bf16 %v2590_v19, %v2588_v61 }
 0xa72   : > { %v5224_v15 = vpop.eup %5223 }
 0xa73   : > { %v2871_v32 = vmul.f32 %v5224_v15, %v2857_v55  ;;  %v5226_v13 = vpop.eup %5225 }
 0xa74   : > { %v2873_v33 = vmul.f32 %v5226_v13, %v2863_v38 }
 0xa75   : > { %v2876_v17 = vsub.f32 2.0, %v2871_v32  ;;  %v2593_v49 = vpop.f32.mrf.mxu1 }
 0xa76   : > { %v2878_v16 = vsub.f32 2.0, %v2873_v33 }
 0xa77   : > { %v2881_v42 = vmul.f32 %v5224_v15, %v2876_v17 }
 0xa78   : > { %v2883_v28 = vmul.f32 %v5226_v13, %v2878_v16 }
 0xa79   : > { %v2886_v1 = vmul.f32 %v6468_v4, %v2881_v42 }
 0xa7a   : > { %v2888_v47 = vmul.f32 %v6459_v63, %v2883_v28 }
 0xa7b   : > { %v2890_v52 = vpack.c.bf16 %v2887_v21, %v2886_v1 }
 0xa7c   : > { %v2752_v2 = vpop.f32.mrf.mxu3  ;;  %v2891_v18 = vpack.c.bf16 %v2888_v47, %v2888_v47 }
 0xa7d   : > { %4477 = vmatmul.msk.bf16.gmra.mxu1 %vm1063_vm2, %v2890_v52  ;;  %v2595_v31 = vpop.f32.mrf.mxu1 }
 0xa84   : > { %v2754_v45 = vpop.f32.mrf.mxu3 }
 0xa85   : > { %v5011_v62 = vpack.i.bf16 %v2754_v45, %v2752_v2 }
 0xa87   : > { %5012 = vrot.lane.b32.xlu0 %v5011_v62, %s5505_s7 }
 0xa8d   : > { %4478 = vmatmul.msk.bf16.gmra.mxu1 %vm1063_vm2, %v2891_v18  ;;  %v5041_v18 = vld [vmem:[%s6963_s10] ss:$0 sm:$0xff] }
 0xa8f   : > { %5022 = vrot.lane.b32.xlu0 %v5021_v10, %s5506_s15 }
 0xab3   : > { %v5008_v14 = vpop.permute.xlu2 %5007 }
 0xab4   : > { %v5010_v26 = vunpack.i.h.bf16 %v5008_v14  ;;  %v5009_v0 = vunpack.i.l.bf16 %v5008_v14 }
 0xab6   : > { %v2996_v8 = vsel %vm1021_vm0, %v6476_v34, %v5010_v26  ;;  %v2995_v43 = vsel %vm1021_vm0, %v6464_v54, %v5009_v0 }
 0xabe   : > { %v2757_v58 = vpop.f32.mrf.mxu3 }
 0xac1   : > { %v2921_v4 = vpop.f32.mrf.mxu1 }
 0xac6   : > { %v2759_v7 = vpop.f32.mrf.mxu3 }
 0xac7   : > { %v5026_v35 = vpack.i.bf16 %v2759_v7, %v2757_v58 }
 0xac9   : > { %5027 = vrot.lane.b32.xlu2 %v5026_v35, %s5505_s7  ;;  %v2923_v57 = vpop.f32.mrf.mxu1 }
 0xaca   : > { %v5016_v29 = vpack.i.bf16 %v2923_v57, %v2921_v4  ;;  %v5282_v4 = vld [vmem:[%s5671_s20] sm:$0xff]  ;;  %v5283_v57 = vld [vmem:[%s5671_s20 + $0x8] sm:$0xff] }
 0xacc   : > { %5017 = vrot.lane.b32.xlu1 %v5016_v29, %s5504_s17 }
 0xace   : > { %v2762_v23 = vpop.f32.mrf.mxu3 }
 0xad1   : > { %2948 = vrot.lane.b32.xlu2 %v2593_v49, %s5506_s15 }
 0xad6   : > { %v2764_v63 = vpop.f32.mrf.mxu3 }
 0xaf9   : > { %v5013_v51 = vpop.permute.xlu0 %5012 }
 0xafa   : > { %v2926_v37 = vpop.f32.mrf.mxu1  ;;  %v5015_v9 = vunpack.i.h.bf16 %v5013_v51  ;;  %v5014_v39 = vunpack.i.l.bf16 %v5013_v51 }
 0xafc   : > { %v3000_v27 = vsel %vm1760_vm3, %v2995_v43, %v5014_v39  ;;  %v3001_v55 = vsel %vm1760_vm3, %v2996_v8, %v5015_v9 }
 0xb01   : > { %v5023_v24 = vpop.permute.xlu0 %5022 }
 0xb02   : > { %v2928_v50 = vpop.f32.mrf.mxu1  ;;  %v5025_v32 = vunpack.i.h.bf16 %v5023_v24  ;;  %v5024_v25 = vunpack.i.l.bf16 %v5023_v24 }
 0xb03   : > { %v5031_v3 = vpack.i.bf16 %v2928_v50, %v2926_v37  ;;  %v5284_v37 = vld [vmem:[%s5671_s20 + $0x10] sm:$0xff] }
 0xb04   : > { %v2998_v54 = vsel %vm1021_vm0, %v6480_v53, %v5025_v32  ;;  %v2997_v42 = vsel %vm1021_vm0, %v6478_v36, %v5024_v25  ;;  %v4625_v32 = vld [vmem:[%s6964_s11 + $0xe0] sm:$0xf]  ;;  %v4863_v25 = vld [vmem:[%s6964_s11 + $0xec] sm:$0xf0] }
 0xb05   : > { %5032 = vrot.lane.b32.xlu0 %v5031_v3, %s5504_s17 }
 0xb0a   : > { %v2931_v6 = vpop.f32.mrf.mxu1 }
 0xb0b   : > { %2988 = vrot.lane.b32.xlu2 %v2931_v6, %s5504_s17  ;;  %s6938_s17 = scalar_lea.vmem %s6983_s29, %s4205_s30 }
 0xb0d   : > { %2968 = vrot.lane.b32.xlu0 %v2762_v23, %s5505_s7 }
 0xb12   : > { %v2933_v48 = vpop.f32.mrf.mxu1 }
 0xb13   : > { %v5286_v48 = vld [vmem:[%s5671_s20 + $0x20] sm:$0xff]  ;;  %s6982_s20 = sld [smem:[#allocation19_spill]] }
 0xb23   : > { %v5028_v15 = vpop.permute.xlu2 %5027 }
 0xb24   : > { %v5030_v34 = vunpack.i.h.bf16 %v5028_v15  ;;  %v5029_v17 = vunpack.i.l.bf16 %v5028_v15 }
 0xb26   : > { %v3003_v1 = vsel %vm1760_vm3, %v2998_v54, %v5030_v34  ;;  %v3002_v33 = vsel %vm1760_vm3, %v2997_v42, %v5029_v17  ;;  %v4861_v34 = vld [vmem:[%s6964_s11 + $0xe4] sm:$0xf]  ;;  %v4626_v17 = vor.u32 %v4863_v25, %v4625_v32  ;;  %v4633_v54 = vld [vmem:[%s6964_s11 + $0xe8] sm:$0xf]  ;;  %v4864_v42 = vld [vmem:[%s6964_s11 + $0xf4] sm:$0xf0] }
 0xb27   : > { %v4569_v32 = vld [vmem:[%s6964_s11 + $0x68] sm:$0xf]  ;;  %v4848_v25 = vld [vmem:[%s6964_s11 + $0x74] sm:$0xf0] }
 0xb28   : > { %3426 = vmatpush.bf16.msra.mxu3 %v4626_v17  ;;  %v4570_v17 = vor.u32 %v4848_v25, %v4569_v32 }
 0xb2b   : > { %v2949_v16 = vpop.permute.xlu2 %2948 }
 0xb2c   : > { %v2999_v53 = vsel %vm1021_vm0, %v6482_v46, %v2949_v16  ;;  %v4857_v16 = vld [vmem:[%s6964_s11 + $0xc4] sm:$0xf] }
 0xb3e   : > { %v5018_v5 = vpop.permute.xlu1 %5017 }
 0xb3f   : > { %v5020_v59 = vunpack.i.h.bf16 %v5018_v5  ;;  %v5019_v61 = vunpack.i.l.bf16 %v5018_v5 }
 0xb41   : > { %v3005_v44 = vsel %vm1766_vm4, %v3000_v27, %v5019_v61  ;;  %v3006_v19 = vsel %vm1766_vm4, %v3001_v55, %v5020_v59 }
 0xb42   : > { %v3010_v38 = vpack.c.bf16 %v3006_v19, %v3005_v44 }
 0xb44   : > { %3089 = vmatmul.bf16.vlgmr.msrb.gmra.mxu2 %v3010_v38 }
 0xb65   : > { %v2989_v45 = vpop.permute.xlu2 %2988 }
 0xb77   : > { %v5033_v49 = vpop.permute.xlu0 %5032 }
 0xb78   : > { %v5035_v13 = vunpack.i.h.bf16 %v5033_v49  ;;  %v5034_v21 = vunpack.i.l.bf16 %v5033_v49  ;;  %v4627_v49 = vld [vmem:[%s6964_s11 + $0xf0] sm:$0xf0] }
 0xb7a   : > { %v3007_v52 = vsel %vm1766_vm4, %v3002_v33, %v5034_v21  ;;  %v3008_v2 = vsel %vm1766_vm4, %v3003_v1, %v5035_v13  ;;  %v4630_v13 = vor.u32 %v4861_v34, %v4627_v49  ;;  %v4634_v21 = vor.u32 %v4864_v42, %v4633_v54  ;;  %v4862_v1 = vld [vmem:[%s6964_s11 + $0xec] sm:$0xf]  ;;  %v4635_v33 = vld [vmem:[%s6964_s11 + $0xf8] sm:$0xf0] }
 0xb7b   : > { %v3011_v31 = vpack.c.bf16 %v3008_v2, %v3007_v52  ;;  %v4638_v52 = vor.u32 %v4862_v1, %v4635_v33  ;;  %v4609_v2 = vld [vmem:[%s6964_s11 + $0xc0] sm:$0xf]  ;;  %v4846_v49 = vld [vmem:[%s6964_s11 + $0x6c] sm:$0xf]  ;;  %v4571_v54 = vld [vmem:[%s6964_s11 + $0x78] sm:$0xf0] }
 0xb7c   : > { %3449 = vmatpush.bf16.msra.mxu0 %v4630_v13  ;;  %3472 = vmatpush.bf16.msra.mxu1 %v4634_v21  ;;  %v4574_v42 = vor.u32 %v4846_v49, %v4571_v54  ;;  %v4545_v13 = vld [vmem:[%s6964_s11 + $0x40] sm:$0xf]  ;;  %v4843_v21 = vld [vmem:[%s6964_s11 + $0x4c] sm:$0xf0]  ;;  %v4841_v1 = vld [vmem:[%s6964_s11 + $0x44] sm:$0xf] }
 0xb7d   : > { %3094 = vmatmul.bf16.gmra.mxu2 %v3011_v31  ;;  %v4859_v31 = vld [vmem:[%s6964_s11 + $0xcc] sm:$0xf0]  ;;  %v4546_v33 = vor.u32 %v4843_v21, %v4545_v13  ;;  %v6776_v21 = vld [vmem:[%s6954_s1 + $0x2] ss:$0 sm:$0xff] }
 0xb7e   : > { %3495 = vmatpush.bf16.msra.mxu2 %v4638_v52  ;;  %v4547_v52 = vld [vmem:[%s6964_s11 + $0x50] sm:$0xf0] }
 0xb7f   : > { %v2969_v28 = vpop.permute.xlu0 %2968 }
 0xb80   : > { %v3004_v36 = vsel %vm1760_vm3, %v2999_v53, %v2969_v28  ;;  %v4610_v28 = vor.u32 %v4859_v31, %v4609_v2  ;;  %v4611_v53 = vld [vmem:[%s6964_s11 + $0xd0] sm:$0xf0]  ;;  %v4553_v2 = vld [vmem:[%s6964_s11 + $0x48] sm:$0xf]  ;;  %v4844_v31 = vld [vmem:[%s6964_s11 + $0x54] sm:$0xf0] }
 0xb81   : > { %v3009_v62 = vsel %vm1766_vm4, %v3004_v36, %v2989_v45  ;;  %v4617_v36 = vld [vmem:[%s6964_s11 + $0xc8] sm:$0xf]  ;;  %v4860_v45 = vld [vmem:[%s6964_s11 + $0xd4] sm:$0xf0] }
 0xb82   : > { %v3012_v47 = vpack.c.bf16 %v3009_v62, %v3009_v62  ;;  %v4614_v62 = vor.u32 %v4857_v16, %v4611_v53  ;;  %3427 = vmatpush.bf16.msra.mxu3 %v4610_v28  ;;  %v4550_v16 = vor.u32 %v4841_v1, %v4547_v52  ;;  %v4554_v28 = vor.u32 %v4844_v31, %v4553_v2  ;;  %v4842_v53 = vld [vmem:[%s6964_s11 + $0x4c] sm:$0xf]  ;;  %v6782_v2 = vld [vmem:[%s6954_s1 + $0x3] ss:$0 sm:$0xff] }
 0xb84   : > { %3450 = vmatpush.bf16.msra.mxu0 %v4614_v62  ;;  %v4529_v62 = vld [vmem:[%s6964_s11 + $0x20] sm:$0xf] }
 0xb8d   : > { %3099 = vmatmul.bf16.gmra.mxu2 %v3012_v47  ;;  %v4618_v47 = vor.u32 %v4860_v45, %v4617_v36  ;;  %v4555_v36 = vld [vmem:[%s6964_s11 + $0x58] sm:$0xf0] }
 0xb8e   : > { %v4558_v45 = vor.u32 %v4842_v53, %v4555_v36 }
 0xb8f   : > { %3473 = vmatpush.bf16.msra.mxu1 %v4618_v47  ;;  %v4839_v47 = vld [vmem:[%s6964_s11 + $0x2c] sm:$0xf0] }
 0xbc7   : > { %v3090_v10 = vpop.f32.mrf.mxu2 }
 0xbc8   : > { %v3091_v58 = vadd.f32 %v5041_v18, %v3090_v10  ;;  %v4619_v10 = vld [vmem:[%s6964_s11 + $0xd8] sm:$0xf0] }
 0xbca   : > { %v6530_v7 = vadd.f32 %v5282_v4, %v3091_v58  ;;  %v4593_v4 = vld [vmem:[%s6964_s11 + $0xa0] sm:$0xf] }
 0xbcc   : > { %3109 = vadd.xlane.f32.xlu0 %v6530_v7 }
 0xbcf   : > { %v3092_v46 = vpop.f32.mrf.mxu2 }
 0xbd0   : > { %v3093_v35 = vadd.f32 %v5041_v18, %v3092_v46  ;;  %v4855_v46 = vld [vmem:[%s6964_s11 + $0xac] sm:$0xf0] }
 0xbd2   : > { %v6534_v29 = vadd.f32 %v5283_v57, %v3093_v35  ;;  %v4853_v35 = vld [vmem:[%s6964_s11 + $0xa4] sm:$0xf]  ;;  %v4594_v57 = vor.u32 %v4855_v46, %v4593_v4  ;;  %v4531_v4 = vld [vmem:[%s6964_s11 + $0x30] sm:$0xf0]  ;;  %v4537_v46 = vld [vmem:[%s6964_s11 + $0x28] sm:$0xf] }
 0xbd4   : > { %3111 = vadd.xlane.f32.xlu1 %v6534_v29  ;;  %3428 = vmatpush.bf16.msra.mxu3 %v4594_v57 }
 0xc00   : > { %v3095_v23 = vpop.f32.mrf.mxu2 }
 0xc01   : > { %v3096_v63 = vadd.f32 %v5041_v18, %v3095_v23  ;;  %v4595_v23 = vld [vmem:[%s6964_s11 + $0xb0] sm:$0xf0] }
 0xc03   : > { %v6538_v50 = vadd.f32 %v5284_v37, %v3096_v63  ;;  %v4601_v63 = vld [vmem:[%s6964_s11 + $0xa8] sm:$0xf]  ;;  %v4856_v37 = vld [vmem:[%s6964_s11 + $0xb4] sm:$0xf0] }
 0xc05   : > { %3113 = vadd.xlane.f32.xlu2 %v6538_v50 }
 0xc08   : > { %v3097_v3 = vpop.f32.mrf.mxu2 }
 0xc09   : > { %v3098_v30 = vadd.f32 %v5041_v18, %v3097_v3  ;;  %v4598_v3 = vor.u32 %v4853_v35, %v4595_v23  ;;  %v4840_v35 = vld [vmem:[%s6964_s11 + $0x34] sm:$0xf0] }
 0xc0b   : > { %v6542_v6 = vadd.f32 %v5285_v60, %v3098_v30  ;;  %v4602_v30 = vor.u32 %v4856_v37, %v4601_v63  ;;  %v4854_v60 = vld [vmem:[%s6964_s11 + $0xac] sm:$0xf]  ;;  %3451 = vmatpush.bf16.msra.mxu0 %v4598_v3  ;;  %v4538_v63 = vor.u32 %v4840_v35, %v4537_v46  ;;  %v4539_v3 = vld [vmem:[%s6964_s11 + $0x38] sm:$0xf0] }
 0xc0c   : > { %v4838_v37 = vld [vmem:[%s6964_s11 + $0x2c] sm:$0xf] }
 0xc0d   : > { %3115 = vadd.xlane.f32.xlu0 %v6542_v6  ;;  %3474 = vmatpush.bf16.msra.mxu1 %v4602_v30  ;;  %v4542_v30 = vor.u32 %v4838_v37, %v4539_v3 }
 0xc10   : > { %v3100_v41 = vpop.f32.mrf.mxu2 }
 0xc11   : > { %v3101_v40 = vadd.f32 %v5041_v18, %v3100_v41  ;;  %v4858_v18 = vld [vmem:[%s6964_s11 + $0xcc] sm:$0xf]  ;;  %v4603_v41 = vld [vmem:[%s6964_s11 + $0xb8] sm:$0xf0] }
 0xc12   : > { %v4622_v58 = vor.u32 %v4858_v18, %v4619_v10  ;;  %v4837_v18 = vld [vmem:[%s6964_s11 + $0x24] sm:$0xf] }
 0xc13   : > { %v6546_v12 = vadd.f32 %v5286_v48, %v3101_v40  ;;  %v4606_v40 = vor.u32 %v4854_v60, %v4603_v41  ;;  %v4577_v48 = vld [vmem:[%s6964_s11 + $0x80] sm:$0xf]  ;;  %v4534_v23 = vor.u32 %v4837_v18, %v4531_v4 }
 0xc14   : > { %3496 = vmatpush.bf16.msra.mxu2 %v4622_v58  ;;  %v4530_v58 = vor.u32 %v4839_v47, %v4529_v62  ;;  %v4513_v41 = vld [vmem:[%s6964_s11] sm:$0xf] }
 0xc15   : > { %3117 = vadd.xlane.f32.xlu1 %v6546_v12 }
 0xc18   : > { %v3102_v56 = vpop.f32.mrf.mxu2  ;;  %3497 = vmatpush.bf16.msra.mxu2 %v4606_v40  ;;  %v4835_v40 = vld [vmem:[%s6964_s11 + $0xc] sm:$0xf0] }
 0xc19   : > { %v4851_v56 = vld [vmem:[%s6964_s11 + $0x8c] sm:$0xf0] }
 0xc3f   : > { %v3110_v20 = vpop.xlane.xlu0 %3109 }
 0xc40   : > { %v3119_v22 = vmul.f32 %v3110_v20, %v5678_v11  ;;  %v4849_v20 = vld [vmem:[%s6964_s11 + $0x84] sm:$0xf] }
 0xc42   : > { %v6551_v14 = vsub.f32 %v6530_v7, %v3119_v22  ;;  %v4578_v22 = vor.u32 %v4851_v56, %v4577_v48  ;;  %v4514_v48 = vor.u32 %v4835_v40, %v4513_v41  ;;  %v4833_v56 = vld [vmem:[%s6964_s11 + $0x4] sm:$0xf] }
 0xc44   : > { %v3129_v51 = vmul.f32 %v6551_v14, %v6551_v14  ;;  %3429 = vmatpush.bf16.msra.mxu3 %v4578_v22  ;;  %v4521_v22 = vld [vmem:[%s6964_s11 + $0x8] sm:$0xf] }
 0xc46   : > { %3134 = vadd.xlane.f32.xlu2 %v3129_v51  ;;  %v4579_v51 = vld [vmem:[%s6964_s11 + $0x90] sm:$0xf0] }
 0xc47   : > { %v3112_v26 = vpop.xlane.xlu1 %3111 }
 0xc48   : > { %v3120_v0 = vmul.f32 %v3112_v26, %v5678_v11  ;;  %v4585_v26 = vld [vmem:[%s6964_s11 + $0x88] sm:$0xf] }
 0xc4a   : > { %v6557_v9 = vsub.f32 %v6534_v29, %v3120_v0  ;;  %v4852_v0 = vld [vmem:[%s6964_s11 + $0x94] sm:$0xf0] }
 0xc4c   : > { %v3130_v39 = vmul.f32 %v6557_v9, %v6557_v9 }
 0xc4e   : > { %3136 = vadd.xlane.f32.xlu0 %v3130_v39  ;;  %v4582_v39 = vor.u32 %v4849_v20, %v4579_v51  ;;  %v4515_v20 = vld [vmem:[%s6964_s11 + $0x10] sm:$0xf0] }
 0xc4f   : > { %v4518_v51 = vor.u32 %v4833_v56, %v4515_v20 }
 0xc50   : > { %3452 = vmatpush.bf16.msra.mxu0 %v4582_v39  ;;  %v4523_v39 = vld [vmem:[%s6964_s11 + $0x18] sm:$0xf0] }
 0xc78   : > { %v3114_v5 = vpop.xlane.xlu2 %3113 }
 0xc79   : > { %v3121_v8 = vmul.f32 %v3114_v5, %v5678_v11  ;;  %v4586_v5 = vor.u32 %v4852_v0, %v4585_v26  ;;  %v4836_v26 = vld [vmem:[%s6964_s11 + $0x14] sm:$0xf0]  ;;  %v4834_v0 = vld [vmem:[%s6964_s11 + $0xc] sm:$0xf] }
 0xc7b   : > { %v6563_v43 = vsub.f32 %v6538_v50, %v3121_v8  ;;  %v4850_v8 = vld [vmem:[%s6964_s11 + $0x8c] sm:$0xf]  ;;  %3475 = vmatpush.bf16.msra.mxu1 %v4586_v5  ;;  %v4522_v5 = vor.u32 %v4836_v26, %v4521_v22 }
 0xc7d   : > { %v3131_v59 = vmul.f32 %v6563_v43, %v6563_v43 }
 0xc7f   : > { %3138 = vadd.xlane.f32.xlu1 %v3131_v59  ;;  %v4587_v59 = vld [vmem:[%s6964_s11 + $0x98] sm:$0xf0]  ;;  %3476 = vmatpush.bf16.msra.mxu1 %v4570_v17 }
 0xc80   : > { %v3116_v61 = vpop.xlane.xlu0 %3115 }
 0xc81   : > { %v3122_v27 = vmul.f32 %v3116_v61, %v5678_v11  ;;  %v4590_v61 = vor.u32 %v4850_v8, %v4587_v59  ;;  %v4526_v8 = vor.u32 %v4834_v0, %v4523_v39 }
 0xc83   : > { %v6569_v55 = vsub.f32 %v6542_v6, %v3122_v27  ;;  %v4561_v27 = vld [vmem:[%s6964_s11 + $0x60] sm:$0xf]  ;;  %3498 = vmatpush.bf16.msra.mxu2 %v4590_v61  ;;  %3477 = vmatpush.bf16.msra.mxu1 %v4554_v28 }
 0xc85   : > { %v3132_v44 = vmul.f32 %v6569_v55, %v6569_v55 }
 0xc87   : > { %3140 = vadd.xlane.f32.xlu2 %v3132_v44  ;;  %v4847_v44 = vld [vmem:[%s6964_s11 + $0x6c] sm:$0xf0]  ;;  %3499 = vmatpush.bf16.msra.mxu2 %v4574_v42 }
 0xc88   : > { %v3118_v19 = vpop.xlane.xlu1 %3117  ;;  %3478 = vmatpush.bf16.msra.mxu1 %v4538_v63 }
 0xc89   : > { %v3123_v38 = vmul.f32 %v3118_v19, %v5678_v11  ;;  %v4845_v19 = vld [vmem:[%s6964_s11 + $0x64] sm:$0xf] }
 0xc8b   : > { %v6575_v24 = vsub.f32 %v6546_v12, %v3123_v38  ;;  %v4562_v38 = vor.u32 %v4847_v44, %v4561_v27  ;;  %3500 = vmatpush.bf16.msra.mxu2 %v4558_v45 }
 0xc8c   : > { %3479 = vmatpush.bf16.msra.mxu1 %v4522_v5 }
 0xc8d   : > { %v3133_v15 = vmul.f32 %v6575_v24, %v6575_v24  ;;  %3430 = vmatpush.bf16.msra.mxu3 %v4562_v38 }
 0xc8f   : > { %3142 = vadd.xlane.f32.xlu0 %v3133_v15  ;;  %v4563_v15 = vld [vmem:[%s6964_s11 + $0x70] sm:$0xf0]  ;;  %3501 = vmatpush.bf16.msra.mxu2 %v4542_v30 }
 0xc90   : > { %v4566_v34 = vor.u32 %v4845_v19, %v4563_v15 }
 0xc91   : > { %3431 = vmatpush.bf16.msra.mxu3 %v4546_v33 }
 0xc92   : > { %3453 = vmatpush.bf16.msra.mxu0 %v4566_v34 }
 0xc93   : > { %3502 = vmatpush.bf16.msra.mxu2 %v4526_v8 }
 0xc95   : > { %3432 = vmatpush.bf16.msra.mxu3 %v4530_v58 }
 0xc96   : > { %3454 = vmatpush.bf16.msra.mxu0 %v4550_v16 }
 0xc99   : > { %3433 = vmatpush.bf16.msra.mxu3 %v4514_v48 }
 0xc9a   : > { %3455 = vmatpush.bf16.msra.mxu0 %v4534_v23 }
 0xc9e   : > { %3456 = vmatpush.bf16.msra.mxu0 %v4518_v51 }
 0xcb9   : > { %v3135_v10 = vpop.xlane.xlu2 %3134 }
 0xcba   : > { %v3144_v57 = vmul.f32 %v3135_v10, %v5678_v11 }
 0xcbc   : > { %v3149_v60 = vadd.f32 1e-05, %v3144_v57 }
 0xcbe   : > { %5227 = vrsqrt.f32 %v3149_v60  ;;  %vm3160_vm1 = vweird.f32 %v3149_v60 }
 0xcc1   : > { %v3137_v59 = vpop.xlane.xlu0 %3136 }
 0xcc2   : > { %v3145_v61 = vmul.f32 %v3137_v59, %v5678_v11 }
 0xcc4   : > { %v5228_v27 = vpop.eup %5227  ;;  %v3150_v44 = vadd.f32 1e-05, %v3145_v61 }
 0xcc5   : > { %v3155_v19 = vmul.f32 %v5228_v27, %v3149_v60  ;;  %vm3161_vm0 = vweird.f32 %v5228_v27 }
 0xcc6   : > { %5229 = vrsqrt.f32 %v3150_v44  ;;  %vm3162_vm2 = vmor %vm3160_vm1, %vm3161_vm0  ;;  %vm3170_vm4 = vweird.f32 %v3150_v44 }
 0xcc7   : > { %v3156_v38 = vmul.f32 %v5228_v27, %v3155_v19 }
 0xcc9   : > { %v3157_v15 = vmul.f32 0.5, %v3156_v38 }
 0xccb   : > { %v3158_v32 = vsub.f32 1.5, %v3157_v15 }
 0xccc   : > { %v5230_v25 = vpop.eup %5229 }
 0xccd   : > { %v3159_v34 = vmul.f32 %v5228_v27, %v3158_v32  ;;  %v3165_v17 = vmul.f32 %v5230_v25, %v3150_v44  ;;  %vm3171_vm3 = vweird.f32 %v5230_v25 }
 0xcce   : > { %vm3172_vm9 = vmor %vm3170_vm4, %vm3171_vm3 }
 0xccf   : > { %v3166_v49 = vmul.f32 %v5230_v25, %v3165_v17  ;;  %v3163_v54 = vsel %vm3162_vm2, %v5228_v27, %v3159_v34  ;;  %v4880_v34 = vld [vmem:[#allocation10 + $0x78] sm:$0xff] }
 0xcd0   : > { %v3204_v1 = vmul.f32 %v3163_v54, %v6551_v14  ;;  %v4888_v17 = vld [vmem:[#allocation10 + $0xb8] sm:$0xff]  ;;  %3993 = vmatpush.bf16.msrb.mxu0 %v4880_v34  ;;  %v4887_v54 = vld [vmem:[#allocation10 + $0xb0] sm:$0xff] }
 0xcd1   : > { %v3167_v42 = vmul.f32 0.5, %v3166_v49  ;;  %4016 = vmatpush.bf16.msrb.mxu1 %v4888_v17  ;;  %v4879_v49 = vld [vmem:[#allocation10 + $0x70] sm:$0xff] }
 0xcd2   : > { %v3210_v31 = vmul.f32 %v6776_v21, %v3204_v1  ;;  %v4871_v1 = vld [vmem:[#allocation10 + $0x30] sm:$0xff] }
 0xcd3   : > { %v3168_v13 = vsub.f32 1.5, %v3167_v42  ;;  %v4872_v42 = vld [vmem:[#allocation10 + $0x38] sm:$0xff] }
 0xcd4   : > { %v3216_v53 = vadd.f32 %v6782_v2, %v3210_v31  ;;  %3994 = vmatpush.bf16.msrb.mxu0 %v4879_v49  ;;  %3970 = vmatpush.bf16.msrb.mxu3 %v4872_v42  ;;  %v4870_v31 = vld [vmem:[#allocation10 + $0x28] sm:$0xff] }
 0xcd5   : > { %v3169_v33 = vmul.f32 %v5230_v25, %v3168_v13  ;;  %4017 = vmatpush.bf16.msrb.mxu1 %v4887_v54  ;;  %v4896_v13 = vld [vmem:[#allocation10 + $0xf8] sm:$0xff] }
 0xcd6   : > { %4039 = vmatpush.bf16.msrb.mxu2 %v4896_v13 }
 0xcd7   : > { %v3173_v52 = vsel %vm3172_vm9, %v5230_v25, %v3169_v33  ;;  %v4895_v33 = vld [vmem:[#allocation10 + $0xf0] sm:$0xff] }
 0xcd8   : > { %v3205_v16 = vmul.f32 %v3173_v52, %v6557_v9  ;;  %3971 = vmatpush.bf16.msrb.mxu3 %v4871_v1  ;;  %v4877_v52 = vld [vmem:[#allocation10 + $0x60] sm:$0xff] }
 0xcda   : > { %v3211_v28 = vmul.f32 %v6776_v21, %v3205_v16  ;;  %4040 = vmatpush.bf16.msrb.mxu2 %v4895_v33  ;;  %v4894_v16 = vld [vmem:[#allocation10 + $0xe8] sm:$0xff] }
 0xcdc   : > { %v3217_v36 = vadd.f32 %v6782_v2, %v3211_v28  ;;  %3972 = vmatpush.bf16.msrb.mxu3 %v4870_v31  ;;  %v4876_v28 = vld [vmem:[#allocation10 + $0x58] sm:$0xff] }
 0xcde   : > { %v3221_v14 = vpack.c.bf16 %v3217_v36, %v3216_v53  ;;  %4041 = vmatpush.bf16.msrb.mxu2 %v4894_v16  ;;  %v4884_v53 = vld [vmem:[#allocation10 + $0x98] sm:$0xff]  ;;  %v4869_v36 = vld [vmem:[#allocation10 + $0x20] sm:$0xff] }
 0xce0   : > { %3434 = vmatmul.bf16.vlgmr.msra.gmra.mxu3 %v3221_v14  ;;  %3457 = vmatmul.bf16.vlgmr.msra.gmra.mxu0 %v3221_v14 }
 0xce1   : > { %3480 = vmatmul.bf16.vlgmr.msra.gmra.mxu1 %v3221_v14  ;;  %3503 = vmatmul.bf16.vlgmr.msra.gmra.mxu2 %v3221_v14  ;;  %v4893_v14 = vld [vmem:[#allocation10 + $0xe0] sm:$0xff] }
 0xce2   : > { %3973 = vmatpush.bf16.msrb.mxu3 %v4869_v36  ;;  %4042 = vmatpush.bf16.msrb.mxu2 %v4893_v14 }
 0xcf2   : > { %v3139_v45 = vpop.xlane.xlu1 %3138 }
 0xcf3   : > { %v3146_v62 = vmul.f32 %v3139_v45, %v5678_v11  ;;  %v4875_v45 = vld [vmem:[#allocation10 + $0x50] sm:$0xff] }
 0xcf5   : > { %v3151_v47 = vadd.f32 1e-05, %v3146_v62  ;;  %v4883_v62 = vld [vmem:[#allocation10 + $0x90] sm:$0xff] }
 0xcf7   : > { %5231 = vrsqrt.f32 %v3151_v47  ;;  %vm3180_vm11 = vweird.f32 %v3151_v47 }
 0xcfa   : > { %v3141_v18 = vpop.xlane.xlu2 %3140 }
 0xcfb   : > { %v3147_v10 = vmul.f32 %v3141_v18, %v5678_v11  ;;  %v4892_v18 = vld [vmem:[#allocation10 + $0xd8] sm:$0xff] }
 0xcfc   : > { %4043 = vmatpush.bf16.msrb.mxu2 %v4892_v18 }
 0xcfd   : > { %v5232_v9 = vpop.eup %5231  ;;  %v3152_v58 = vadd.f32 1e-05, %v3147_v10  ;;  %v3256_v10 = vld [vmem:[%s6965_s12] sm:$0xf] }
 0xcfe   : > { %v3175_v4 = vmul.f32 %v5232_v9, %v3151_v47  ;;  %vm3181_vm10 = vweird.f32 %v5232_v9  ;;  %v4868_v47 = vld [vmem:[#allocation10 + $0x18] sm:$0xff] }
 0xcff   : > { %5233 = vrsqrt.f32 %v3152_v58  ;;  %vm3182_vm12 = vmor %vm3180_vm11, %vm3181_vm10  ;;  %vm3190_vm14 = vweird.f32 %v3152_v58  ;;  %3974 = vmatpush.bf16.msrb.mxu3 %v4868_v47 }
 0xd00   : > { %v3176_v46 = vmul.f32 %v5232_v9, %v3175_v4  ;;  %v6804_v4 = vperm.slane %v3256_v10, 1 }
 0xd02   : > { %v3177_v35 = vmul.f32 0.5, %v3176_v46  ;;  %v3143_v57 = vpop.xlane.xlu0 %3142  ;;  %v4867_v46 = vld [vmem:[#allocation10 + $0x10] sm:$0xff] }
 0xd03   : > { %v3148_v23 = vmul.f32 %v3143_v57, %v5678_v11  ;;  %v6806_v57 = vperm.slane %v3256_v10, 2  ;;  %3975 = vmatpush.bf16.msrb.mxu3 %v4867_v46 }
 0xd04   : > { %v3178_v63 = vsub.f32 1.5, %v3177_v35  ;;  %v4891_v35 = vld [vmem:[#allocation10 + $0xd0] sm:$0xff] }
 0xd05   : > { %v5234_v37 = vpop.eup %5233  ;;  %v3153_v3 = vadd.f32 1e-05, %v3148_v23  ;;  %4044 = vmatpush.bf16.msrb.mxu2 %v4891_v35  ;;  %v4873_v23 = vld [vmem:[#allocation10 + $0x40] sm:$0xff] }
 0xd06   : > { %v3179_v30 = vmul.f32 %v5232_v9, %v3178_v63  ;;  %v3185_v60 = vmul.f32 %v5234_v37, %v3152_v58  ;;  %vm3191_vm13 = vweird.f32 %v5234_v37  ;;  %v4882_v58 = vld [vmem:[#allocation10 + $0x88] sm:$0xff]  ;;  %v4881_v63 = vld [vmem:[#allocation10 + $0x80] sm:$0xff] }
 0xd07   : > { %5235 = vrsqrt.f32 %v3153_v3  ;;  %vm3192_vm15 = vmor %vm3190_vm14, %vm3191_vm13  ;;  %vm3200_vm6 = vweird.f32 %v3153_v3 }
 0xd08   : > { %v3186_v41 = vmul.f32 %v5234_v37, %v3185_v60  ;;  %v3183_v40 = vsel %vm3182_vm12, %v5232_v9, %v3179_v30  ;;  %v4874_v9 = vld [vmem:[#allocation10 + $0x48] sm:$0xff] }
 0xd09   : > { %v3206_v22 = vmul.f32 %v3183_v40, %v6563_v43  ;;  %v4866_v60 = vld [vmem:[#allocation10 + $0x8] sm:$0xff] }
 0xd0a   : > { %v3187_v48 = vmul.f32 0.5, %v3186_v41  ;;  %v4890_v41 = vld [vmem:[#allocation10 + $0xc8] sm:$0xff]  ;;  %3976 = vmatpush.bf16.msrb.mxu3 %v4866_v60 }
 0xd0b   : > { %v3212_v5 = vmul.f32 %v6776_v21, %v3206_v22  ;;  %4045 = vmatpush.bf16.msrb.mxu2 %v4890_v41  ;;  %v4889_v22 = vld [vmem:[#allocation10 + $0xc0] sm:$0xff] }
 0xd0c   : > { %v3188_v56 = vsub.f32 1.5, %v3187_v48 }
 0xd0d   : > { %v5236_v20 = vpop.eup %5235  ;;  %v3218_v27 = vadd.f32 %v6782_v2, %v3212_v5 }
 0xd0e   : > { %v3189_v51 = vmul.f32 %v5234_v37, %v3188_v56  ;;  %v3195_v11 = vmul.f32 %v5236_v20, %v3153_v3  ;;  %vm3201_vm5 = vweird.f32 %v5236_v20  ;;  %v6815_v56 = vperm.slane %v3256_v10, 0 }
 0xd0f   : > { %vm3202_vm7 = vmor %vm3200_vm6, %vm3201_vm5  ;;  %4046 = vmatpush.bf16.msrb.mxu2 %v4889_v22 }
 0xd10   : > { %v3193_v26 = vsel %vm3192_vm15, %v5234_v37, %v3189_v51  ;;  %v3196_v0 = vmul.f32 %v5236_v20, %v3195_v11  ;;  %v6818_v11 = vperm.slane %v3256_v10, 3 }
 0xd11   : > { %v3207_v39 = vmul.f32 %v3193_v26, %v6569_v55 }
 0xd12   : > { %v3197_v8 = vmul.f32 0.5, %v3196_v0 }
 0xd13   : > { %v3213_v59 = vmul.f32 %v6776_v21, %v3207_v39 }
 0xd14   : > { %v3198_v61 = vsub.f32 1.5, %v3197_v8 }
 0xd15   : > { %v3219_v44 = vadd.f32 %v6782_v2, %v3213_v59 }
 0xd16   : > { %v3199_v43 = vmul.f32 %v5236_v20, %v3198_v61 }
 0xd17   : > { %v3222_v19 = vpack.c.bf16 %v3219_v44, %v3218_v27 }
 0xd18   : > { %v3203_v38 = vsel %vm3202_vm7, %v5236_v20, %v3199_v43  ;;  %v4865_v20 = vld [vmem:[#allocation10] sm:$0xff] }
 0xd19   : > { %3439 = vmatmul.bf16.gmra.mxu3 %v3222_v19  ;;  %3462 = vmatmul.bf16.gmra.mxu0 %v3222_v19  ;;  %v3208_v55 = vmul.f32 %v3203_v38, %v6575_v24  ;;  %v4878_v24 = vld [vmem:[#allocation10 + $0x68] sm:$0xff] }
 0xd1a   : > { %3485 = vmatmul.bf16.gmra.mxu1 %v3222_v19  ;;  %3508 = vmatmul.bf16.gmra.mxu2 %v3222_v19 }
 0xd1b   : > { %v3214_v15 = vmul.f32 %v6776_v21, %v3208_v55  ;;  %v4886_v21 = vld [vmem:[#allocation10 + $0xa8] sm:$0xff]  ;;  %3995 = vmatpush.bf16.msrb.mxu0 %v4878_v24  ;;  %3977 = vmatpush.bf16.msrb.mxu3 %v4865_v20 }
 0xd1c   : > { %4018 = vmatpush.bf16.msrb.mxu1 %v4886_v21 }
 0xd1d   : > { %v3220_v32 = vadd.f32 %v6782_v2, %v3214_v15  ;;  %v4885_v2 = vld [vmem:[#allocation10 + $0xa0] sm:$0xff] }
 0xd1f   : > { %v3223_v25 = vpack.c.bf16 %v3220_v32, %v3220_v32  ;;  %3996 = vmatpush.bf16.msrb.mxu0 %v4877_v52 }
 0xd20   : > { %4019 = vmatpush.bf16.msrb.mxu1 %v4885_v2 }
 0xd23   : > { %3997 = vmatpush.bf16.msrb.mxu0 %v4876_v28 }
 0xd24   : > { %4020 = vmatpush.bf16.msrb.mxu1 %v4884_v53 }
 0xd27   : > { %3998 = vmatpush.bf16.msrb.mxu0 %v4875_v45 }
 0xd28   : > { %4021 = vmatpush.bf16.msrb.mxu1 %v4883_v62 }
 0xd29   : > { %3444 = vmatmul.bf16.gmra.mxu3 %v3223_v25  ;;  %3467 = vmatmul.bf16.gmra.mxu0 %v3223_v25 }
 0xd2a   : > { %3490 = vmatmul.bf16.gmra.mxu1 %v3223_v25  ;;  %3513 = vmatmul.bf16.gmra.mxu2 %v3223_v25 }
 0xd2b   : > { %3999 = vmatpush.bf16.msrb.mxu0 %v4874_v9 }
 0xd2c   : > { %4022 = vmatpush.bf16.msrb.mxu1 %v4882_v58 }
 0xd2f   : > { %4000 = vmatpush.bf16.msrb.mxu0 %v4873_v23 }
 0xd30   : > { %4023 = vmatpush.bf16.msrb.mxu1 %v4881_v63 }
 0xd5d   : > { %v3458_v37 = vpop.f32.mrf.mxu0 }
 0xd5e   : > { %v6809_v3 = vadd.f32 %v3458_v37, %v6804_v4  ;;  %v3481_v30 = vpop.f32.mrf.mxu1 }
 0xd5f   : > { %v6812_v40 = vadd.f32 %v3481_v30, %v6806_v57 }
 0xd60   : > { %v3539_v48 = vmul.f32 0.044715, %v6809_v3 }
 0xd61   : > { %v3540_v51 = vmul.f32 0.044715, %v6812_v40 }
 0xd62   : > { %v3559_v26 = vmul.f32 %v3539_v48, %v6809_v3 }
 0xd63   : > { %v3560_v0 = vmul.f32 %v3540_v51, %v6812_v40  ;;  %v3435_v39 = vpop.f32.mrf.mxu3 }
 0xd64   : > { %v3579_v5 = vmul.f32 %v3559_v26, %v6809_v3  ;;  %v6824_v8 = vadd.f32 %v3435_v39, %v6815_v56  ;;  %v3504_v59 = vpop.f32.mrf.mxu2 }
 0xd65   : > { %v3580_v61 = vmul.f32 %v3560_v0, %v6812_v40  ;;  %v6828_v27 = vadd.f32 %v3504_v59, %v6818_v11  ;;  %v3460_v44 = vpop.f32.mrf.mxu0 }
 0xd66   : > { %v3599_v43 = vadd.f32 %v3579_v5, %v6809_v3  ;;  %v3538_v19 = vmul.f32 0.044715, %v6824_v8  ;;  %v3461_v38 = vadd.f32 %v3460_v44, %v6804_v4  ;;  %v3483_v55 = vpop.f32.mrf.mxu1  ;;  %v3519_v5 = vmul.f32 0.5, %v6809_v3 }
 0xd67   : > { %v3600_v15 = vadd.f32 %v3580_v61, %v6812_v40  ;;  %v3541_v32 = vmul.f32 0.044715, %v6828_v27  ;;  %v3484_v25 = vadd.f32 %v3483_v55, %v6806_v57  ;;  %v3518_v3 = vmul.f32 0.5, %v6824_v8 }
 0xd68   : > { %v3558_v34 = vmul.f32 %v3538_v19, %v6824_v8  ;;  %v3543_v17 = vmul.f32 0.044715, %v3461_v38  ;;  %v3619_v42 = vmul.f32 0.7978846, %v3599_v43  ;;  %v3523_v59 = vmul.f32 0.5, %v3461_v38 }
 0xd69   : > { %v3561_v49 = vmul.f32 %v3541_v32, %v6828_v27  ;;  %v3544_v54 = vmul.f32 0.044715, %v3484_v25  ;;  %v3620_v21 = vmul.f32 0.7978846, %v3600_v15  ;;  %v3520_v43 = vmul.f32 0.5, %v6812_v40 }
 0xd6a   : > { %v3578_v13 = vmul.f32 %v3558_v34, %v6824_v8  ;;  %v3563_v24 = vmul.f32 %v3543_v17, %v3461_v38  ;;  %5237 = vtanh.f32 %v3619_v42  ;;  %v3524_v19 = vmul.f32 0.5, %v3484_v25 }
 0xd6b   : > { %v3581_v1 = vmul.f32 %v3561_v49, %v6828_v27  ;;  %v3564_v33 = vmul.f32 %v3544_v54, %v3484_v25  ;;  %v3437_v52 = vpop.f32.mrf.mxu3  ;;  %5239 = vtanh.f32 %v3620_v21  ;;  %v3521_v40 = vmul.f32 0.5, %v6828_v27 }
 0xd6c   : > { %v3598_v2 = vadd.f32 %v3578_v13, %v6824_v8  ;;  %v3583_v31 = vmul.f32 %v3563_v24, %v3461_v38  ;;  %v3438_v16 = vadd.f32 %v3437_v52, %v6815_v56  ;;  %v3506_v28 = vpop.f32.mrf.mxu2 }
 0xd6d   : > { %v3601_v53 = vadd.f32 %v3581_v1, %v6828_v27  ;;  %v3584_v36 = vmul.f32 %v3564_v33, %v3484_v25  ;;  %v3507_v14 = vadd.f32 %v3506_v28, %v6818_v11 }
 0xd6e   : > { %v3603_v45 = vadd.f32 %v3583_v31, %v3461_v38  ;;  %v3542_v62 = vmul.f32 0.044715, %v3438_v16  ;;  %v3618_v10 = vmul.f32 0.7978846, %v3598_v2  ;;  %v3522_v38 = vmul.f32 0.5, %v3438_v16 }
 0xd6f   : > { %v3604_v47 = vadd.f32 %v3584_v36, %v3484_v25  ;;  %v3545_v18 = vmul.f32 0.044715, %v3507_v14  ;;  %v3621_v46 = vmul.f32 0.7978846, %v3601_v53  ;;  %v3525_v25 = vmul.f32 0.5, %v3507_v14 }
 0xd70   : > { %v3623_v9 = vmul.f32 0.7978846, %v3603_v45  ;;  %v3562_v58 = vmul.f32 %v3542_v62, %v3438_v16  ;;  %v5238_v30 = vpop.eup %5237 }
 0xd71   : > { %v3624_v35 = vmul.f32 0.7978846, %v3604_v47  ;;  %v3565_v23 = vmul.f32 %v3545_v18, %v3507_v14  ;;  %v5240_v41 = vpop.eup %5239  ;;  %v3659_v22 = vadd.f32 1.0, %v5238_v30 }
 0xd72   : > { %5241 = vtanh.f32 %v3623_v9  ;;  %v3582_v63 = vmul.f32 %v3562_v58, %v3438_v16  ;;  %v3660_v0 = vadd.f32 1.0, %v5240_v41 }
 0xd73   : > { %5243 = vtanh.f32 %v3624_v35  ;;  %v3585_v37 = vmul.f32 %v3565_v23, %v3507_v14  ;;  %v3679_v32 = vmul.f32 %v3659_v22, %v3519_v5 }
 0xd74   : > { %5245 = vtanh.f32 %v3618_v10  ;;  %v3602_v60 = vadd.f32 %v3582_v63, %v3438_v16  ;;  %v3680_v17 = vmul.f32 %v3660_v0, %v3520_v43 }
 0xd75   : > { %5247 = vtanh.f32 %v3621_v46  ;;  %v3605_v48 = vadd.f32 %v3585_v37, %v3507_v14 }
 0xd76   : > { %v3622_v20 = vmul.f32 0.7978846, %v3602_v60 }
 0xd77   : > { %v3625_v51 = vmul.f32 0.7978846, %v3605_v48 }
 0xd78   : > { %v5242_v26 = vpop.eup %5241  ;;  %5249 = vtanh.f32 %v3622_v20 }
 0xd79   : > { %v5244_v39 = vpop.eup %5243  ;;  %v3663_v61 = vadd.f32 1.0, %v5242_v26  ;;  %5251 = vtanh.f32 %v3625_v51 }
 0xd7a   : > { %v5246_v44 = vpop.eup %5245  ;;  %v3664_v55 = vadd.f32 1.0, %v5244_v39 }
 0xd7b   : > { %v5248_v15 = vpop.eup %5247  ;;  %v3683_v34 = vmul.f32 %v3663_v61, %v3523_v59  ;;  %v3658_v54 = vadd.f32 1.0, %v5246_v44 }
 0xd7c   : > { %v3684_v49 = vmul.f32 %v3664_v55, %v3524_v19  ;;  %v3661_v24 = vadd.f32 1.0, %v5248_v15 }
 0xd7d   : > { %v3699_v42 = vpack.c.bf16 %v3683_v34, %v3679_v32  ;;  %v3678_v2 = vmul.f32 %v3658_v54, %v3518_v3 }
 0xd7e   : > { %v5250_v13 = vpop.eup %5249  ;;  %v3700_v21 = vpack.c.bf16 %v3684_v49, %v3680_v17  ;;  %v3681_v28 = vmul.f32 %v3661_v24, %v3521_v40 }
 0xd7f   : > { %v5252_v1 = vpop.eup %5251  ;;  %v3662_v33 = vadd.f32 1.0, %v5250_v13  ;;  %4001 = vmatmul.bf16.vlgmr.msrb.gmra.mxu0 %v3699_v42 }
 0xd80   : > { %v3665_v52 = vadd.f32 1.0, %v5252_v1  ;;  %4024 = vmatmul.bf16.vlgmr.msrb.gmra.mxu1 %v3700_v21 }
 0xd81   : > { %v3682_v31 = vmul.f32 %v3662_v33, %v3522_v38 }
 0xd82   : > { %v3685_v53 = vmul.f32 %v3665_v52, %v3525_v25 }
 0xd83   : > { %v3698_v36 = vpack.c.bf16 %v3682_v31, %v3678_v2 }
 0xd84   : > { %v3701_v45 = vpack.c.bf16 %v3685_v53, %v3681_v28 }
 0xd85   : > { %3978 = vmatmul.bf16.vlgmr.msrb.gmra.mxu3 %v3698_v36 }
 0xd86   : > { %4047 = vmatmul.bf16.vlgmr.msrb.gmra.mxu2 %v3701_v45 }
 0xd96   : > { %v3463_v62 = vpop.f32.mrf.mxu0 }
 0xd97   : > { %v3464_v47 = vadd.f32 %v3463_v62, %v6804_v4  ;;  %v3486_v8 = vpop.f32.mrf.mxu1 }
 0xd98   : > { %v6850_v16 = vadd.f32 %v3486_v8, %v6806_v57 }
 0xd99   : > { %v3547_v18 = vmul.f32 0.044715, %v3464_v47 }
 0xd9a   : > { %v3548_v27 = vmul.f32 0.044715, %v6850_v16 }
 0xd9b   : > { %v3567_v14 = vmul.f32 %v3547_v18, %v3464_v47 }
 0xd9c   : > { %v3568_v10 = vmul.f32 %v3548_v27, %v6850_v16  ;;  %v3440_v9 = vpop.f32.mrf.mxu3  ;;  %v3527_v27 = vmul.f32 0.5, %v3464_v47 }
 0xd9d   : > { %v6855_v58 = vadd.f32 %v3440_v9, %v6815_v56  ;;  %v3509_v46 = vpop.f32.mrf.mxu2  ;;  %v3587_v35 = vmul.f32 %v3567_v14, %v3464_v47 }
 0xd9e   : > { %v6858_v23 = vadd.f32 %v3509_v46, %v6818_v11  ;;  %v3465_v63 = vpop.f32.mrf.mxu0  ;;  %v3588_v37 = vmul.f32 %v3568_v10, %v6850_v16  ;;  %v3528_v46 = vmul.f32 0.5, %v6850_v16 }
 0xd9f   : > { %v3546_v30 = vmul.f32 0.044715, %v6855_v58  ;;  %v3466_v60 = vadd.f32 %v3465_v63, %v6804_v4  ;;  %v3488_v41 = vpop.f32.mrf.mxu1  ;;  %v3607_v48 = vadd.f32 %v3587_v35, %v3464_v47 }
 0xda0   : > { %v3549_v20 = vmul.f32 0.044715, %v6858_v23  ;;  %v6865_v22 = vadd.f32 %v3488_v41, %v6806_v57  ;;  %v3608_v51 = vadd.f32 %v3588_v37, %v6850_v16 }
 0xda1   : > { %v3566_v26 = vmul.f32 %v3546_v30, %v6855_v58  ;;  %v3551_v0 = vmul.f32 0.044715, %v3466_v60  ;;  %v3627_v59 = vmul.f32 0.7978846, %v3607_v48  ;;  %v3531_v41 = vmul.f32 0.5, %v3466_v60 }
 0xda2   : > { %v3569_v39 = vmul.f32 %v3549_v20, %v6858_v23  ;;  %v3552_v5 = vmul.f32 0.044715, %v6865_v22  ;;  %v3628_v55 = vmul.f32 0.7978846, %v3608_v51 }
 0xda3   : > { %v3571_v61 = vmul.f32 %v3551_v0, %v3466_v60  ;;  %v3586_v44 = vmul.f32 %v3566_v26, %v6855_v58  ;;  %5253 = vtanh.f32 %v3627_v59 }
 0xda4   : > { %v3572_v43 = vmul.f32 %v3552_v5, %v6865_v22  ;;  %v3442_v19 = vpop.f32.mrf.mxu3  ;;  %v3589_v13 = vmul.f32 %v3569_v39, %v6858_v23  ;;  %5255 = vtanh.f32 %v3628_v55 }
 0xda5   : > { %v6874_v15 = vadd.f32 %v3442_v19, %v6815_v56  ;;  %v3511_v32 = vpop.f32.mrf.mxu2  ;;  %v3591_v34 = vmul.f32 %v3571_v61, %v3466_v60  ;;  %v3606_v17 = vadd.f32 %v3586_v44, %v6855_v58 }
 0xda6   : > { %v6878_v49 = vadd.f32 %v3511_v32, %v6818_v11  ;;  %v3468_v54 = vpop.f32.mrf.mxu0  ;;  %v3592_v42 = vmul.f32 %v3572_v43, %v6865_v22  ;;  %v3609_v36 = vadd.f32 %v3589_v13, %v6858_v23 }
 0xda7   : > { %v3550_v24 = vmul.f32 0.044715, %v6874_v15  ;;  %v6884_v21 = vadd.f32 %v3468_v54, %v6804_v4  ;;  %v3491_v1 = vpop.f32.mrf.mxu1  ;;  %v3611_v3 = vadd.f32 %v3591_v34, %v3466_v60  ;;  %v3626_v31 = vmul.f32 0.7978846, %v3606_v17 }
 0xda8   : > { %v3553_v38 = vmul.f32 0.044715, %v6878_v49  ;;  %v6888_v33 = vadd.f32 %v3491_v1, %v6806_v57  ;;  %v3612_v40 = vadd.f32 %v3592_v42, %v6865_v22  ;;  %v3629_v48 = vmul.f32 0.7978846, %v3609_v36 }
 0xda9   : > { %v3570_v25 = vmul.f32 %v3550_v24, %v6874_v15  ;;  %v3555_v52 = vmul.f32 0.044715, %v6884_v21  ;;  %v3631_v2 = vmul.f32 0.7978846, %v3611_v3  ;;  %v5254_v62 = vpop.eup %5253  ;;  %v3532_v34 = vmul.f32 0.5, %v6865_v22 }
 0xdaa   : > { %v3573_v28 = vmul.f32 %v3553_v38, %v6878_v49  ;;  %v3556_v4 = vmul.f32 0.044715, %v6888_v33  ;;  %v3632_v53 = vmul.f32 0.7978846, %v3612_v40  ;;  %v5256_v63 = vpop.eup %5255 }
 0xdab   : > { %v3575_v45 = vmul.f32 %v3555_v52, %v6884_v21  ;;  %5257 = vtanh.f32 %v3631_v2  ;;  %v3590_v57 = vmul.f32 %v3570_v25, %v6874_v15  ;;  %v3668_v60 = vadd.f32 1.0, %v5256_v63 }
 0xdac   : > { %v3576_v8 = vmul.f32 %v3556_v4, %v6888_v33  ;;  %v3445_v18 = vpop.f32.mrf.mxu3  ;;  %5259 = vtanh.f32 %v3632_v53  ;;  %v3593_v14 = vmul.f32 %v3573_v28, %v6878_v49 }
 0xdad   : > { %v6901_v10 = vadd.f32 %v3445_v18, %v6815_v56  ;;  %v3514_v9 = vpop.f32.mrf.mxu2  ;;  %v3610_v35 = vadd.f32 %v3590_v57, %v6874_v15  ;;  %5261 = vtanh.f32 %v3626_v31  ;;  %v3667_v56 = vadd.f32 1.0, %v5254_v62 }
 0xdae   : > { %v6906_v37 = vadd.f32 %v3514_v9, %v6818_v11  ;;  %v3470_v30 = vpop.f32.mrf.mxu0  ;;  %v3613_v47 = vadd.f32 %v3593_v14, %v6878_v49  ;;  %v3595_v0 = vmul.f32 %v3575_v45, %v6884_v21  ;;  %5263 = vtanh.f32 %v3629_v48 }
 0xdaf   : > { %v3554_v20 = vmul.f32 0.044715, %v6901_v10  ;;  %v3493_v51 = vpop.f32.mrf.mxu1  ;;  %v3630_v26 = vmul.f32 0.7978846, %v3610_v35  ;;  %v3596_v5 = vmul.f32 %v3576_v8, %v6888_v33  ;;  %v3687_v24 = vmul.f32 %v3667_v56, %v3527_v27 }
 0xdb0   : > { %v3557_v16 = vmul.f32 0.044715, %v6906_v37  ;;  %v3633_v39 = vmul.f32 0.7978846, %v3613_v47  ;;  %v3615_v61 = vadd.f32 %v3595_v0, %v6884_v21  ;;  %v3688_v25 = vmul.f32 %v3668_v60, %v3528_v46 }
 0xdb1   : > { %v5258_v11 = vpop.eup %5257  ;;  %v3574_v59 = vmul.f32 %v3554_v20, %v6901_v10  ;;  %5265 = vtanh.f32 %v3630_v26  ;;  %v3616_v55 = vadd.f32 %v3596_v5, %v6888_v33  ;;  %v3526_v8 = vmul.f32 0.5, %v6855_v58 }
 0xdb2   : > { %v5260_v44 = vpop.eup %5259  ;;  %v3577_v43 = vmul.f32 %v3557_v16, %v6906_v37  ;;  %v3671_v19 = vadd.f32 1.0, %v5258_v11  ;;  %5267 = vtanh.f32 %v3633_v39  ;;  %v3635_v54 = vmul.f32 0.7978846, %v3615_v61 }
 0xdb3   : > { %v5262_v32 = vpop.eup %5261  ;;  %v3672_v17 = vadd.f32 1.0, %v5260_v44  ;;  %v3594_v42 = vmul.f32 %v3574_v59, %v6901_v10  ;;  %v3636_v3 = vmul.f32 0.7978846, %v3616_v55  ;;  %v3530_v18 = vmul.f32 0.5, %v6874_v15 }
 0xdb4   : > { %v3447_v13 = vpop.f32.mrf.mxu3  ;;  %v3691_v1 = vmul.f32 %v3671_v19, %v3531_v41  ;;  %v3597_v38 = vmul.f32 %v3577_v43, %v6906_v37  ;;  %5269 = vtanh.f32 %v3635_v54  ;;  %v5264_v31 = vpop.eup %5263  ;;  %v3666_v4 = vadd.f32 1.0, %v5262_v32 }
 0xdb5   : > { %v3516_v40 = vpop.f32.mrf.mxu2  ;;  %v3692_v52 = vmul.f32 %v3672_v17, %v3532_v34  ;;  %v3614_v2 = vadd.f32 %v3594_v42, %v6901_v10  ;;  %5271 = vtanh.f32 %v3636_v3  ;;  %v3669_v45 = vadd.f32 1.0, %v5264_v31 }
 0xdb6   : > { %v3703_v28 = vpack.c.bf16 %v3691_v1, %v3687_v24  ;;  %v3617_v22 = vadd.f32 %v3597_v38, %v6906_v37  ;;  %v3529_v9 = vmul.f32 0.5, %v6858_v23  ;;  %v3533_v46 = vmul.f32 0.5, %v6878_v49 }
 0xdb7   : > { %v5266_v53 = vpop.eup %5265  ;;  %v3704_v36 = vpack.c.bf16 %v3692_v52, %v3688_v25  ;;  %v3634_v57 = vmul.f32 0.7978846, %v3614_v2  ;;  %v3686_v63 = vmul.f32 %v3666_v4, %v3526_v8  ;;  %v3535_v26 = vmul.f32 0.5, %v6884_v21 }
 0xdb8   : > { %v5268_v62 = vpop.eup %5267  ;;  %4006 = vmatmul.bf16.gmra.mxu0 %v3703_v28  ;;  %v3670_v27 = vadd.f32 1.0, %v5266_v53  ;;  %v3637_v14 = vmul.f32 0.7978846, %v3617_v22  ;;  %v3689_v47 = vmul.f32 %v3669_v45, %v3529_v9  ;;  %v3536_v49 = vmul.f32 0.5, %v6888_v33  ;;  %v5044_v33 = vld [vmem:[%s6982_s20] ss:$0 sm:$0xff] }
 0xdb9   : > { %4029 = vmatmul.bf16.gmra.mxu1 %v3704_v36  ;;  %v3673_v35 = vadd.f32 1.0, %v5268_v62  ;;  %5273 = vtanh.f32 %v3634_v57  ;;  %v3534_v60 = vmul.f32 0.5, %v6901_v10  ;;  %v3537_v44 = vmul.f32 0.5, %v6906_v37 }
 0xdba   : > { %v3690_v30 = vmul.f32 %v3670_v27, %v3530_v18  ;;  %v5270_v41 = vpop.eup %5269  ;;  %5275 = vtanh.f32 %v3637_v14 }
 0xdbb   : > { %v3693_v48 = vmul.f32 %v3673_v35, %v3533_v46  ;;  %v5272_v20 = vpop.eup %5271  ;;  %v3675_v15 = vadd.f32 1.0, %v5270_v41 }
 0xdbc   : > { %v3702_v51 = vpack.c.bf16 %v3690_v30, %v3686_v63  ;;  %v3676_v56 = vadd.f32 1.0, %v5272_v20 }
 0xdbd   : > { %v3705_v58 = vpack.c.bf16 %v3693_v48, %v3689_v47  ;;  %v3695_v16 = vmul.f32 %v3675_v15, %v3535_v26 }
 0xdbe   : > { %3983 = vmatmul.bf16.gmra.mxu3 %v3702_v51  ;;  %v3696_v39 = vmul.f32 %v3676_v56, %v3536_v49 }
 0xdbf   : > { %4052 = vmatmul.bf16.gmra.mxu2 %v3705_v58  ;;  %v5274_v23 = vpop.eup %5273  ;;  %v3707_v59 = vpack.c.bf16 %v3695_v16, %v3695_v16 }
 0xdc0   : > { %v5276_v0 = vpop.eup %5275  ;;  %v3674_v5 = vadd.f32 1.0, %v5274_v23  ;;  %v3708_v61 = vpack.c.bf16 %v3696_v39, %v3696_v39 }
 0xdc1   : > { %v3677_v11 = vadd.f32 1.0, %v5276_v0 }
 0xdc2   : > { %v3694_v43 = vmul.f32 %v3674_v5, %v3534_v60 }
 0xdc3   : > { %v3697_v19 = vmul.f32 %v3677_v11, %v3537_v44 }
 0xdc4   : > { %v3706_v21 = vpack.c.bf16 %v3694_v43, %v3694_v43 }
 0xdc5   : > { %v3709_v55 = vpack.c.bf16 %v3697_v19, %v3697_v19 }
 0xdc8   : > { %4011 = vmatmul.bf16.gmra.mxu0 %v3707_v59 }
 0xdc9   : > { %4034 = vmatmul.bf16.gmra.mxu1 %v3708_v61 }
 0xdce   : > { %3988 = vmatmul.bf16.gmra.mxu3 %v3706_v21 }
 0xdcf   : > { %4057 = vmatmul.bf16.gmra.mxu2 %v3709_v55 }
 0xdfc   : > { %v4002_v32 = vpop.f32.mrf.mxu0 }
 0xdfd   : > { %v4025_v10 = vpop.f32.mrf.mxu1 }
 0xe04   : > { %v4004_v38 = vpop.f32.mrf.mxu0 }
 0xe05   : > { %v4027_v25 = vpop.f32.mrf.mxu1 }
 0xe08   : > { %v3979_v34 = vpop.f32.mrf.mxu3 }
 0xe09   : > { %v3980_v17 = vadd.f32 %v5044_v33, %v3979_v34  ;;  %v4048_v42 = vpop.f32.mrf.mxu2 }
 0xe0b   : > { %v4003_v54 = vadd.f32 %v4002_v32, %v3980_v17 }
 0xe0d   : > { %v4026_v37 = vadd.f32 %v4025_v10, %v4003_v54 }
 0xe0f   : > { %v4049_v13 = vadd.f32 %v4048_v42, %v4026_v37 }
 0xe10   : > { %v3981_v24 = vpop.f32.mrf.mxu3 }
 0xe11   : > { %v4062_v1 = vadd.f32 %v4049_v13, %v6530_v7  ;;  %v3982_v3 = vadd.f32 %v5044_v33, %v3981_v24  ;;  %v4050_v2 = vpop.f32.mrf.mxu2 }
 0xe13   : > { %4067 = vst [vmem:[%s6938_s17] sm:$0xff] %v4062_v1  ;;  %v4005_v40 = vadd.f32 %v4004_v38, %v3982_v3 }
 0xe15   : > { %v4028_v52 = vadd.f32 %v4027_v25, %v4005_v40 }
 0xe17   : > { %v4051_v31 = vadd.f32 %v4050_v2, %v4028_v52 }
 0xe19   : > { %v4063_v28 = vadd.f32 %v4051_v31, %v6534_v29 }
 0xe1b   : > { %4068 = vst [vmem:[%s6938_s17 + $0x8] sm:$0xff] %v4063_v28 }
 0xe35   : > { %v4007_v4 = vpop.f32.mrf.mxu0 }
 0xe36   : > { %v4030_v22 = vpop.f32.mrf.mxu1 }
 0xe3d   : > { %v4009_v53 = vpop.f32.mrf.mxu0 }
 0xe3e   : > { %v4032_v36 = vpop.f32.mrf.mxu1 }
 0xe41   : > { %v3984_v45 = vpop.f32.mrf.mxu3 }
 0xe42   : > { %v3985_v57 = vadd.f32 %v5044_v33, %v3984_v45  ;;  %v4053_v62 = vpop.f32.mrf.mxu2 }
 0xe44   : > { %v4008_v7 = vadd.f32 %v4007_v4, %v3985_v57 }
 0xe45   : > { %v4012_v8 = vpop.f32.mrf.mxu0 }
 0xe46   : > { %v4031_v18 = vadd.f32 %v4030_v22, %v4008_v7  ;;  %v4035_v27 = vpop.f32.mrf.mxu1 }
 0xe48   : > { %v4054_v14 = vadd.f32 %v4053_v62, %v4031_v18 }
 0xe49   : > { %v3986_v9 = vpop.f32.mrf.mxu3 }
 0xe4a   : > { %v4064_v46 = vadd.f32 %v4054_v14, %v6538_v50  ;;  %v3987_v35 = vadd.f32 %v5044_v33, %v3986_v9  ;;  %v4055_v29 = vpop.f32.mrf.mxu2 }
 0xe4c   : > { %4069 = vst [vmem:[%s6938_s17 + $0x10] sm:$0xff] %v4064_v46  ;;  %v4010_v63 = vadd.f32 %v4009_v53, %v3987_v35 }
 0xe4d   : > { %v4014_v30 = vpop.f32.mrf.mxu0 }
 0xe4e   : > { %v4033_v41 = vadd.f32 %v4032_v36, %v4010_v63  ;;  %v4037_v47 = vpop.f32.mrf.mxu1 }
 0xe50   : > { %v4056_v48 = vadd.f32 %v4055_v29, %v4033_v41 }
 0xe51   : > { %v3989_v20 = vpop.f32.mrf.mxu3 }
 0xe52   : > { %v4065_v51 = vadd.f32 %v4056_v48, %v6542_v6  ;;  %v3990_v58 = vadd.f32 %v5044_v33, %v3989_v20  ;;  %v4058_v15 = vpop.f32.mrf.mxu2 }
 0xe54   : > { %4070 = vst [vmem:[%s6938_s17 + $0x18] sm:$0xff] %v4065_v51  ;;  %v4013_v56 = vadd.f32 %v4012_v8, %v3990_v58 }
 0xe56   : > { %v4036_v26 = vadd.f32 %v4035_v27, %v4013_v56 }
 0xe58   : > { %v4059_v23 = vadd.f32 %v4058_v15, %v4036_v26 }
 0xe59   : > { %v3991_v49 = vpop.f32.mrf.mxu3 }
 0xe5a   : > { %v4066_v50 = vadd.f32 %v4059_v23, %v6546_v12  ;;  %v4060_v0 = vpop.f32.mrf.mxu2 }
 0xe5c   : > { %4071 = vst [vmem:[%s6938_s17 + $0x20] sm:$0xff] %v4066_v50 }
 0xe5d PF: > { %s29_s18 = sadd.s32 1, %s5489_s18  }
 0xe5e   : > { %p26_p7 = scmp.ge.s32.totalorder %s29_s18, 4  }
 0xe60   :  { %28 = sbr.rel (!%p26_p7) target bundleno = 10 (0xa), region = 136 }
 0xe65   :  { %4094 = vsyncpa [#allocation3], 1 }
 0xe66   :  { %4096 = vsyncpa [#allocation3 + $0x1], 1 }
 0xe67   :  { %4097 = vsyncpa [#allocation5], 1 }
 0xe68   :  { %4098 = vsyncpa [#allocation8], 1 }
 0xe69   :  { %4099 = vsyncpa [#allocation11], 1 }

</bundles_post_ra>
